<compile_context>
chip_gen: v5e
topology: v5e:2x2
jax: 0.10.0
libtpu: 0.0.40
codegen_flags: <defaults>
</compile_context>

<pallas_src>
from functools import partial

import jax
import jax.numpy as jnp
from jax.experimental import pallas as pl
from jax.experimental.pallas import tpu as pltpu

_MM_DTYPE = jnp.bfloat16       # MXU operand dtype; accumulation stays f32
_ACT_DTYPE = jnp.bfloat16      # inter-kernel activation dtype
_EPS = 1e-5
_NEG_INF = -1e9
_APPROX_RECIP = True           # pl.reciprocal(approx=True) for softmax denom (EUP slot)
                               # set False for exact parity checks vs. PyTorch


# ----------------------------------------------------------------------------
# Generation-aware sizing (VMEM limit, tile sizes)
# ----------------------------------------------------------------------------
_TPU_VMEM_BYTES = None


def _vmem_bytes():
    global _TPU_VMEM_BYTES
    if _TPU_VMEM_BYTES is None:
        try:
            _TPU_VMEM_BYTES = int(pltpu.get_tpu_info().vmem_capacity_bytes)
        except Exception:
            _TPU_VMEM_BYTES = 128 * 1024 * 1024
    return _TPU_VMEM_BYTES


def _small_vmem():             # v7x-class chip: 64 MiB VMEM per TensorCore
    return _vmem_bytes() <= 64 * 1024 * 1024


def _vmem_limit():             # scoped-VMEM limit per review: ~96 MiB v5e/v6e, ~48 MiB v7x
    return (48 if _small_vmem() else 96) * 1024 * 1024


def _row_tile_max():           # row tile for memory-bound row-wise kernels
    return 512 if _small_vmem() else 1024


def _target_block_rows():      # target rows (TB * N_pad) per transformer grid step
    return 256 if _small_vmem() else 512


# ----------------------------------------------------------------------------
# In-kernel helpers
# ----------------------------------------------------------------------------
def _ln(x, g, b):
    mu = jnp.mean(x, axis=-1, keepdims=True)
    var = jnp.mean(jnp.square(x - mu), axis=-1, keepdims=True)
    return (x - mu) * jax.lax.rsqrt(var + _EPS) * g + b


def _softmax_rows(logits):
    m = jnp.max(logits, axis=-1, keepdims=True)
    p = jnp.exp(logits - m)
    denom = jnp.sum(p, axis=-1, keepdims=True)
    if _APPROX_RECIP:
        return p * pl.reciprocal(denom, approx=True)
    return p / denom


# ----------------------------------------------------------------------------
# Fused (depth-stacked) transformer kernel
# ----------------------------------------------------------------------------
def _tf_kernel(x_ref, bias_ref,
               ln1g, ln1b, wqkv, bqkv, wo, bo,
               ln2g, ln2b, w1, b1, w2, b2,
               o_ref, res_scr, attn_scr, *, tb, n, heads, dim_head):
    f32 = jnp.float32
    d = pl.program_id(1)
    inner = heads * dim_head

    @pl.when(d == 0)
    def _():
        res_scr[...] = x_ref[...].astype(f32)      # load residual stream once per tile

    x = res_scr[...]                               # (TB*N, D) f32

    # ---- attention (pre-norm; softmax scale pre-folded into the Q cols of wqkv) ----
    h = _ln(x, ln1g[0].astype(f32), ln1b[0].astype(f32))
    qkv = jnp.dot(h.astype(_MM_DTYPE), wqkv[0],
                  preferred_element_type=f32) + bqkv[0].astype(f32)   # (TB*N, 3*inner)

    for hi in range(heads):                        # static unroll over heads
        lo = hi * dim_head
        qh = qkv[:, lo:lo + dim_head].reshape(tb, n, dim_head)
        kh = qkv[:, inner + lo:inner + lo + dim_head].reshape(tb, n, dim_head)
        vh = qkv[:, 2 * inner + lo:2 * inner + lo + dim_head].reshape(tb, n, dim_head)
        logits = jnp.einsum("bqd,bkd->bqk",
                            qh.astype(_MM_DTYPE), kh.astype(_MM_DTYPE),
                            preferred_element_type=f32)               # (TB, N, N)
        logits = logits + bias_ref[0, hi].astype(f32)                 # shared graph bias
        p = _softmax_rows(logits)
        oh = jnp.einsum("bqk,bkd->bqd",
                        p.astype(_MM_DTYPE), vh.astype(_MM_DTYPE),
                        preferred_element_type=f32)                   # (TB, N, dh)
        attn_scr[:, lo:lo + dim_head] = oh.reshape(tb * n, dim_head)  # scratch write

    x = x + jnp.dot(attn_scr[...].astype(_MM_DTYPE), wo[0],
                    preferred_element_type=f32) + bo[0].astype(f32)

    # ---- MLP (pre-norm) ----
    h = _ln(x, ln2g[0].astype(f32), ln2b[0].astype(f32))
    h = jax.nn.gelu(jnp.dot(h.astype(_MM_DTYPE), w1[0],
                            preferred_element_type=f32) + b1[0].astype(f32))
    x = x + jnp.dot(h.astype(_MM_DTYPE), w2[0],
                    preferred_element_type=f32) + b2[0].astype(f32)

    res_scr[...] = x

    @pl.when(d == pl.num_programs(1) - 1)
    def _():
        o_ref[...] = x.astype(o_ref.dtype)


def _pad_attn_bias(bias, n_pad):
    """(1,H,N,N) -> (1,H,n_pad,n_pad); padded key columns masked with -1e9."""
    _, H, N, _ = bias.shape
    if n_pad == N:
        return bias
    out = jnp.full((1, H, n_pad, n_pad), _NEG_INF, dtype=bias.dtype)
    return out.at[:, :, :N, :N].set(bias)


_TF_WEIGHT_KEYS = ("ln1g", "ln1b", "wqkv", "bqkv", "wo", "bo",
                   "ln2g", "ln2b", "w1", "b1", "w2", "b2")


def fused_transformer(x, bias, tfp, heads, dim_head):
    """x: (B, N, D) activations; bias: (1, H, N, N) f32 graph bias (shared).

    Runs all `depth` blocks in a single pallas_call (weights stacked along depth,
    prefetched across the 'arbitrary' depth grid axis; residual stream kept in a
    VMEM scratch).
    """
    B, N, D = x.shape
    H = bias.shape[1]
    n_pad = ((N + 7) // 8) * 8
    depth = tfp["wqkv"].shape[0]
    inner = heads * dim_head
    mlp_dim = tfp["w1"].shape[-1]

    tb = min(max(1, _target_block_rows() // n_pad), B)
    Bp = ((B + tb - 1) // tb) * tb
    rows = tb * n_pad
    nbt = Bp // tb

    xp = x
    if n_pad != N or Bp != B:
        xp = jnp.pad(x, ((0, Bp - B), (0, n_pad - N), (0, 0)))
    xr = xp.reshape(Bp * n_pad, D)
    bias_p = _pad_attn_bias(bias, n_pad)

    weights = [tfp[k] for k in _TF_WEIGHT_KEYS]          # all (depth, r, c)

    x_spec = pl.BlockSpec((rows, D), lambda i, d: (i, 0))
    bias_spec = pl.BlockSpec((1, H, n_pad, n_pad), lambda i, d: (0, 0, 0, 0))
    w_specs = [pl.BlockSpec((1,) + w.shape[1:], lambda i, d: (d, 0, 0))
               for w in weights]

    flops = int(nbt * depth * (
        2 * rows * D * (3 * inner) + 2 * rows * inner * D
        + 2 * rows * D * mlp_dim + 2 * rows * mlp_dim * D
        + 4 * tb * heads * n_pad * n_pad * dim_head))
    transcendentals = int(nbt * depth * (tb * heads * n_pad * n_pad + rows * mlp_dim))
    w_bytes = sum(int(w.size) * w.dtype.itemsize for w in weights)
    bytes_accessed = int(w_bytes + int(bias_p.size) * bias_p.dtype.itemsize
                         + 2 * Bp * n_pad * D * x.dtype.itemsize)

    out = pl.pallas_call(
        partial(_tf_kernel, tb=tb, n=n_pad, heads=heads, dim_head=dim_head),
        grid=(nbt, depth),
        in_specs=[x_spec, bias_spec] + w_specs,
        out_specs=pl.BlockSpec((rows, D), lambda i, d: (i, 0)),
        out_shape=jax.ShapeDtypeStruct((Bp * n_pad, D), x.dtype),
        scratch_shapes=[pltpu.VMEM((rows, D), jnp.float32),      # residual stream
                        pltpu.VMEM((rows, inner), jnp.float32)], # attention output
        compiler_params=pltpu.CompilerParams(
            dimension_semantics=("parallel", "arbitrary"),
            vmem_limit_bytes=_vmem_limit()),
        cost_estimate=pl.CostEstimate(flops=flops,
                                      transcendentals=transcendentals,
                                      bytes_accessed=bytes_accessed),
    )(xr, bias_p, *weights)
    return out.reshape(Bp, n_pad, D)[:B, :N]


# ----------------------------------------------------------------------------
# Fused dual NodeEmbedding kernel (features + velocity, summed)
# ----------------------------------------------------------------------------
_NODE_KEYS = ("ln1_g", "ln1_b", "w1", "b1", "w2", "b2", "ln2_g", "ln2_b")


def _node_pair_kernel(px_ref, pv_ref,
                      a_ln1g, a_ln1b, a_w1, a_b1, a_w2, a_b2, a_ln2g, a_ln2b,
                      b_ln1g, b_ln1b, b_w1, b_b1, b_w2, b_b2, b_ln2g, b_ln2b,
                      o_ref):
    f32 = jnp.float32

    def branch(x, ln1g, ln1b, w1, b1, w2, b2, ln2g, ln2b):
        h = _ln(x, ln1g[...].astype(f32), ln1b[...].astype(f32))
        h = jax.nn.gelu(jnp.dot(h.astype(_MM_DTYPE), w1[...],
                                preferred_element_type=f32) + b1[...].astype(f32))
        h = jnp.dot(h.astype(_MM_DTYPE), w2[...],
                    preferred_element_type=f32) + b2[...].astype(f32)
        return _ln(h, ln2g[...].astype(f32), ln2b[...].astype(f32))

    y = branch(px_ref[...].astype(f32),
               a_ln1g, a_ln1b, a_w1, a_b1, a_w2, a_b2, a_ln2g, a_ln2b) \
        + branch(pv_ref[...].astype(f32),
                 b_ln1g, b_ln1b, b_w1, b_b1, b_w2, b_b2, b_ln2g, b_ln2b)
    o_ref[...] = y.astype(o_ref.dtype)


def node_embed_pair(px, pv, pa, pb, dim):
    """px, pv: (M, patch_dim) -> (M, dim) = NodeEmbed_a(px) + NodeEmbed_b(pv)."""
    M, PD = px.shape
    tm = min(M, _row_tile_max())
    if tm < M:
        tm = max(8, (tm // 8) * 8)
    Mp = ((M + tm - 1) // tm) * tm
    if Mp != M:
        pad = ((0, Mp - M), (0, 0))
        px = jnp.pad(px, pad)
        pv = jnp.pad(pv, pad)

    weights = [pa[k] for k in _NODE_KEYS] + [pb[k] for k in _NODE_KEYS]
    x_spec = pl.BlockSpec((tm, PD), lambda i: (i, 0))
    w_specs = [pl.BlockSpec(w.shape, lambda i: (0, 0)) for w in weights]

    out = pl.pallas_call(
        _node_pair_kernel,
        grid=(Mp // tm,),
        in_specs=[x_spec, x_spec] + w_specs,
        out_specs=pl.BlockSpec((tm, dim), lambda i: (i, 0)),
        out_shape=jax.ShapeDtypeStruct((Mp, dim), jnp.float32),
        compiler_params=pltpu.CompilerParams(dimension_semantics=("parallel",),
                                             vmem_limit_bytes=_vmem_limit()),
    )(px, pv, *weights)
    return out[:M]


# ----------------------------------------------------------------------------
# Row-tiled LayerNorm and fused LayerNorm + classification head
# ----------------------------------------------------------------------------
def _ln_kernel(x_ref, g_ref, b_ref, o_ref):
    o_ref[...] = _ln(x_ref[...].astype(jnp.float32),
                     g_ref[...].astype(jnp.float32),
                     b_ref[...].astype(jnp.float32)).astype(o_ref.dtype)


def pallas_layernorm(x, g, b):
    D = x.shape[-1]
    lead = x.shape[:-1]
    x2 = x.reshape(-1, D)
    M = x2.shape[0]
    tm = min(M, _row_tile_max())
    if tm < M:
        tm = max(8, (tm // 8) * 8)
    Mp = ((M + tm - 1) // tm) * tm
    if Mp != M:
        x2 = jnp.pad(x2, ((0, Mp - M), (0, 0)))
    out = pl.pallas_call(
        _ln_kernel,
        grid=(Mp // tm,),
        in_specs=[pl.BlockSpec((tm, D), lambda i: (i, 0)),
                  pl.BlockSpec((1, D), lambda i: (0, 0)),
                  pl.BlockSpec((1, D), lambda i: (0, 0))],
        out_specs=pl.BlockSpec((tm, D), lambda i: (i, 0)),
        out_shape=jax.ShapeDtypeStruct((Mp, D), x.dtype),
        compiler_params=pltpu.CompilerParams(dimension_semantics=("parallel",),
                                             vmem_limit_bytes=_vmem_limit()),
    )(x2, g.reshape(1, D), b.reshape(1, D))
    return out[:M].reshape(lead + (D,))


def _ln_head_kernel(x_ref, g_ref, b_ref, w_ref, hb_ref, o_ref):
    f32 = jnp.float32
    h = _ln(x_ref[...].astype(f32), g_ref[...].astype(f32), b_ref[...].astype(f32))
    o_ref[...] = (jnp.dot(h.astype(_MM_DTYPE), w_ref[...],
                          preferred_element_type=f32)
                  + hb_ref[...].astype(f32)).astype(o_ref.dtype)


def pallas_ln_head(x, g, b, w, hb):
    """x: (B, D); w: (D, Cp) bf16 (padded to 128 lanes); hb: (1, Cp) f32."""
    B, D = x.shape
    Cp = w.shape[1]
    return pl.pallas_call(
        _ln_head_kernel,
        grid=(1,),
        in_specs=[pl.BlockSpec((B, D), lambda i: (0, 0)),
                  pl.BlockSpec((1, D), lambda i: (0, 0)),
                  pl.BlockSpec((1, D), lambda i: (0, 0)),
                  pl.BlockSpec((D, Cp), lambda i: (0, 0)),
                  pl.BlockSpec((1, Cp), lambda i: (0, 0))],
        out_specs=pl.BlockSpec((B, Cp), lambda i: (0, 0)),
        out_shape=jax.ShapeDtypeStruct((B, Cp), jnp.float32),
        compiler_params=pltpu.CompilerParams(vmem_limit_bytes=_vmem_limit()),
    )(x, g.reshape(1, D), b.reshape(1, D), w, hb)


# ----------------------------------------------------------------------------
# Once-per-forward glue (plain JAX: tiny, gather-heavy, launch-bound in Pallas)
# ----------------------------------------------------------------------------
def video_to_patches(x, ph, pw, fps):
    # x: (b, c, F, H, W) -> (b, f, h*w, ph*pw*fps*c)
    b, c, F, H, W = x.shape
    f, hg, wg = F // fps, H // ph, W // pw
    x = x.reshape(b, c, f, fps, hg, ph, wg, pw)
    x = jnp.transpose(x, (0, 2, 4, 6, 5, 7, 3, 1))   # b f hg wg ph pw fps c
    return x.reshape(b, f, hg * wg, ph * pw * fps * c)


def centrality(embed_table, b, f, H, W, ph, pw, fps):
    rows, cols = jnp.arange(H), jnp.arange(W)
    deg_r = jnp.where((rows == 0) | (rows == H - 1), 1, 2)
    deg_c = jnp.where((cols == 0) | (cols == W - 1), 1, 2)
    deg = deg_r[:, None] + deg_c[None, :]                   # (H, W)
    emb = embed_table[deg]                                  # (H, W, cd)
    cd = embed_table.shape[1]
    hg, wg = H // ph, W // pw
    emb = jnp.broadcast_to(emb[None], (fps, H, W, cd))
    emb = emb.reshape(fps, hg, ph, wg, pw, cd)
    emb = jnp.transpose(emb, (1, 3, 2, 4, 0, 5))            # hg wg ph pw fps cd
    emb = emb.reshape(hg * wg, ph * pw * fps * cd)          # (n, dim)
    return jnp.broadcast_to(emb[None, None], (b, f, hg * wg, emb.shape[-1]))


def spatial_attn_bias(p, hgrid, wgrid, ph, pw, heads, max_dist):
    hi, wi = jnp.meshgrid(jnp.arange(hgrid), jnp.arange(wgrid), indexing="ij")
    hi, wi = hi.reshape(-1), wi.reshape(-1)
    ch = (hi.astype(jnp.float32) + 0.5) * ph
    cw = (wi.astype(jnp.float32) + 0.5) * pw
    euclid = jnp.sqrt((ch[:, None] - ch[None, :]) ** 2 +
                      (cw[:, None] - cw[None, :]) ** 2)            # (n, n)
    hop = jnp.clip(jnp.abs(hi[:, None] - hi[None, :]) +
                   jnp.abs(wi[:, None] - wi[None, :]), 0, max_dist)
    n = euclid.shape[0]
    e = euclid.reshape(n * n, 1)
    e = jax.nn.gelu(e @ p["ew1"] + p["eb1"])
    e = jax.nn.gelu(e @ p["ew2"] + p["eb2"])
    e = e @ p["ew3"] + p["eb3"]
    bias = e.reshape(n, n, heads) + p["hop_embed"][hop]            # (n, n, H)
    bias = jnp.transpose(bias, (2, 0, 1))                          # (H, n, n)
    bias = jnp.pad(bias, ((0, 0), (1, 0), (1, 0)))                 # cls row/col = 0
    return bias[None].astype(jnp.float32)                          # (1, H, n+1, n+1)


def temporal_attn_bias(p, f, heads):
    ti = jnp.arange(f)
    dist = jnp.abs(ti[:, None] - ti[None, :]).astype(jnp.float32).reshape(f * f, 1)
    e = jax.nn.gelu(dist @ p["tw1"] + p["tb1"])
    e = e @ p["tw2"] + p["tb2"]
    bias = jnp.transpose(e.reshape(f, f, heads), (2, 0, 1))
    bias = jnp.pad(bias, ((0, 0), (1, 0), (1, 0)))
    return bias[None].astype(jnp.float32)                          # (1, H, f+1, f+1)


# ----------------------------------------------------------------------------
# Forward
# ----------------------------------------------------------------------------
def forward(prep, x, cfg):
    ph = pw = cfg["patch"]
    fps = cfg["frame_patch_size"]
    dim, heads, dh = cfg["dim"], cfg["heads"], cfg["dim_head"]
    b, c, F, H, W = x.shape
    f, hg, wg = F // fps, H // ph, W // pw
    n = hg * wg

    sbias = spatial_attn_bias(prep["spatial_bias"], hg, wg, ph, pw, heads,
                              cfg["multi_hop_max_dist"])
    tbias = temporal_attn_bias(prep["temporal_bias"], f, heads)

    # velocity[:, :, 1:] = diff(x, dim=2); first frame zeros
    vel = jnp.concatenate(
        [jnp.zeros_like(x[:, :, :1]), x[:, :, 1:] - x[:, :, :-1]], axis=2)

    cenc = centrality(prep["central_embed"], b, f, H, W, ph, pw, fps)
    px = video_to_patches(x, ph, pw, fps).reshape(b * f * n, -1)
    pv = video_to_patches(vel, ph, pw, fps).reshape(b * f * n, -1)
    emb = node_embed_pair(px, pv, prep["node_feat"], prep["node_vel"], dim)

    h = emb.reshape(b, f, n, dim) + cenc + prep["pos_embedding"][:, :f, :n]

    # spatial cls tokens + spatial transformer
    scl = jnp.broadcast_to(prep["spatial_cls"][None], (b, f, 1, dim))
    h = jnp.concatenate([scl, h], axis=2)                          # (b, f, n+1, dim)
    hs = h.reshape(b * f, n + 1, dim).astype(_ACT_DTYPE)
    hs = fused_transformer(hs, sbias, prep["spatial_tf"], heads, dh)

    # cls pool -> only cls rows need the spatial final LayerNorm (row-wise op)
    h = hs.reshape(b, f, n + 1, dim)[:, :, 0]                      # (b, f, dim)
    h = pallas_layernorm(h, prep["spatial_tf"]["final_ln_g"],
                         prep["spatial_tf"]["final_ln_b"])

    # temporal cls token + temporal transformer
    tcl = jnp.broadcast_to(prep["temporal_cls"], (b, 1, dim)).astype(h.dtype)
    h = jnp.concatenate([tcl, h], axis=1)                          # (b, f+1, dim)
    h = fused_transformer(h, tbias, prep["temporal_tf"], heads, dh)
    h = h[:, 0]                                                    # (b, dim)

    # fused temporal final LayerNorm + classification head (128-lane padded)
    logits = pallas_ln_head(h, prep["temporal_tf"]["final_ln_g"],
                            prep["temporal_tf"]["final_ln_b"],
                            prep["head_w"], prep["head_b"])        # (b, Cp)
    return logits[:, :cfg["num_classes"]]


# ----------------------------------------------------------------------------
# Parameter preparation (stack per-block weights along depth, pre-cast to bf16,
# fold softmax scale into Q, pad classification head) — runs once, outside jit.
# ----------------------------------------------------------------------------
def _prep_block_stack(blocks, heads, dim_head):
    inner = heads * dim_head
    scale = dim_head ** -0.5

    def stack(k):
        return jnp.stack([blk[k] for blk in blocks], axis=0)

    wqkv = stack("w_qkv")                                           # (depth, D, 3*inner)
    wqkv = jnp.concatenate([wqkv[..., :inner] * scale, wqkv[..., inner:]], axis=-1)
    bqkv = stack("b_qkv")                                           # (depth, 3*inner)
    bqkv = jnp.concatenate([bqkv[..., :inner] * scale, bqkv[..., inner:]], axis=-1)

    return dict(
        ln1g=stack("attn_ln_g")[:, None, :], ln1b=stack("attn_ln_b")[:, None, :],
        wqkv=wqkv.astype(_MM_DTYPE), bqkv=bqkv[:, None, :],
        wo=stack("w_o").astype(_MM_DTYPE), bo=stack("b_o")[:, None, :],
        ln2g=stack("mlp_ln_g")[:, None, :], ln2b=stack("mlp_ln_b")[:, None, :],
        w1=stack("w1").astype(_MM_DTYPE), b1=stack("b1")[:, None, :],
        w2=stack("w2").astype(_MM_DTYPE), b2=stack("b2")[:, None, :],
    )


def _prep_node(p):
    return dict(
        ln1_g=p["ln1_g"].reshape(1, -1), ln1_b=p["ln1_b"].reshape(1, -1),
        w1=p["w1"].astype(_MM_DTYPE), b1=p["b1"].reshape(1, -1),
        w2=p["w2"].astype(_MM_DTYPE), b2=p["b2"].reshape(1, -1),
        ln2_g=p["ln2_g"].reshape(1, -1), ln2_b=p["ln2_b"].reshape(1, -1))


def prepare(params, cfg):
    heads, dh = cfg["heads"], cfg["dim_head"]
    prep = dict(params)
    for name in ("spatial_tf", "temporal_tf"):
        prep[name] = dict(_prep_block_stack(params[name]["blocks"], heads, dh),
                          final_ln_g=params[name]["final_ln_g"],
                          final_ln_b=params[name]["final_ln_b"])
    prep["node_feat"] = _prep_node(params["node_feat"])
    prep["node_vel"] = _prep_node(params["node_vel"])

    D, C = params["head_w"].shape
    Cp = max(128, ((C + 127) // 128) * 128)        # lane-dense head output
    hw = jnp.zeros((D, Cp), jnp.float32).at[:, :C].set(params["head_w"])
    hb = jnp.zeros((Cp,), jnp.float32).at[:C].set(params["head_b"])
    prep["head_w"] = hw.astype(_MM_DTYPE)
    prep["head_b"] = hb.reshape(1, Cp)
    return prep


# ----------------------------------------------------------------------------
# Deterministic parameter init (faithful, f32, unstacked)
# ----------------------------------------------------------------------------
def init_params(key, cfg):
    dim, heads, dh, mlp_dim = cfg["dim"], cfg["heads"], cfg["dim_head"], cfg["mlp_dim"]
    ph = pw = cfg["patch"]
    fps, channels = cfg["frame_patch_size"], cfg["channels"]
    patch_dim = channels * ph * pw * fps
    central_dim = dim // (ph * pw * fps)
    nip = (cfg["image_size"] // ph) * (cfg["image_size"] // pw)
    nfp = cfg["frames"] // fps
    hidden = 64

    kit = iter(jax.random.split(key, 64))

    def nrm(shape, scale=0.02):
        return (scale * jax.random.normal(next(kit), shape)).astype(jnp.float32)

    def node_embed_params():
        return dict(ln1_g=jnp.ones((patch_dim,)), ln1_b=jnp.zeros((patch_dim,)),
                    w1=nrm((patch_dim, hidden)), b1=jnp.zeros((hidden,)),
                    w2=nrm((hidden, dim)), b2=jnp.zeros((dim,)),
                    ln2_g=jnp.ones((dim,)), ln2_b=jnp.zeros((dim,)))

    def block_params():
        inner = heads * dh
        return dict(attn_ln_g=jnp.ones((dim,)), attn_ln_b=jnp.zeros((dim,)),
                    w_qkv=nrm((dim, 3 * inner)), b_qkv=jnp.zeros((3 * inner,)),
                    w_o=nrm((inner, dim)), b_o=jnp.zeros((dim,)),
                    mlp_ln_g=jnp.ones((dim,)), mlp_ln_b=jnp.zeros((dim,)),
                    w1=nrm((dim, mlp_dim)), b1=jnp.zeros((mlp_dim,)),
                    w2=nrm((mlp_dim, dim)), b2=jnp.zeros((dim,)))

    def tf_params(depth):
        return dict(blocks=[block_params() for _ in range(depth)],
                    final_ln_g=jnp.ones((dim,)), final_ln_b=jnp.zeros((dim,)))

    return dict(
        central_embed=nrm((cfg["max_degree"] + 1, central_dim)),
        spatial_bias=dict(hop_embed=nrm((cfg["multi_hop_max_dist"] + 1, heads)),
                          ew1=nrm((1, hidden)), eb1=jnp.zeros((hidden,)),
                          ew2=nrm((hidden, hidden)), eb2=jnp.zeros((hidden,)),
                          ew3=nrm((hidden, heads)), eb3=jnp.zeros((heads,))),
        temporal_bias=dict(tw1=nrm((1, hidden)), tb1=jnp.zeros((hidden,)),
                           tw2=nrm((hidden, heads)), tb2=jnp.zeros((heads,))),
        node_feat=node_embed_params(),
        node_vel=node_embed_params(),
        pos_embedding=nrm((1, nfp, nip, dim), scale=1.0),
        spatial_cls=nrm((1, 1, dim), scale=1.0)[0],   # (1, dim)
        temporal_cls=nrm((1, 1, dim), scale=1.0)[0],
        spatial_tf=tf_params(cfg["spatial_depth"]),
        temporal_tf=tf_params(cfg["temporal_depth"]),
        head_w=nrm((dim, cfg["num_classes"])), head_b=jnp.zeros((cfg["num_classes"],)),
    )


# ----------------------------------------------------------------------------
if __name__ == "__main__":
    cfg = dict(
        image_size=8, patch=4, frames=4, frame_patch_size=2,
        channels=2, dim=32, spatial_depth=2, temporal_depth=2,
        heads=2, dim_head=16, mlp_dim=64, num_classes=5,
        max_degree=4, multi_hop_max_dist=4,
    )
    key = jax.random.PRNGKey(0)
    pkey, xkey = jax.random.split(key)
    params = init_params(pkey, cfg)
    prep = prepare(params, cfg)               # stack/scale/cast weights once, outside jit
    x = jax.random.normal(
        xkey, (2, cfg["channels"], cfg["frames"], cfg["image_size"], cfg["image_size"]),
        dtype=jnp.float32)

    fwd = jax.jit(lambda p, v: forward(p, v, cfg))
    out = jax.block_until_ready(fwd(prep, x))
    assert out.shape == (2, cfg["num_classes"]) and out.dtype == jnp.float32
    assert bool(jnp.all(jnp.isfinite(out)))
    print("KERNEL_OK")
</pallas_src>

<mosaic_0001>
module attributes {stable_mosaic.version = 11 : i64} {
  func.func @_node_pair_kernel(%arg0: i32, %arg1: memref<16x64xf32, #tpu.memory_space<vmem>>, %arg2: memref<16x64xf32, #tpu.memory_space<vmem>>, %arg3: memref<1x64xf32, #tpu.memory_space<vmem>>, %arg4: memref<1x64xf32, #tpu.memory_space<vmem>>, %arg5: memref<64x64xbf16, #tpu.memory_space<vmem>>, %arg6: memref<1x64xf32, #tpu.memory_space<vmem>>, %arg7: memref<64x32xbf16, #tpu.memory_space<vmem>>, %arg8: memref<1x32xf32, #tpu.memory_space<vmem>>, %arg9: memref<1x32xf32, #tpu.memory_space<vmem>>, %arg10: memref<1x32xf32, #tpu.memory_space<vmem>>, %arg11: memref<1x64xf32, #tpu.memory_space<vmem>>, %arg12: memref<1x64xf32, #tpu.memory_space<vmem>>, %arg13: memref<64x64xbf16, #tpu.memory_space<vmem>>, %arg14: memref<1x64xf32, #tpu.memory_space<vmem>>, %arg15: memref<64x32xbf16, #tpu.memory_space<vmem>>, %arg16: memref<1x32xf32, #tpu.memory_space<vmem>>, %arg17: memref<1x32xf32, #tpu.memory_space<vmem>>, %arg18: memref<1x32xf32, #tpu.memory_space<vmem>>, %arg19: memref<16x32xf32, #tpu.memory_space<vmem>>) attributes {dimension_semantics = [#tpu.dimension_semantics<parallel>], iteration_bounds = array<i64: 1>, scalar_prefetch = 0 : i64, scratch_operands = 0 : i64, tpu.core_type = #tpu.core_type<tc>, window_params = [{transform_indices = @transform_0, window_bounds = array<i64: 16, 64>}, {transform_indices = @transform_1, window_bounds = array<i64: 16, 64>}, {pipeline_mode = #tpu.pipeline_mode<synchronous>, transform_indices = @transform_2, window_bounds = array<i64: 1, 64>}, {pipeline_mode = #tpu.pipeline_mode<synchronous>, transform_indices = @transform_3, window_bounds = array<i64: 1, 64>}, {pipeline_mode = #tpu.pipeline_mode<synchronous>, transform_indices = @transform_4, window_bounds = array<i64: 64, 64>}, {pipeline_mode = #tpu.pipeline_mode<synchronous>, transform_indices = @transform_5, window_bounds = array<i64: 1, 64>}, {pipeline_mode = #tpu.pipeline_mode<synchronous>, transform_indices = @transform_6, window_bounds = array<i64: 64, 32>}, {pipeline_mode = #tpu.pipeline_mode<synchronous>, transform_indices = @transform_7, window_bounds = array<i64: 1, 32>}, {pipeline_mode = #tpu.pipeline_mode<synchronous>, transform_indices = @transform_8, window_bounds = array<i64: 1, 32>}, {pipeline_mode = #tpu.pipeline_mode<synchronous>, transform_indices = @transform_9, window_bounds = array<i64: 1, 32>}, {pipeline_mode = #tpu.pipeline_mode<synchronous>, transform_indices = @transform_10, window_bounds = array<i64: 1, 64>}, {pipeline_mode = #tpu.pipeline_mode<synchronous>, transform_indices = @transform_11, window_bounds = array<i64: 1, 64>}, {pipeline_mode = #tpu.pipeline_mode<synchronous>, transform_indices = @transform_12, window_bounds = array<i64: 64, 64>}, {pipeline_mode = #tpu.pipeline_mode<synchronous>, transform_indices = @transform_13, window_bounds = array<i64: 1, 64>}, {pipeline_mode = #tpu.pipeline_mode<synchronous>, transform_indices = @transform_14, window_bounds = array<i64: 64, 32>}, {pipeline_mode = #tpu.pipeline_mode<synchronous>, transform_indices = @transform_15, window_bounds = array<i64: 1, 32>}, {pipeline_mode = #tpu.pipeline_mode<synchronous>, transform_indices = @transform_16, window_bounds = array<i64: 1, 32>}, {pipeline_mode = #tpu.pipeline_mode<synchronous>, transform_indices = @transform_17, window_bounds = array<i64: 1, 32>}, {transform_indices = @transform_18, window_bounds = array<i64: 16, 32>}]} {
    %c0 = arith.constant 0 : index
    %c0_0 = arith.constant 0 : index
    %0 = vector.load %arg1[%c0, %c0_0] : memref<16x64xf32, #tpu.memory_space<vmem>>, vector<16x64xf32>
    %c0_1 = arith.constant 0 : index
    %c0_2 = arith.constant 0 : index
    %1 = vector.load %arg3[%c0_1, %c0_2] : memref<1x64xf32, #tpu.memory_space<vmem>>, vector<1x64xf32>
    %c0_3 = arith.constant 0 : index
    %c0_4 = arith.constant 0 : index
    %2 = vector.load %arg4[%c0_3, %c0_4] : memref<1x64xf32, #tpu.memory_space<vmem>>, vector<1x64xf32>
    %cst = arith.constant dense<0.000000e+00> : vector<16xf32>
    %3 = vector.multi_reduction <add>, %0, %cst [1] : vector<16x64xf32> to vector<16xf32>
    %4 = vector.shape_cast %3 : vector<16xf32> to vector<16x1xf32>
    %cst_5 = arith.constant 6.400000e+01 : f32
    %5 = vector.broadcast %cst_5 : f32 to vector<16x1xf32>
    %6 = arith.divf %4, %5 : vector<16x1xf32>
    %7 = vector.broadcast %6 : vector<16x1xf32> to vector<16x64xf32>
    %8 = arith.subf %0, %7 : vector<16x64xf32>
    %9 = arith.mulf %8, %8 : vector<16x64xf32>
    %cst_6 = arith.constant dense<0.000000e+00> : vector<16xf32>
    %10 = vector.multi_reduction <add>, %9, %cst_6 [1] : vector<16x64xf32> to vector<16xf32>
    %11 = vector.shape_cast %10 : vector<16xf32> to vector<16x1xf32>
    %cst_7 = arith.constant 6.400000e+01 : f32
    %12 = vector.broadcast %cst_7 : f32 to vector<16x1xf32>
    %13 = arith.divf %11, %12 : vector<16x1xf32>
    %14 = vector.broadcast %6 : vector<16x1xf32> to vector<16x64xf32>
    %15 = arith.subf %0, %14 : vector<16x64xf32>
    %cst_8 = arith.constant 9.99999974E-6 : f32
    %16 = vector.broadcast %cst_8 : f32 to vector<16x1xf32>
    %17 = arith.addf %13, %16 : vector<16x1xf32>
    %18 = math.rsqrt %17 : vector<16x1xf32>
    %19 = vector.broadcast %18 : vector<16x1xf32> to vector<16x64xf32>
    %20 = arith.mulf %15, %19 : vector<16x64xf32>
    %21 = vector.broadcast %1 : vector<1x64xf32> to vector<16x64xf32>
    %22 = arith.mulf %20, %21 : vector<16x64xf32>
    %23 = vector.broadcast %2 : vector<1x64xf32> to vector<16x64xf32>
    %24 = arith.addf %22, %23 : vector<16x64xf32>
    %25 = arith.truncf %24 : vector<16x64xf32> to vector<16x64xbf16>
    %c0_9 = arith.constant 0 : index
    %c0_10 = arith.constant 0 : index
    %26 = vector.load %arg5[%c0_9, %c0_10] : memref<64x64xbf16, #tpu.memory_space<vmem>>, vector<64x64xbf16>
    %cst_11 = arith.constant dense<0.000000e+00> : vector<16x64xf32>
    %27 = tpu.matmul %25, %26, %cst_11 {dimension_numbers = #tpu.dot_dimension_numbers<[1], [0], [0], [1], [0, 0, 1, 1], [], []>} : vector<16x64xbf16>, vector<64x64xbf16>, vector<16x64xf32> -> vector<16x64xf32>
    %c0_12 = arith.constant 0 : index
    %c0_13 = arith.constant 0 : index
    %28 = vector.load %arg6[%c0_12, %c0_13] : memref<1x64xf32, #tpu.memory_space<vmem>>, vector<1x64xf32>
    %29 = vector.broadcast %28 : vector<1x64xf32> to vector<16x64xf32>
    %30 = arith.addf %27, %29 : vector<16x64xf32>
    %31 = arith.mulf %30, %30 : vector<16x64xf32>
    %32 = arith.mulf %30, %31 : vector<16x64xf32>
    %cst_14 = arith.constant 4.471500e-02 : f32
    %33 = vector.broadcast %cst_14 : f32 to vector<16x64xf32>
    %34 = arith.mulf %33, %32 : vector<16x64xf32>
    %35 = arith.addf %30, %34 : vector<16x64xf32>
    %cst_15 = arith.constant 0.797884583 : f32
    %36 = vector.broadcast %cst_15 : f32 to vector<16x64xf32>
    %37 = arith.mulf %36, %35 : vector<16x64xf32>
    %38 = math.tanh %37 : vector<16x64xf32>
    %cst_16 = arith.constant 1.000000e+00 : f32
    %39 = vector.broadcast %cst_16 : f32 to vector<16x64xf32>
    %40 = arith.addf %39, %38 : vector<16x64xf32>
    %cst_17 = arith.constant 5.000000e-01 : f32
    %41 = vector.broadcast %cst_17 : f32 to vector<16x64xf32>
    %42 = arith.mulf %41, %40 : vector<16x64xf32>
    %43 = arith.mulf %30, %42 : vector<16x64xf32>
    %44 = arith.truncf %43 : vector<16x64xf32> to vector<16x64xbf16>
    %c0_18 = arith.constant 0 : index
    %c0_19 = arith.constant 0 : index
    %45 = vector.load %arg7[%c0_18, %c0_19] : memref<64x32xbf16, #tpu.memory_space<vmem>>, vector<64x32xbf16>
    %cst_20 = arith.constant dense<0.000000e+00> : vector<16x32xf32>
    %46 = tpu.matmul %44, %45, %cst_20 {dimension_numbers = #tpu.dot_dimension_numbers<[1], [0], [0], [1], [0, 0, 1, 1], [], []>} : vector<16x64xbf16>, vector<64x32xbf16>, vector<16x32xf32> -> vector<16x32xf32>
    %c0_21 = arith.constant 0 : index
    %c0_22 = arith.constant 0 : index
    %47 = vector.load %arg8[%c0_21, %c0_22] : memref<1x32xf32, #tpu.memory_space<vmem>>, vector<1x32xf32>
    %48 = vector.broadcast %47 : vector<1x32xf32> to vector<16x32xf32>
    %49 = arith.addf %46, %48 : vector<16x32xf32>
    %c0_23 = arith.constant 0 : index
    %c0_24 = arith.constant 0 : index
    %50 = vector.load %arg9[%c0_23, %c0_24] : memref<1x32xf32, #tpu.memory_space<vmem>>, vector<1x32xf32>
    %c0_25 = arith.constant 0 : index
    %c0_26 = arith.constant 0 : index
    %51 = vector.load %arg10[%c0_25, %c0_26] : memref<1x32xf32, #tpu.memory_space<vmem>>, vector<1x32xf32>
    %cst_27 = arith.constant dense<0.000000e+00> : vector<16xf32>
    %52 = vector.multi_reduction <add>, %49, %cst_27 [1] : vector<16x32xf32> to vector<16xf32>
    %53 = vector.shape_cast %52 : vector<16xf32> to vector<16x1xf32>
    %cst_28 = arith.constant 3.200000e+01 : f32
    %54 = vector.broadcast %cst_28 : f32 to vector<16x1xf32>
    %55 = arith.divf %53, %54 : vector<16x1xf32>
    %56 = vector.broadcast %55 : vector<16x1xf32> to vector<16x32xf32>
    %57 = arith.subf %49, %56 : vector<16x32xf32>
    %58 = arith.mulf %57, %57 : vector<16x32xf32>
    %cst_29 = arith.constant dense<0.000000e+00> : vector<16xf32>
    %59 = vector.multi_reduction <add>, %58, %cst_29 [1] : vector<16x32xf32> to vector<16xf32>
    %60 = vector.shape_cast %59 : vector<16xf32> to vector<16x1xf32>
    %cst_30 = arith.constant 3.200000e+01 : f32
    %61 = vector.broadcast %cst_30 : f32 to vector<16x1xf32>
    %62 = arith.divf %60, %61 : vector<16x1xf32>
    %63 = vector.broadcast %55 : vector<16x1xf32> to vector<16x32xf32>
    %64 = arith.subf %49, %63 : vector<16x32xf32>
    %cst_31 = arith.constant 9.99999974E-6 : f32
    %65 = vector.broadcast %cst_31 : f32 to vector<16x1xf32>
    %66 = arith.addf %62, %65 : vector<16x1xf32>
    %67 = math.rsqrt %66 : vector<16x1xf32>
    %68 = vector.broadcast %67 : vector<16x1xf32> to vector<16x32xf32>
    %69 = arith.mulf %64, %68 : vector<16x32xf32>
    %70 = vector.broadcast %50 : vector<1x32xf32> to vector<16x32xf32>
    %71 = arith.mulf %69, %70 : vector<16x32xf32>
    %72 = vector.broadcast %51 : vector<1x32xf32> to vector<16x32xf32>
    %73 = arith.addf %71, %72 : vector<16x32xf32>
    %c0_32 = arith.constant 0 : index
    %c0_33 = arith.constant 0 : index
    %74 = vector.load %arg2[%c0_32, %c0_33] : memref<16x64xf32, #tpu.memory_space<vmem>>, vector<16x64xf32>
    %c0_34 = arith.constant 0 : index
    %c0_35 = arith.constant 0 : index
    %75 = vector.load %arg11[%c0_34, %c0_35] : memref<1x64xf32, #tpu.memory_space<vmem>>, vector<1x64xf32>
    %c0_36 = arith.constant 0 : index
    %c0_37 = arith.constant 0 : index
    %76 = vector.load %arg12[%c0_36, %c0_37] : memref<1x64xf32, #tpu.memory_space<vmem>>, vector<1x64xf32>
    %cst_38 = arith.constant dense<0.000000e+00> : vector<16xf32>
    %77 = vector.multi_reduction <add>, %74, %cst_38 [1] : vector<16x64xf32> to vector<16xf32>
    %78 = vector.shape_cast %77 : vector<16xf32> to vector<16x1xf32>
    %cst_39 = arith.constant 6.400000e+01 : f32
    %79 = vector.broadcast %cst_39 : f32 to vector<16x1xf32>
    %80 = arith.divf %78, %79 : vector<16x1xf32>
    %81 = vector.broadcast %80 : vector<16x1xf32> to vector<16x64xf32>
    %82 = arith.subf %74, %81 : vector<16x64xf32>
    %83 = arith.mulf %82, %82 : vector<16x64xf32>
    %cst_40 = arith.constant dense<0.000000e+00> : vector<16xf32>
    %84 = vector.multi_reduction <add>, %83, %cst_40 [1] : vector<16x64xf32> to vector<16xf32>
    %85 = vector.shape_cast %84 : vector<16xf32> to vector<16x1xf32>
    %cst_41 = arith.constant 6.400000e+01 : f32
    %86 = vector.broadcast %cst_41 : f32 to vector<16x1xf32>
    %87 = arith.divf %85, %86 : vector<16x1xf32>
    %88 = vector.broadcast %80 : vector<16x1xf32> to vector<16x64xf32>
    %89 = arith.subf %74, %88 : vector<16x64xf32>
    %cst_42 = arith.constant 9.99999974E-6 : f32
    %90 = vector.broadcast %cst_42 : f32 to vector<16x1xf32>
    %91 = arith.addf %87, %90 : vector<16x1xf32>
    %92 = math.rsqrt %91 : vector<16x1xf32>
    %93 = vector.broadcast %92 : vector<16x1xf32> to vector<16x64xf32>
    %94 = arith.mulf %89, %93 : vector<16x64xf32>
    %95 = vector.broadcast %75 : vector<1x64xf32> to vector<16x64xf32>
    %96 = arith.mulf %94, %95 : vector<16x64xf32>
    %97 = vector.broadcast %76 : vector<1x64xf32> to vector<16x64xf32>
    %98 = arith.addf %96, %97 : vector<16x64xf32>
    %99 = arith.truncf %98 : vector<16x64xf32> to vector<16x64xbf16>
    %c0_43 = arith.constant 0 : index
    %c0_44 = arith.constant 0 : index
    %100 = vector.load %arg13[%c0_43, %c0_44] : memref<64x64xbf16, #tpu.memory_space<vmem>>, vector<64x64xbf16>
    %cst_45 = arith.constant dense<0.000000e+00> : vector<16x64xf32>
    %101 = tpu.matmul %99, %100, %cst_45 {dimension_numbers = #tpu.dot_dimension_numbers<[1], [0], [0], [1], [0, 0, 1, 1], [], []>} : vector<16x64xbf16>, vector<64x64xbf16>, vector<16x64xf32> -> vector<16x64xf32>
    %c0_46 = arith.constant 0 : index
    %c0_47 = arith.constant 0 : index
    %102 = vector.load %arg14[%c0_46, %c0_47] : memref<1x64xf32, #tpu.memory_space<vmem>>, vector<1x64xf32>
    %103 = vector.broadcast %102 : vector<1x64xf32> to vector<16x64xf32>
    %104 = arith.addf %101, %103 : vector<16x64xf32>
    %105 = arith.mulf %104, %104 : vector<16x64xf32>
    %106 = arith.mulf %104, %105 : vector<16x64xf32>
    %cst_48 = arith.constant 4.471500e-02 : f32
    %107 = vector.broadcast %cst_48 : f32 to vector<16x64xf32>
    %108 = arith.mulf %107, %106 : vector<16x64xf32>
    %109 = arith.addf %104, %108 : vector<16x64xf32>
    %cst_49 = arith.constant 0.797884583 : f32
    %110 = vector.broadcast %cst_49 : f32 to vector<16x64xf32>
    %111 = arith.mulf %110, %109 : vector<16x64xf32>
    %112 = math.tanh %111 : vector<16x64xf32>
    %cst_50 = arith.constant 1.000000e+00 : f32
    %113 = vector.broadcast %cst_50 : f32 to vector<16x64xf32>
    %114 = arith.addf %113, %112 : vector<16x64xf32>
    %cst_51 = arith.constant 5.000000e-01 : f32
    %115 = vector.broadcast %cst_51 : f32 to vector<16x64xf32>
    %116 = arith.mulf %115, %114 : vector<16x64xf32>
    %117 = arith.mulf %104, %116 : vector<16x64xf32>
    %118 = arith.truncf %117 : vector<16x64xf32> to vector<16x64xbf16>
    %c0_52 = arith.constant 0 : index
    %c0_53 = arith.constant 0 : index
    %119 = vector.load %arg15[%c0_52, %c0_53] : memref<64x32xbf16, #tpu.memory_space<vmem>>, vector<64x32xbf16>
    %cst_54 = arith.constant dense<0.000000e+00> : vector<16x32xf32>
    %120 = tpu.matmul %118, %119, %cst_54 {dimension_numbers = #tpu.dot_dimension_numbers<[1], [0], [0], [1], [0, 0, 1, 1], [], []>} : vector<16x64xbf16>, vector<64x32xbf16>, vector<16x32xf32> -> vector<16x32xf32>
    %c0_55 = arith.constant 0 : index
    %c0_56 = arith.constant 0 : index
    %121 = vector.load %arg16[%c0_55, %c0_56] : memref<1x32xf32, #tpu.memory_space<vmem>>, vector<1x32xf32>
    %122 = vector.broadcast %121 : vector<1x32xf32> to vector<16x32xf32>
    %123 = arith.addf %120, %122 : vector<16x32xf32>
    %c0_57 = arith.constant 0 : index
    %c0_58 = arith.constant 0 : index
    %124 = vector.load %arg17[%c0_57, %c0_58] : memref<1x32xf32, #tpu.memory_space<vmem>>, vector<1x32xf32>
    %c0_59 = arith.constant 0 : index
    %c0_60 = arith.constant 0 : index
    %125 = vector.load %arg18[%c0_59, %c0_60] : memref<1x32xf32, #tpu.memory_space<vmem>>, vector<1x32xf32>
    %cst_61 = arith.constant dense<0.000000e+00> : vector<16xf32>
    %126 = vector.multi_reduction <add>, %123, %cst_61 [1] : vector<16x32xf32> to vector<16xf32>
    %127 = vector.shape_cast %126 : vector<16xf32> to vector<16x1xf32>
    %cst_62 = arith.constant 3.200000e+01 : f32
    %128 = vector.broadcast %cst_62 : f32 to vector<16x1xf32>
    %129 = arith.divf %127, %128 : vector<16x1xf32>
    %130 = vector.broadcast %129 : vector<16x1xf32> to vector<16x32xf32>
    %131 = arith.subf %123, %130 : vector<16x32xf32>
    %132 = arith.mulf %131, %131 : vector<16x32xf32>
    %cst_63 = arith.constant dense<0.000000e+00> : vector<16xf32>
    %133 = vector.multi_reduction <add>, %132, %cst_63 [1] : vector<16x32xf32> to vector<16xf32>
    %134 = vector.shape_cast %133 : vector<16xf32> to vector<16x1xf32>
    %cst_64 = arith.constant 3.200000e+01 : f32
    %135 = vector.broadcast %cst_64 : f32 to vector<16x1xf32>
    %136 = arith.divf %134, %135 : vector<16x1xf32>
    %137 = vector.broadcast %129 : vector<16x1xf32> to vector<16x32xf32>
    %138 = arith.subf %123, %137 : vector<16x32xf32>
    %cst_65 = arith.constant 9.99999974E-6 : f32
    %139 = vector.broadcast %cst_65 : f32 to vector<16x1xf32>
    %140 = arith.addf %136, %139 : vector<16x1xf32>
    %141 = math.rsqrt %140 : vector<16x1xf32>
    %142 = vector.broadcast %141 : vector<16x1xf32> to vector<16x32xf32>
    %143 = arith.mulf %138, %142 : vector<16x32xf32>
    %144 = vector.broadcast %124 : vector<1x32xf32> to vector<16x32xf32>
    %145 = arith.mulf %143, %144 : vector<16x32xf32>
    %146 = vector.broadcast %125 : vector<1x32xf32> to vector<16x32xf32>
    %147 = arith.addf %145, %146 : vector<16x32xf32>
    %148 = arith.addf %73, %147 : vector<16x32xf32>
    %c0_66 = arith.constant 0 : index
    %c0_67 = arith.constant 0 : index
    %149 = vector.load %arg19[%c0_66, %c0_67] : memref<16x32xf32, #tpu.memory_space<vmem>>, vector<16x32xf32>
    tpu.vector_store %arg19[%c0_66, %c0_67], %148 {strides = array<i32>} : memref<16x32xf32, #tpu.memory_space<vmem>>, vector<16x32xf32>,
    return
  }
  func.func @transform_0(%arg0: i32) -> (i32, i32) {
    %c0_i32 = arith.constant 0 : i32
    %c0_i32_0 = arith.constant 0 : i32
    return %arg0, %c0_i32 : i32, i32
  }
  func.func @transform_1(%arg0: i32) -> (i32, i32) {
    %c0_i32 = arith.constant 0 : i32
    %c0_i32_0 = arith.constant 0 : i32
    return %arg0, %c0_i32 : i32, i32
  }
  func.func @transform_2(%arg0: i32) -> (i32, i32) {
    %c0_i32 = arith.constant 0 : i32
    %c0_i32_0 = arith.constant 0 : i32
    %c0_i32_1 = arith.constant 0 : i32
    return %c0_i32, %c0_i32_0 : i32, i32
  }
  func.func @transform_3(%arg0: i32) -> (i32, i32) {
    %c0_i32 = arith.constant 0 : i32
    %c0_i32_0 = arith.constant 0 : i32
    %c0_i32_1 = arith.constant 0 : i32
    return %c0_i32, %c0_i32_0 : i32, i32
  }
  func.func @transform_4(%arg0: i32) -> (i32, i32) {
    %c0_i32 = arith.constant 0 : i32
    %c0_i32_0 = arith.constant 0 : i32
    %c0_i32_1 = arith.constant 0 : i32
    return %c0_i32, %c0_i32_0 : i32, i32
  }
  func.func @transform_5(%arg0: i32) -> (i32, i32) {
    %c0_i32 = arith.constant 0 : i32
    %c0_i32_0 = arith.constant 0 : i32
    %c0_i32_1 = arith.constant 0 : i32
    return %c0_i32, %c0_i32_0 : i32, i32
  }
  func.func @transform_6(%arg0: i32) -> (i32, i32) {
    %c0_i32 = arith.constant 0 : i32
    %c0_i32_0 = arith.constant 0 : i32
    %c0_i32_1 = arith.constant 0 : i32
    return %c0_i32, %c0_i32_0 : i32, i32
  }
  func.func @transform_7(%arg0: i32) -> (i32, i32) {
    %c0_i32 = arith.constant 0 : i32
    %c0_i32_0 = arith.constant 0 : i32
    %c0_i32_1 = arith.constant 0 : i32
    return %c0_i32, %c0_i32_0 : i32, i32
  }
  func.func @transform_8(%arg0: i32) -> (i32, i32) {
    %c0_i32 = arith.constant 0 : i32
    %c0_i32_0 = arith.constant 0 : i32
    %c0_i32_1 = arith.constant 0 : i32
    return %c0_i32, %c0_i32_0 : i32, i32
  }
  func.func @transform_9(%arg0: i32) -> (i32, i32) {
    %c0_i32 = arith.constant 0 : i32
    %c0_i32_0 = arith.constant 0 : i32
    %c0_i32_1 = arith.constant 0 : i32
    return %c0_i32, %c0_i32_0 : i32, i32
  }
  func.func @transform_10(%arg0: i32) -> (i32, i32) {
    %c0_i32 = arith.constant 0 : i32
    %c0_i32_0 = arith.constant 0 : i32
    %c0_i32_1 = arith.constant 0 : i32
    return %c0_i32, %c0_i32_0 : i32, i32
  }
  func.func @transform_11(%arg0: i32) -> (i32, i32) {
    %c0_i32 = arith.constant 0 : i32
    %c0_i32_0 = arith.constant 0 : i32
    %c0_i32_1 = arith.constant 0 : i32
    return %c0_i32, %c0_i32_0 : i32, i32
  }
  func.func @transform_12(%arg0: i32) -> (i32, i32) {
    %c0_i32 = arith.constant 0 : i32
    %c0_i32_0 = arith.constant 0 : i32
    %c0_i32_1 = arith.constant 0 : i32
    return %c0_i32, %c0_i32_0 : i32, i32
  }
  func.func @transform_13(%arg0: i32) -> (i32, i32) {
    %c0_i32 = arith.constant 0 : i32
    %c0_i32_0 = arith.constant 0 : i32
    %c0_i32_1 = arith.constant 0 : i32
    return %c0_i32, %c0_i32_0 : i32, i32
  }
  func.func @transform_14(%arg0: i32) -> (i32, i32) {
    %c0_i32 = arith.constant 0 : i32
    %c0_i32_0 = arith.constant 0 : i32
    %c0_i32_1 = arith.constant 0 : i32
    return %c0_i32, %c0_i32_0 : i32, i32
  }
  func.func @transform_15(%arg0: i32) -> (i32, i32) {
    %c0_i32 = arith.constant 0 : i32
    %c0_i32_0 = arith.constant 0 : i32
    %c0_i32_1 = arith.constant 0 : i32
    return %c0_i32, %c0_i32_0 : i32, i32
  }
  func.func @transform_16(%arg0: i32) -> (i32, i32) {
    %c0_i32 = arith.constant 0 : i32
    %c0_i32_0 = arith.constant 0 : i32
    %c0_i32_1 = arith.constant 0 : i32
    return %c0_i32, %c0_i32_0 : i32, i32
  }
  func.func @transform_17(%arg0: i32) -> (i32, i32) {
    %c0_i32 = arith.constant 0 : i32
    %c0_i32_0 = arith.constant 0 : i32
    %c0_i32_1 = arith.constant 0 : i32
    return %c0_i32, %c0_i32_0 : i32, i32
  }
  func.func @transform_18(%arg0: i32) -> (i32, i32) {
    %c0_i32 = arith.constant 0 : i32
    %c0_i32_0 = arith.constant 0 : i32
    return %arg0, %c0_i32 : i32, i32
  }
}

module attributes {stable_mosaic.version = 11 : i64} {
  func.func @_tf_kernel(%arg0: i32, %arg1: i32, %arg2: memref<32x32xbf16, #tpu.memory_space<vmem>>, %arg3: memref<1x2x8x8xf32, #tpu.memory_space<vmem>>, %arg4: memref<1x1x32xf32, #tpu.memory_space<vmem>>, %arg5: memref<1x1x32xf32, #tpu.memory_space<vmem>>, %arg6: memref<1x32x96xbf16, #tpu.memory_space<vmem>>, %arg7: memref<1x1x96xf32, #tpu.memory_space<vmem>>, %arg8: memref<1x32x32xbf16, #tpu.memory_space<vmem>>, %arg9: memref<1x1x32xf32, #tpu.memory_space<vmem>>, %arg10: memref<1x1x32xf32, #tpu.memory_space<vmem>>, %arg11: memref<1x1x32xf32, #tpu.memory_space<vmem>>, %arg12: memref<1x32x64xbf16, #tpu.memory_space<vmem>>, %arg13: memref<1x1x64xf32, #tpu.memory_space<vmem>>, %arg14: memref<1x64x32xbf16, #tpu.memory_space<vmem>>, %arg15: memref<1x1x32xf32, #tpu.memory_space<vmem>>, %arg16: memref<32x32xbf16, #tpu.memory_space<vmem>>, %arg17: memref<32x32xf32, #tpu.memory_space<vmem>>, %arg18: memref<32x32xf32, #tpu.memory_space<vmem>>) attributes {dimension_semantics = [#tpu.dimension_semantics<parallel>, #tpu.dimension_semantics<arbitrary>], iteration_bounds = array<i64: 1, 2>, scalar_prefetch = 0 : i64, scratch_operands = 2 : i64, tpu.core_type = #tpu.core_type<tc>, window_params = [{transform_indices = @transform_0, window_bounds = array<i64: 32, 32>}, {pipeline_mode = #tpu.pipeline_mode<synchronous>, transform_indices = @transform_1, window_bounds = array<i64: 1, 2, 8, 8>}, {transform_indices = @transform_2, window_bounds = array<i64: 1, 1, 32>}, {transform_indices = @transform_3, window_bounds = array<i64: 1, 1, 32>}, {transform_indices = @transform_4, window_bounds = array<i64: 1, 32, 96>}, {transform_indices = @transform_5, window_bounds = array<i64: 1, 1, 96>}, {transform_indices = @transform_6, window_bounds = array<i64: 1, 32, 32>}, {transform_indices = @transform_7, window_bounds = array<i64: 1, 1, 32>}, {transform_indices = @transform_8, window_bounds = array<i64: 1, 1, 32>}, {transform_indices = @transform_9, window_bounds = array<i64: 1, 1, 32>}, {transform_indices = @transform_10, window_bounds = array<i64: 1, 32, 64>}, {transform_indices = @transform_11, window_bounds = array<i64: 1, 1, 64>}, {transform_indices = @transform_12, window_bounds = array<i64: 1, 64, 32>}, {transform_indices = @transform_13, window_bounds = array<i64: 1, 1, 32>}, {transform_indices = @transform_14, window_bounds = array<i64: 32, 32>}]} {
    %c0_i32 = arith.constant 0 : i32
    %0 = arith.cmpi eq, %arg1, %c0_i32 : i32
    %1 = arith.extui %0 : i1 to i32
    %c0_i32_0 = arith.constant 0 : i32
    %2 = arith.cmpi ne, %1, %c0_i32_0 : i32
    scf.if %2 {
      %c0_78 = arith.constant 0 : index
      %c0_79 = arith.constant 0 : index
      %166 = vector.load %arg2[%c0_78, %c0_79] : memref<32x32xbf16, #tpu.memory_space<vmem>>, vector<32x32xbf16>
      %167 = arith.extf %166 : vector<32x32xbf16> to vector<32x32xf32>
      %c0_80 = arith.constant 0 : index
      %c0_81 = arith.constant 0 : index
      %168 = vector.load %arg17[%c0_80, %c0_81] : memref<32x32xf32, #tpu.memory_space<vmem>>, vector<32x32xf32>
      tpu.vector_store %arg17[%c0_80, %c0_81], %167 {strides = array<i32>} : memref<32x32xf32, #tpu.memory_space<vmem>>, vector<32x32xf32>,
    } else {
    }
    %c0 = arith.constant 0 : index
    %c0_1 = arith.constant 0 : index
    %3 = vector.load %arg17[%c0, %c0_1] : memref<32x32xf32, #tpu.memory_space<vmem>>, vector<32x32xf32>
    %c0_2 = arith.constant 0 : index
    %c0_3 = arith.constant 0 : index
    %c0_4 = arith.constant 0 : index
    %4 = vector.load %arg4[%c0_2, %c0_3, %c0_4] : memref<1x1x32xf32, #tpu.memory_space<vmem>>, vector<1x1x32xf32>
    %5 = vector.shape_cast %4 : vector<1x1x32xf32> to vector<1x32xf32>
    %c0_5 = arith.constant 0 : index
    %c0_6 = arith.constant 0 : index
    %c0_7 = arith.constant 0 : index
    %6 = vector.load %arg5[%c0_5, %c0_6, %c0_7] : memref<1x1x32xf32, #tpu.memory_space<vmem>>, vector<1x1x32xf32>
    %7 = vector.shape_cast %6 : vector<1x1x32xf32> to vector<1x32xf32>
    %cst = arith.constant dense<0.000000e+00> : vector<32xf32>
    %8 = vector.multi_reduction <add>, %3, %cst [1] : vector<32x32xf32> to vector<32xf32>
    %9 = vector.shape_cast %8 : vector<32xf32> to vector<32x1xf32>
    %cst_8 = arith.constant 3.200000e+01 : f32
    %10 = vector.broadcast %cst_8 : f32 to vector<32x1xf32>
    %11 = arith.divf %9, %10 : vector<32x1xf32>
    %12 = vector.broadcast %11 : vector<32x1xf32> to vector<32x32xf32>
    %13 = arith.subf %3, %12 : vector<32x32xf32>
    %14 = arith.mulf %13, %13 : vector<32x32xf32>
    %cst_9 = arith.constant dense<0.000000e+00> : vector<32xf32>
    %15 = vector.multi_reduction <add>, %14, %cst_9 [1] : vector<32x32xf32> to vector<32xf32>
    %16 = vector.shape_cast %15 : vector<32xf32> to vector<32x1xf32>
    %cst_10 = arith.constant 3.200000e+01 : f32
    %17 = vector.broadcast %cst_10 : f32 to vector<32x1xf32>
    %18 = arith.divf %16, %17 : vector<32x1xf32>
    %19 = vector.broadcast %11 : vector<32x1xf32> to vector<32x32xf32>
    %20 = arith.subf %3, %19 : vector<32x32xf32>
    %cst_11 = arith.constant 9.99999974E-6 : f32
    %21 = vector.broadcast %cst_11 : f32 to vector<32x1xf32>
    %22 = arith.addf %18, %21 : vector<32x1xf32>
    %23 = math.rsqrt %22 : vector<32x1xf32>
    %24 = vector.broadcast %23 : vector<32x1xf32> to vector<32x32xf32>
    %25 = arith.mulf %20, %24 : vector<32x32xf32>
    %26 = vector.broadcast %5 : vector<1x32xf32> to vector<32x32xf32>
    %27 = arith.mulf %25, %26 : vector<32x32xf32>
    %28 = vector.broadcast %7 : vector<1x32xf32> to vector<32x32xf32>
    %29 = arith.addf %27, %28 : vector<32x32xf32>
    %30 = arith.truncf %29 : vector<32x32xf32> to vector<32x32xbf16>
    %c0_12 = arith.constant 0 : index
    %c0_13 = arith.constant 0 : index
    %c0_14 = arith.constant 0 : index
    %31 = vector.load %arg6[%c0_12, %c0_13, %c0_14] : memref<1x32x96xbf16, #tpu.memory_space<vmem>>, vector<1x32x96xbf16>
    %32 = vector.shape_cast %31 : vector<1x32x96xbf16> to vector<32x96xbf16>
    %cst_15 = arith.constant dense<0.000000e+00> : vector<32x96xf32>
    %33 = tpu.matmul %30, %32, %cst_15 {dimension_numbers = #tpu.dot_dimension_numbers<[1], [0], [0], [1], [0, 0, 1, 1], [], []>} : vector<32x32xbf16>, vector<32x96xbf16>, vector<32x96xf32> -> vector<32x96xf32>
    %c0_16 = arith.constant 0 : index
    %c0_17 = arith.constant 0 : index
    %c0_18 = arith.constant 0 : index
    %34 = vector.load %arg7[%c0_16, %c0_17, %c0_18] : memref<1x1x96xf32, #tpu.memory_space<vmem>>, vector<1x1x96xf32>
    %35 = vector.shape_cast %34 : vector<1x1x96xf32> to vector<1x96xf32>
    %36 = vector.broadcast %35 : vector<1x96xf32> to vector<32x96xf32>
    %37 = arith.addf %33, %36 : vector<32x96xf32>
    %38 = vector.extract_strided_slice %37 {offsets = [0, 0], sizes = [32, 16], strides = [1, 1]} : vector<32x96xf32> to vector<32x16xf32>
    %39 = vector.shape_cast %38 : vector<32x16xf32> to vector<4x8x16xf32>
    %40 = vector.extract_strided_slice %37 {offsets = [0, 32], sizes = [32, 16], strides = [1, 1]} : vector<32x96xf32> to vector<32x16xf32>
    %41 = vector.shape_cast %40 : vector<32x16xf32> to vector<4x8x16xf32>
    %42 = vector.extract_strided_slice %37 {offsets = [0, 64], sizes = [32, 16], strides = [1, 1]} : vector<32x96xf32> to vector<32x16xf32>
    %43 = vector.shape_cast %42 : vector<32x16xf32> to vector<4x8x16xf32>
    %44 = arith.truncf %39 : vector<4x8x16xf32> to vector<4x8x16xbf16>
    %45 = arith.truncf %41 : vector<4x8x16xf32> to vector<4x8x16xbf16>
    "tpu.trace_start"() <{level = 10 : i32, message = "bqd,bkd->bqk"}> : () -> ()
    %cst_19 = arith.constant dense<0.000000e+00> : vector<4x8x8xf32>
    %46 = tpu.matmul %44, %45, %cst_19 {dimension_numbers = #tpu.dot_dimension_numbers<[2], [2], [1], [1], [0, 0, 0, 1, 1, 1], [0], [0]>} : vector<4x8x16xbf16>, vector<4x8x16xbf16>, vector<4x8x8xf32> -> vector<4x8x8xf32>
    "tpu.trace_stop"() : () -> ()
    %c0_20 = arith.constant 0 : index
    %c0_21 = arith.constant 0 : index
    %c0_22 = arith.constant 0 : index
    %c0_23 = arith.constant 0 : index
    %47 = vector.load %arg3[%c0_20, %c0_21, %c0_22, %c0_23] : memref<1x2x8x8xf32, #tpu.memory_space<vmem>>, vector<1x1x8x8xf32>
    %48 = vector.shape_cast %47 : vector<1x1x8x8xf32> to vector<8x8xf32>
    %49 = vector.shape_cast %48 : vector<8x8xf32> to vector<1x8x8xf32>
    %50 = vector.broadcast %49 : vector<1x8x8xf32> to vector<4x8x8xf32>
    %51 = arith.addf %46, %50 : vector<4x8x8xf32>
    %cst_24 = arith.constant dense<0xFF800000> : vector<4x8xf32>
    %52 = vector.multi_reduction <maximumf>, %51, %cst_24 [2] : vector<4x8x8xf32> to vector<4x8xf32>
    %53 = vector.shape_cast %52 : vector<4x8xf32> to vector<4x8x1xf32>
    %54 = vector.broadcast %53 : vector<4x8x1xf32> to vector<4x8x8xf32>
    %55 = arith.subf %51, %54 : vector<4x8x8xf32>
    %56 = math.exp %55 : vector<4x8x8xf32>
    %cst_25 = arith.constant dense<0.000000e+00> : vector<4x8xf32>
    %57 = vector.multi_reduction <add>, %56, %cst_25 [2] : vector<4x8x8xf32> to vector<4x8xf32>
    %58 = vector.shape_cast %57 : vector<4x8xf32> to vector<4x8x1xf32>
    %59 = tpu.reciprocal %58 {approx = true} : vector<4x8x1xf32> -> vector<4x8x1xf32>
    %60 = vector.broadcast %59 : vector<4x8x1xf32> to vector<4x8x8xf32>
    %61 = arith.mulf %56, %60 : vector<4x8x8xf32>
    %62 = arith.truncf %61 : vector<4x8x8xf32> to vector<4x8x8xbf16>
    %63 = arith.truncf %43 : vector<4x8x16xf32> to vector<4x8x16xbf16>
    "tpu.trace_start"() <{level = 10 : i32, message = "bqk,bkd->bqd"}> : () -> ()
    %cst_26 = arith.constant dense<0.000000e+00> : vector<4x8x16xf32>
    %64 = tpu.matmul %62, %63, %cst_26 {dimension_numbers = #tpu.dot_dimension_numbers<[2], [1], [1], [2], [0, 0, 0, 1, 1, 2], [0], [0]>} : vector<4x8x8xbf16>, vector<4x8x16xbf16>, vector<4x8x16xf32> -> vector<4x8x16xf32>
    "tpu.trace_stop"() : () -> ()
    %65 = vector.shape_cast %64 : vector<4x8x16xf32> to vector<32x16xf32>
    %c0_27 = arith.constant 0 : index
    %c0_28 = arith.constant 0 : index
    %66 = vector.load %arg18[%c0_27, %c0_28] : memref<32x32xf32, #tpu.memory_space<vmem>>, vector<32x16xf32>
    tpu.vector_store %arg18[%c0_27, %c0_28], %65 {strides = array<i32>} : memref<32x32xf32, #tpu.memory_space<vmem>>, vector<32x16xf32>,
    %67 = vector.extract_strided_slice %37 {offsets = [0, 16], sizes = [32, 16], strides = [1, 1]} : vector<32x96xf32> to vector<32x16xf32>
    %68 = vector.shape_cast %67 : vector<32x16xf32> to vector<4x8x16xf32>
    %69 = vector.extract_strided_slice %37 {offsets = [0, 48], sizes = [32, 16], strides = [1, 1]} : vector<32x96xf32> to vector<32x16xf32>
    %70 = vector.shape_cast %69 : vector<32x16xf32> to vector<4x8x16xf32>
    %71 = vector.extract_strided_slice %37 {offsets = [0, 80], sizes = [32, 16], strides = [1, 1]} : vector<32x96xf32> to vector<32x16xf32>
    %72 = vector.shape_cast %71 : vector<32x16xf32> to vector<4x8x16xf32>
    %73 = arith.truncf %68 : vector<4x8x16xf32> to vector<4x8x16xbf16>
    %74 = arith.truncf %70 : vector<4x8x16xf32> to vector<4x8x16xbf16>
    "tpu.trace_start"() <{level = 10 : i32, message = "bqd,bkd->bqk"}> : () -> ()
    %cst_29 = arith.constant dense<0.000000e+00> : vector<4x8x8xf32>
    %75 = tpu.matmul %73, %74, %cst_29 {dimension_numbers = #tpu.dot_dimension_numbers<[2], [2], [1], [1], [0, 0, 0, 1, 1, 1], [0], [0]>} : vector<4x8x16xbf16>, vector<4x8x16xbf16>, vector<4x8x8xf32> -> vector<4x8x8xf32>
    "tpu.trace_stop"() : () -> ()
    %c0_30 = arith.constant 0 : index
    %c1 = arith.constant 1 : index
    %c0_31 = arith.constant 0 : index
    %c0_32 = arith.constant 0 : index
    %76 = vector.load %arg3[%c0_30, %c1, %c0_31, %c0_32] : memref<1x2x8x8xf32, #tpu.memory_space<vmem>>, vector<1x1x8x8xf32>
    %77 = vector.shape_cast %76 : vector<1x1x8x8xf32> to vector<8x8xf32>
    %78 = vector.shape_cast %77 : vector<8x8xf32> to vector<1x8x8xf32>
    %79 = vector.broadcast %78 : vector<1x8x8xf32> to vector<4x8x8xf32>
    %80 = arith.addf %75, %79 : vector<4x8x8xf32>
    %cst_33 = arith.constant dense<0xFF800000> : vector<4x8xf32>
    %81 = vector.multi_reduction <maximumf>, %80, %cst_33 [2] : vector<4x8x8xf32> to vector<4x8xf32>
    %82 = vector.shape_cast %81 : vector<4x8xf32> to vector<4x8x1xf32>
    %83 = vector.broadcast %82 : vector<4x8x1xf32> to vector<4x8x8xf32>
    %84 = arith.subf %80, %83 : vector<4x8x8xf32>
    %85 = math.exp %84 : vector<4x8x8xf32>
    %cst_34 = arith.constant dense<0.000000e+00> : vector<4x8xf32>
    %86 = vector.multi_reduction <add>, %85, %cst_34 [2] : vector<4x8x8xf32> to vector<4x8xf32>
    %87 = vector.shape_cast %86 : vector<4x8xf32> to vector<4x8x1xf32>
    %88 = tpu.reciprocal %87 {approx = true} : vector<4x8x1xf32> -> vector<4x8x1xf32>
    %89 = vector.broadcast %88 : vector<4x8x1xf32> to vector<4x8x8xf32>
    %90 = arith.mulf %85, %89 : vector<4x8x8xf32>
    %91 = arith.truncf %90 : vector<4x8x8xf32> to vector<4x8x8xbf16>
    %92 = arith.truncf %72 : vector<4x8x16xf32> to vector<4x8x16xbf16>
    "tpu.trace_start"() <{level = 10 : i32, message = "bqk,bkd->bqd"}> : () -> ()
    %cst_35 = arith.constant dense<0.000000e+00> : vector<4x8x16xf32>
    %93 = tpu.matmul %91, %92, %cst_35 {dimension_numbers = #tpu.dot_dimension_numbers<[2], [1], [1], [2], [0, 0, 0, 1, 1, 2], [0], [0]>} : vector<4x8x8xbf16>, vector<4x8x16xbf16>, vector<4x8x16xf32> -> vector<4x8x16xf32>
    "tpu.trace_stop"() : () -> ()
    %94 = vector.shape_cast %93 : vector<4x8x16xf32> to vector<32x16xf32>
    %c0_36 = arith.constant 0 : index
    %c16 = arith.constant 16 : index
    %95 = vector.load %arg18[%c0_36, %c16] : memref<32x32xf32, #tpu.memory_space<vmem>>, vector<32x16xf32>
    tpu.vector_store %arg18[%c0_36, %c16], %94 {strides = array<i32>} : memref<32x32xf32, #tpu.memory_space<vmem>>, vector<32x16xf32>,
    %c0_37 = arith.constant 0 : index
    %c0_38 = arith.constant 0 : index
    %96 = vector.load %arg18[%c0_37, %c0_38] : memref<32x32xf32, #tpu.memory_space<vmem>>, vector<32x32xf32>
    %97 = arith.truncf %96 : vector<32x32xf32> to vector<32x32xbf16>
    %c0_39 = arith.constant 0 : index
    %c0_40 = arith.constant 0 : index
    %c0_41 = arith.constant 0 : index
    %98 = vector.load %arg8[%c0_39, %c0_40, %c0_41] : memref<1x32x32xbf16, #tpu.memory_space<vmem>>, vector<1x32x32xbf16>
    %99 = vector.shape_cast %98 : vector<1x32x32xbf16> to vector<32x32xbf16>
    %cst_42 = arith.constant dense<0.000000e+00> : vector<32x32xf32>
    %100 = tpu.matmul %97, %99, %cst_42 {dimension_numbers = #tpu.dot_dimension_numbers<[1], [0], [0], [1], [0, 0, 1, 1], [], []>} : vector<32x32xbf16>, vector<32x32xbf16>, vector<32x32xf32> -> vector<32x32xf32>
    %101 = arith.addf %3, %100 : vector<32x32xf32>
    %c0_43 = arith.constant 0 : index
    %c0_44 = arith.constant 0 : index
    %c0_45 = arith.constant 0 : index
    %102 = vector.load %arg9[%c0_43, %c0_44, %c0_45] : memref<1x1x32xf32, #tpu.memory_space<vmem>>, vector<1x1x32xf32>
    %103 = vector.shape_cast %102 : vector<1x1x32xf32> to vector<1x32xf32>
    %104 = vector.broadcast %103 : vector<1x32xf32> to vector<32x32xf32>
    %105 = arith.addf %101, %104 : vector<32x32xf32>
    %c0_46 = arith.constant 0 : index
    %c0_47 = arith.constant 0 : index
    %c0_48 = arith.constant 0 : index
    %106 = vector.load %arg10[%c0_46, %c0_47, %c0_48] : memref<1x1x32xf32, #tpu.memory_space<vmem>>, vector<1x1x32xf32>
    %107 = vector.shape_cast %106 : vector<1x1x32xf32> to vector<1x32xf32>
    %c0_49 = arith.constant 0 : index
    %c0_50 = arith.constant 0 : index
    %c0_51 = arith.constant 0 : index
    %108 = vector.load %arg11[%c0_49, %c0_50, %c0_51] : memref<1x1x32xf32, #tpu.memory_space<vmem>>, vector<1x1x32xf32>
    %109 = vector.shape_cast %108 : vector<1x1x32xf32> to vector<1x32xf32>
    %cst_52 = arith.constant dense<0.000000e+00> : vector<32xf32>
    %110 = vector.multi_reduction <add>, %105, %cst_52 [1] : vector<32x32xf32> to vector<32xf32>
    %111 = vector.shape_cast %110 : vector<32xf32> to vector<32x1xf32>
    %cst_53 = arith.constant 3.200000e+01 : f32
    %112 = vector.broadcast %cst_53 : f32 to vector<32x1xf32>
    %113 = arith.divf %111, %112 : vector<32x1xf32>
    %114 = vector.broadcast %113 : vector<32x1xf32> to vector<32x32xf32>
    %115 = arith.subf %105, %114 : vector<32x32xf32>
    %116 = arith.mulf %115, %115 : vector<32x32xf32>
    %cst_54 = arith.constant dense<0.000000e+00> : vector<32xf32>
    %117 = vector.multi_reduction <add>, %116, %cst_54 [1] : vector<32x32xf32> to vector<32xf32>
    %118 = vector.shape_cast %117 : vector<32xf32> to vector<32x1xf32>
    %cst_55 = arith.constant 3.200000e+01 : f32
    %119 = vector.broadcast %cst_55 : f32 to vector<32x1xf32>
    %120 = arith.divf %118, %119 : vector<32x1xf32>
    %121 = vector.broadcast %113 : vector<32x1xf32> to vector<32x32xf32>
    %122 = arith.subf %105, %121 : vector<32x32xf32>
    %cst_56 = arith.constant 9.99999974E-6 : f32
    %123 = vector.broadcast %cst_56 : f32 to vector<32x1xf32>
    %124 = arith.addf %120, %123 : vector<32x1xf32>
    %125 = math.rsqrt %124 : vector<32x1xf32>
    %126 = vector.broadcast %125 : vector<32x1xf32> to vector<32x32xf32>
    %127 = arith.mulf %122, %126 : vector<32x32xf32>
    %128 = vector.broadcast %107 : vector<1x32xf32> to vector<32x32xf32>
    %129 = arith.mulf %127, %128 : vector<32x32xf32>
    %130 = vector.broadcast %109 : vector<1x32xf32> to vector<32x32xf32>
    %131 = arith.addf %129, %130 : vector<32x32xf32>
    %132 = arith.truncf %131 : vector<32x32xf32> to vector<32x32xbf16>
    %c0_57 = arith.constant 0 : index
    %c0_58 = arith.constant 0 : index
    %c0_59 = arith.constant 0 : index
    %133 = vector.load %arg12[%c0_57, %c0_58, %c0_59] : memref<1x32x64xbf16, #tpu.memory_space<vmem>>, vector<1x32x64xbf16>
    %134 = vector.shape_cast %133 : vector<1x32x64xbf16> to vector<32x64xbf16>
    %cst_60 = arith.constant dense<0.000000e+00> : vector<32x64xf32>
    %135 = tpu.matmul %132, %134, %cst_60 {dimension_numbers = #tpu.dot_dimension_numbers<[1], [0], [0], [1], [0, 0, 1, 1], [], []>} : vector<32x32xbf16>, vector<32x64xbf16>, vector<32x64xf32> -> vector<32x64xf32>
    %c0_61 = arith.constant 0 : index
    %c0_62 = arith.constant 0 : index
    %c0_63 = arith.constant 0 : index
    %136 = vector.load %arg13[%c0_61, %c0_62, %c0_63] : memref<1x1x64xf32, #tpu.memory_space<vmem>>, vector<1x1x64xf32>
    %137 = vector.shape_cast %136 : vector<1x1x64xf32> to vector<1x64xf32>
    %138 = vector.broadcast %137 : vector<1x64xf32> to vector<32x64xf32>
    %139 = arith.addf %135, %138 : vector<32x64xf32>
    %140 = arith.mulf %139, %139 : vector<32x64xf32>
    %141 = arith.mulf %139, %140 : vector<32x64xf32>
    %cst_64 = arith.constant 4.471500e-02 : f32
    %142 = vector.broadcast %cst_64 : f32 to vector<32x64xf32>
    %143 = arith.mulf %142, %141 : vector<32x64xf32>
    %144 = arith.addf %139, %143 : vector<32x64xf32>
    %cst_65 = arith.constant 0.797884583 : f32
    %145 = vector.broadcast %cst_65 : f32 to vector<32x64xf32>
    %146 = arith.mulf %145, %144 : vector<32x64xf32>
    %147 = math.tanh %146 : vector<32x64xf32>
    %cst_66 = arith.constant 1.000000e+00 : f32
    %148 = vector.broadcast %cst_66 : f32 to vector<32x64xf32>
    %149 = arith.addf %148, %147 : vector<32x64xf32>
    %cst_67 = arith.constant 5.000000e-01 : f32
    %150 = vector.broadcast %cst_67 : f32 to vector<32x64xf32>
    %151 = arith.mulf %150, %149 : vector<32x64xf32>
    %152 = arith.mulf %139, %151 : vector<32x64xf32>
    %153 = arith.truncf %152 : vector<32x64xf32> to vector<32x64xbf16>
    %c0_68 = arith.constant 0 : index
    %c0_69 = arith.constant 0 : index
    %c0_70 = arith.constant 0 : index
    %154 = vector.load %arg14[%c0_68, %c0_69, %c0_70] : memref<1x64x32xbf16, #tpu.memory_space<vmem>>, vector<1x64x32xbf16>
    %155 = vector.shape_cast %154 : vector<1x64x32xbf16> to vector<64x32xbf16>
    %cst_71 = arith.constant dense<0.000000e+00> : vector<32x32xf32>
    %156 = tpu.matmul %153, %155, %cst_71 {dimension_numbers = #tpu.dot_dimension_numbers<[1], [0], [0], [1], [0, 0, 1, 1], [], []>} : vector<32x64xbf16>, vector<64x32xbf16>, vector<32x32xf32> -> vector<32x32xf32>
    %157 = arith.addf %105, %156 : vector<32x32xf32>
    %c0_72 = arith.constant 0 : index
    %c0_73 = arith.constant 0 : index
    %c0_74 = arith.constant 0 : index
    %158 = vector.load %arg15[%c0_72, %c0_73, %c0_74] : memref<1x1x32xf32, #tpu.memory_space<vmem>>, vector<1x1x32xf32>
    %159 = vector.shape_cast %158 : vector<1x1x32xf32> to vector<1x32xf32>
    %160 = vector.broadcast %159 : vector<1x32xf32> to vector<32x32xf32>
    %161 = arith.addf %157, %160 : vector<32x32xf32>
    %c0_75 = arith.constant 0 : index
    %c0_76 = arith.constant 0 : index
    %162 = vector.load %arg17[%c0_75, %c0_76] : memref<32x32xf32, #tpu.memory_space<vmem>>, vector<32x32xf32>
    tpu.vector_store %arg17[%c0_75, %c0_76], %161 {strides = array<i32>} : memref<32x32xf32, #tpu.memory_space<vmem>>, vector<32x32xf32>,
    %c1_i32 = arith.constant 1 : i32
    %163 = arith.cmpi eq, %arg1, %c1_i32 : i32
    %164 = arith.extui %163 : i1 to i32
    %c0_i32_77 = arith.constant 0 : i32
    %165 = arith.cmpi ne, %164, %c0_i32_77 : i32
    scf.if %165 {
      %166 = arith.truncf %161 : vector<32x32xf32> to vector<32x32xbf16>
      %c0_78 = arith.constant 0 : index
      %c0_79 = arith.constant 0 : index
      %167 = vector.load %arg16[%c0_78, %c0_79] : memref<32x32xbf16, #tpu.memory_space<vmem>>, vector<32x32xbf16>
      tpu.vector_store %arg16[%c0_78, %c0_79], %166 {strides = array<i32>} : memref<32x32xbf16, #tpu.memory_space<vmem>>, vector<32x32xbf16>,
    } else {
    }
    return
  }
  func.func @transform_0(%arg0: i32, %arg1: i32) -> (i32, i32) {
    %c0_i32 = arith.constant 0 : i32
    %c0_i32_0 = arith.constant 0 : i32
    return %arg0, %c0_i32 : i32, i32
  }
  func.func @transform_1(%arg0: i32, %arg1: i32) -> (i32, i32, i32, i32) {
    %c0_i32 = arith.constant 0 : i32
    %c0_i32_0 = arith.constant 0 : i32
    %c0_i32_1 = arith.constant 0 : i32
    %c0_i32_2 = arith.constant 0 : i32
    %c0_i32_3 = arith.constant 0 : i32
    return %c0_i32, %c0_i32_0, %c0_i32_1, %c0_i32_2 : i32, i32, i32, i32
  }
  func.func @transform_2(%arg0: i32, %arg1: i32) -> (i32, i32, i32) {
    %c0_i32 = arith.constant 0 : i32
    %c0_i32_0 = arith.constant 0 : i32
    %c0_i32_1 = arith.constant 0 : i32
    return %arg1, %c0_i32, %c0_i32_0 : i32, i32, i32
  }
  func.func @transform_3(%arg0: i32, %arg1: i32) -> (i32, i32, i32) {
    %c0_i32 = arith.constant 0 : i32
    %c0_i32_0 = arith.constant 0 : i32
    %c0_i32_1 = arith.constant 0 : i32
    return %arg1, %c0_i32, %c0_i32_0 : i32, i32, i32
  }
  func.func @transform_4(%arg0: i32, %arg1: i32) -> (i32, i32, i32) {
    %c0_i32 = arith.constant 0 : i32
    %c0_i32_0 = arith.constant 0 : i32
    %c0_i32_1 = arith.constant 0 : i32
    return %arg1, %c0_i32, %c0_i32_0 : i32, i32, i32
  }
  func.func @transform_5(%arg0: i32, %arg1: i32) -> (i32, i32, i32) {
    %c0_i32 = arith.constant 0 : i32
    %c0_i32_0 = arith.constant 0 : i32
    %c0_i32_1 = arith.constant 0 : i32
    return %arg1, %c0_i32, %c0_i32_0 : i32, i32, i32
  }
  func.func @transform_6(%arg0: i32, %arg1: i32) -> (i32, i32, i32) {
    %c0_i32 = arith.constant 0 : i32
    %c0_i32_0 = arith.constant 0 : i32
    %c0_i32_1 = arith.constant 0 : i32
    return %arg1, %c0_i32, %c0_i32_0 : i32, i32, i32
  }
  func.func @transform_7(%arg0: i32, %arg1: i32) -> (i32, i32, i32) {
    %c0_i32 = arith.constant 0 : i32
    %c0_i32_0 = arith.constant 0 : i32
    %c0_i32_1 = arith.constant 0 : i32
    return %arg1, %c0_i32, %c0_i32_0 : i32, i32, i32
  }
  func.func @transform_8(%arg0: i32, %arg1: i32) -> (i32, i32, i32) {
    %c0_i32 = arith.constant 0 : i32
    %c0_i32_0 = arith.constant 0 : i32
    %c0_i32_1 = arith.constant 0 : i32
    return %arg1, %c0_i32, %c0_i32_0 : i32, i32, i32
  }
  func.func @transform_9(%arg0: i32, %arg1: i32) -> (i32, i32, i32) {
    %c0_i32 = arith.constant 0 : i32
    %c0_i32_0 = arith.constant 0 : i32
    %c0_i32_1 = arith.constant 0 : i32
    return %arg1, %c0_i32, %c0_i32_0 : i32, i32, i32
  }
  func.func @transform_10(%arg0: i32, %arg1: i32) -> (i32, i32, i32) {
    %c0_i32 = arith.constant 0 : i32
    %c0_i32_0 = arith.constant 0 : i32
    %c0_i32_1 = arith.constant 0 : i32
    return %arg1, %c0_i32, %c0_i32_0 : i32, i32, i32
  }
  func.func @transform_11(%arg0: i32, %arg1: i32) -> (i32, i32, i32) {
    %c0_i32 = arith.constant 0 : i32
    %c0_i32_0 = arith.constant 0 : i32
    %c0_i32_1 = arith.constant 0 : i32
    return %arg1, %c0_i32, %c0_i32_0 : i32, i32, i32
  }
  func.func @transform_12(%arg0: i32, %arg1: i32) -> (i32, i32, i32) {
    %c0_i32 = arith.constant 0 : i32
    %c0_i32_0 = arith.constant 0 : i32
    %c0_i32_1 = arith.constant 0 : i32
    return %arg1, %c0_i32, %c0_i32_0 : i32, i32, i32
  }
  func.func @transform_13(%arg0: i32, %arg1: i32) -> (i32, i32, i32) {
    %c0_i32 = arith.constant 0 : i32
    %c0_i32_0 = arith.constant 0 : i32
    %c0_i32_1 = arith.constant 0 : i32
    return %arg1, %c0_i32, %c0_i32_0 : i32, i32, i32
  }
  func.func @transform_14(%arg0: i32, %arg1: i32) -> (i32, i32) {
    %c0_i32 = arith.constant 0 : i32
    %c0_i32_0 = arith.constant 0 : i32
    return %arg0, %c0_i32 : i32, i32
  }
}

module attributes {stable_mosaic.version = 11 : i64} {
  func.func @_ln_kernel(%arg0: i32, %arg1: memref<4x32xbf16, #tpu.memory_space<vmem>>, %arg2: memref<1x32xf32, #tpu.memory_space<vmem>>, %arg3: memref<1x32xf32, #tpu.memory_space<vmem>>, %arg4: memref<4x32xbf16, #tpu.memory_space<vmem>>) attributes {dimension_semantics = [#tpu.dimension_semantics<parallel>], iteration_bounds = array<i64: 1>, scalar_prefetch = 0 : i64, scratch_operands = 0 : i64, tpu.core_type = #tpu.core_type<tc>, window_params = [{transform_indices = @transform_0, window_bounds = array<i64: 4, 32>}, {pipeline_mode = #tpu.pipeline_mode<synchronous>, transform_indices = @transform_1, window_bounds = array<i64: 1, 32>}, {pipeline_mode = #tpu.pipeline_mode<synchronous>, transform_indices = @transform_2, window_bounds = array<i64: 1, 32>}, {transform_indices = @transform_3, window_bounds = array<i64: 4, 32>}]} {
    %c0 = arith.constant 0 : index
    %c0_0 = arith.constant 0 : index
    %0 = vector.load %arg1[%c0, %c0_0] : memref<4x32xbf16, #tpu.memory_space<vmem>>, vector<4x32xbf16>
    %1 = arith.extf %0 : vector<4x32xbf16> to vector<4x32xf32>
    %c0_1 = arith.constant 0 : index
    %c0_2 = arith.constant 0 : index
    %2 = vector.load %arg2[%c0_1, %c0_2] : memref<1x32xf32, #tpu.memory_space<vmem>>, vector<1x32xf32>
    %c0_3 = arith.constant 0 : index
    %c0_4 = arith.constant 0 : index
    %3 = vector.load %arg3[%c0_3, %c0_4] : memref<1x32xf32, #tpu.memory_space<vmem>>, vector<1x32xf32>
    %cst = arith.constant dense<0.000000e+00> : vector<4xf32>
    %4 = vector.multi_reduction <add>, %1, %cst [1] : vector<4x32xf32> to vector<4xf32>
    %5 = vector.shape_cast %4 : vector<4xf32> to vector<4x1xf32>
    %cst_5 = arith.constant 3.200000e+01 : f32
    %6 = vector.broadcast %cst_5 : f32 to vector<4x1xf32>
    %7 = arith.divf %5, %6 : vector<4x1xf32>
    %8 = vector.broadcast %7 : vector<4x1xf32> to vector<4x32xf32>
    %9 = arith.subf %1, %8 : vector<4x32xf32>
    %10 = arith.mulf %9, %9 : vector<4x32xf32>
    %cst_6 = arith.constant dense<0.000000e+00> : vector<4xf32>
    %11 = vector.multi_reduction <add>, %10, %cst_6 [1] : vector<4x32xf32> to vector<4xf32>
    %12 = vector.shape_cast %11 : vector<4xf32> to vector<4x1xf32>
    %cst_7 = arith.constant 3.200000e+01 : f32
    %13 = vector.broadcast %cst_7 : f32 to vector<4x1xf32>
    %14 = arith.divf %12, %13 : vector<4x1xf32>
    %15 = vector.broadcast %7 : vector<4x1xf32> to vector<4x32xf32>
    %16 = arith.subf %1, %15 : vector<4x32xf32>
    %cst_8 = arith.constant 9.99999974E-6 : f32
    %17 = vector.broadcast %cst_8 : f32 to vector<4x1xf32>
    %18 = arith.addf %14, %17 : vector<4x1xf32>
    %19 = math.rsqrt %18 : vector<4x1xf32>
    %20 = vector.broadcast %19 : vector<4x1xf32> to vector<4x32xf32>
    %21 = arith.mulf %16, %20 : vector<4x32xf32>
    %22 = vector.broadcast %2 : vector<1x32xf32> to vector<4x32xf32>
    %23 = arith.mulf %21, %22 : vector<4x32xf32>
    %24 = vector.broadcast %3 : vector<1x32xf32> to vector<4x32xf32>
    %25 = arith.addf %23, %24 : vector<4x32xf32>
    %26 = arith.truncf %25 : vector<4x32xf32> to vector<4x32xbf16>
    %c0_9 = arith.constant 0 : index
    %c0_10 = arith.constant 0 : index
    %27 = vector.load %arg4[%c0_9, %c0_10] : memref<4x32xbf16, #tpu.memory_space<vmem>>, vector<4x32xbf16>
    tpu.vector_store %arg4[%c0_9, %c0_10], %26 {strides = array<i32>} : memref<4x32xbf16, #tpu.memory_space<vmem>>, vector<4x32xbf16>,
    return
  }
  func.func @transform_0(%arg0: i32) -> (i32, i32) {
    %c0_i32 = arith.constant 0 : i32
    %c0_i32_0 = arith.constant 0 : i32
    return %arg0, %c0_i32 : i32, i32
  }
  func.func @transform_1(%arg0: i32) -> (i32, i32) {
    %c0_i32 = arith.constant 0 : i32
    %c0_i32_0 = arith.constant 0 : i32
    %c0_i32_1 = arith.constant 0 : i32
    return %c0_i32, %c0_i32_0 : i32, i32
  }
  func.func @transform_2(%arg0: i32) -> (i32, i32) {
    %c0_i32 = arith.constant 0 : i32
    %c0_i32_0 = arith.constant 0 : i32
    %c0_i32_1 = arith.constant 0 : i32
    return %c0_i32, %c0_i32_0 : i32, i32
  }
  func.func @transform_3(%arg0: i32) -> (i32, i32) {
    %c0_i32 = arith.constant 0 : i32
    %c0_i32_0 = arith.constant 0 : i32
    return %arg0, %c0_i32 : i32, i32
  }
}

module attributes {stable_mosaic.version = 11 : i64} {
  func.func @_tf_kernel(%arg0: i32, %arg1: i32, %arg2: memref<16x32xbf16, #tpu.memory_space<vmem>>, %arg3: memref<1x2x8x8xf32, #tpu.memory_space<vmem>>, %arg4: memref<1x1x32xf32, #tpu.memory_space<vmem>>, %arg5: memref<1x1x32xf32, #tpu.memory_space<vmem>>, %arg6: memref<1x32x96xbf16, #tpu.memory_space<vmem>>, %arg7: memref<1x1x96xf32, #tpu.memory_space<vmem>>, %arg8: memref<1x32x32xbf16, #tpu.memory_space<vmem>>, %arg9: memref<1x1x32xf32, #tpu.memory_space<vmem>>, %arg10: memref<1x1x32xf32, #tpu.memory_space<vmem>>, %arg11: memref<1x1x32xf32, #tpu.memory_space<vmem>>, %arg12: memref<1x32x64xbf16, #tpu.memory_space<vmem>>, %arg13: memref<1x1x64xf32, #tpu.memory_space<vmem>>, %arg14: memref<1x64x32xbf16, #tpu.memory_space<vmem>>, %arg15: memref<1x1x32xf32, #tpu.memory_space<vmem>>, %arg16: memref<16x32xbf16, #tpu.memory_space<vmem>>, %arg17: memref<16x32xf32, #tpu.memory_space<vmem>>, %arg18: memref<16x32xf32, #tpu.memory_space<vmem>>) attributes {dimension_semantics = [#tpu.dimension_semantics<parallel>, #tpu.dimension_semantics<arbitrary>], iteration_bounds = array<i64: 1, 2>, scalar_prefetch = 0 : i64, scratch_operands = 2 : i64, tpu.core_type = #tpu.core_type<tc>, window_params = [{transform_indices = @transform_0, window_bounds = array<i64: 16, 32>}, {pipeline_mode = #tpu.pipeline_mode<synchronous>, transform_indices = @transform_1, window_bounds = array<i64: 1, 2, 8, 8>}, {transform_indices = @transform_2, window_bounds = array<i64: 1, 1, 32>}, {transform_indices = @transform_3, window_bounds = array<i64: 1, 1, 32>}, {transform_indices = @transform_4, window_bounds = array<i64: 1, 32, 96>}, {transform_indices = @transform_5, window_bounds = array<i64: 1, 1, 96>}, {transform_indices = @transform_6, window_bounds = array<i64: 1, 32, 32>}, {transform_indices = @transform_7, window_bounds = array<i64: 1, 1, 32>}, {transform_indices = @transform_8, window_bounds = array<i64: 1, 1, 32>}, {transform_indices = @transform_9, window_bounds = array<i64: 1, 1, 32>}, {transform_indices = @transform_10, window_bounds = array<i64: 1, 32, 64>}, {transform_indices = @transform_11, window_bounds = array<i64: 1, 1, 64>}, {transform_indices = @transform_12, window_bounds = array<i64: 1, 64, 32>}, {transform_indices = @transform_13, window_bounds = array<i64: 1, 1, 32>}, {transform_indices = @transform_14, window_bounds = array<i64: 16, 32>}]} {
    %c0_i32 = arith.constant 0 : i32
    %0 = arith.cmpi eq, %arg1, %c0_i32 : i32
    %1 = arith.extui %0 : i1 to i32
    %c0_i32_0 = arith.constant 0 : i32
    %2 = arith.cmpi ne, %1, %c0_i32_0 : i32
    scf.if %2 {
      %c0_78 = arith.constant 0 : index
      %c0_79 = arith.constant 0 : index
      %166 = vector.load %arg2[%c0_78, %c0_79] : memref<16x32xbf16, #tpu.memory_space<vmem>>, vector<16x32xbf16>
      %167 = arith.extf %166 : vector<16x32xbf16> to vector<16x32xf32>
      %c0_80 = arith.constant 0 : index
      %c0_81 = arith.constant 0 : index
      %168 = vector.load %arg17[%c0_80, %c0_81] : memref<16x32xf32, #tpu.memory_space<vmem>>, vector<16x32xf32>
      tpu.vector_store %arg17[%c0_80, %c0_81], %167 {strides = array<i32>} : memref<16x32xf32, #tpu.memory_space<vmem>>, vector<16x32xf32>,
    } else {
    }
    %c0 = arith.constant 0 : index
    %c0_1 = arith.constant 0 : index
    %3 = vector.load %arg17[%c0, %c0_1] : memref<16x32xf32, #tpu.memory_space<vmem>>, vector<16x32xf32>
    %c0_2 = arith.constant 0 : index
    %c0_3 = arith.constant 0 : index
    %c0_4 = arith.constant 0 : index
    %4 = vector.load %arg4[%c0_2, %c0_3, %c0_4] : memref<1x1x32xf32, #tpu.memory_space<vmem>>, vector<1x1x32xf32>
    %5 = vector.shape_cast %4 : vector<1x1x32xf32> to vector<1x32xf32>
    %c0_5 = arith.constant 0 : index
    %c0_6 = arith.constant 0 : index
    %c0_7 = arith.constant 0 : index
    %6 = vector.load %arg5[%c0_5, %c0_6, %c0_7] : memref<1x1x32xf32, #tpu.memory_space<vmem>>, vector<1x1x32xf32>
    %7 = vector.shape_cast %6 : vector<1x1x32xf32> to vector<1x32xf32>
    %cst = arith.constant dense<0.000000e+00> : vector<16xf32>
    %8 = vector.multi_reduction <add>, %3, %cst [1] : vector<16x32xf32> to vector<16xf32>
    %9 = vector.shape_cast %8 : vector<16xf32> to vector<16x1xf32>
    %cst_8 = arith.constant 3.200000e+01 : f32
    %10 = vector.broadcast %cst_8 : f32 to vector<16x1xf32>
    %11 = arith.divf %9, %10 : vector<16x1xf32>
    %12 = vector.broadcast %11 : vector<16x1xf32> to vector<16x32xf32>
    %13 = arith.subf %3, %12 : vector<16x32xf32>
    %14 = arith.mulf %13, %13 : vector<16x32xf32>
    %cst_9 = arith.constant dense<0.000000e+00> : vector<16xf32>
    %15 = vector.multi_reduction <add>, %14, %cst_9 [1] : vector<16x32xf32> to vector<16xf32>
    %16 = vector.shape_cast %15 : vector<16xf32> to vector<16x1xf32>
    %cst_10 = arith.constant 3.200000e+01 : f32
    %17 = vector.broadcast %cst_10 : f32 to vector<16x1xf32>
    %18 = arith.divf %16, %17 : vector<16x1xf32>
    %19 = vector.broadcast %11 : vector<16x1xf32> to vector<16x32xf32>
    %20 = arith.subf %3, %19 : vector<16x32xf32>
    %cst_11 = arith.constant 9.99999974E-6 : f32
    %21 = vector.broadcast %cst_11 : f32 to vector<16x1xf32>
    %22 = arith.addf %18, %21 : vector<16x1xf32>
    %23 = math.rsqrt %22 : vector<16x1xf32>
    %24 = vector.broadcast %23 : vector<16x1xf32> to vector<16x32xf32>
    %25 = arith.mulf %20, %24 : vector<16x32xf32>
    %26 = vector.broadcast %5 : vector<1x32xf32> to vector<16x32xf32>
    %27 = arith.mulf %25, %26 : vector<16x32xf32>
    %28 = vector.broadcast %7 : vector<1x32xf32> to vector<16x32xf32>
    %29 = arith.addf %27, %28 : vector<16x32xf32>
    %30 = arith.truncf %29 : vector<16x32xf32> to vector<16x32xbf16>
    %c0_12 = arith.constant 0 : index
    %c0_13 = arith.constant 0 : index
    %c0_14 = arith.constant 0 : index
    %31 = vector.load %arg6[%c0_12, %c0_13, %c0_14] : memref<1x32x96xbf16, #tpu.memory_space<vmem>>, vector<1x32x96xbf16>
    %32 = vector.shape_cast %31 : vector<1x32x96xbf16> to vector<32x96xbf16>
    %cst_15 = arith.constant dense<0.000000e+00> : vector<16x96xf32>
    %33 = tpu.matmul %30, %32, %cst_15 {dimension_numbers = #tpu.dot_dimension_numbers<[1], [0], [0], [1], [0, 0, 1, 1], [], []>} : vector<16x32xbf16>, vector<32x96xbf16>, vector<16x96xf32> -> vector<16x96xf32>
    %c0_16 = arith.constant 0 : index
    %c0_17 = arith.constant 0 : index
    %c0_18 = arith.constant 0 : index
    %34 = vector.load %arg7[%c0_16, %c0_17, %c0_18] : memref<1x1x96xf32, #tpu.memory_space<vmem>>, vector<1x1x96xf32>
    %35 = vector.shape_cast %34 : vector<1x1x96xf32> to vector<1x96xf32>
    %36 = vector.broadcast %35 : vector<1x96xf32> to vector<16x96xf32>
    %37 = arith.addf %33, %36 : vector<16x96xf32>
    %38 = vector.extract_strided_slice %37 {offsets = [0, 0], sizes = [16, 16], strides = [1, 1]} : vector<16x96xf32> to vector<16x16xf32>
    %39 = vector.shape_cast %38 : vector<16x16xf32> to vector<2x8x16xf32>
    %40 = vector.extract_strided_slice %37 {offsets = [0, 32], sizes = [16, 16], strides = [1, 1]} : vector<16x96xf32> to vector<16x16xf32>
    %41 = vector.shape_cast %40 : vector<16x16xf32> to vector<2x8x16xf32>
    %42 = vector.extract_strided_slice %37 {offsets = [0, 64], sizes = [16, 16], strides = [1, 1]} : vector<16x96xf32> to vector<16x16xf32>
    %43 = vector.shape_cast %42 : vector<16x16xf32> to vector<2x8x16xf32>
    %44 = arith.truncf %39 : vector<2x8x16xf32> to vector<2x8x16xbf16>
    %45 = arith.truncf %41 : vector<2x8x16xf32> to vector<2x8x16xbf16>
    "tpu.trace_start"() <{level = 10 : i32, message = "bqd,bkd->bqk"}> : () -> ()
    %cst_19 = arith.constant dense<0.000000e+00> : vector<2x8x8xf32>
    %46 = tpu.matmul %44, %45, %cst_19 {dimension_numbers = #tpu.dot_dimension_numbers<[2], [2], [1], [1], [0, 0, 0, 1, 1, 1], [0], [0]>} : vector<2x8x16xbf16>, vector<2x8x16xbf16>, vector<2x8x8xf32> -> vector<2x8x8xf32>
    "tpu.trace_stop"() : () -> ()
    %c0_20 = arith.constant 0 : index
    %c0_21 = arith.constant 0 : index
    %c0_22 = arith.constant 0 : index
    %c0_23 = arith.constant 0 : index
    %47 = vector.load %arg3[%c0_20, %c0_21, %c0_22, %c0_23] : memref<1x2x8x8xf32, #tpu.memory_space<vmem>>, vector<1x1x8x8xf32>
    %48 = vector.shape_cast %47 : vector<1x1x8x8xf32> to vector<8x8xf32>
    %49 = vector.shape_cast %48 : vector<8x8xf32> to vector<1x8x8xf32>
    %50 = vector.broadcast %49 : vector<1x8x8xf32> to vector<2x8x8xf32>
    %51 = arith.addf %46, %50 : vector<2x8x8xf32>
    %cst_24 = arith.constant dense<0xFF800000> : vector<2x8xf32>
    %52 = vector.multi_reduction <maximumf>, %51, %cst_24 [2] : vector<2x8x8xf32> to vector<2x8xf32>
    %53 = vector.shape_cast %52 : vector<2x8xf32> to vector<2x8x1xf32>
    %54 = vector.broadcast %53 : vector<2x8x1xf32> to vector<2x8x8xf32>
    %55 = arith.subf %51, %54 : vector<2x8x8xf32>
    %56 = math.exp %55 : vector<2x8x8xf32>
    %cst_25 = arith.constant dense<0.000000e+00> : vector<2x8xf32>
    %57 = vector.multi_reduction <add>, %56, %cst_25 [2] : vector<2x8x8xf32> to vector<2x8xf32>
    %58 = vector.shape_cast %57 : vector<2x8xf32> to vector<2x8x1xf32>
    %59 = tpu.reciprocal %58 {approx = true} : vector<2x8x1xf32> -> vector<2x8x1xf32>
    %60 = vector.broadcast %59 : vector<2x8x1xf32> to vector<2x8x8xf32>
    %61 = arith.mulf %56, %60 : vector<2x8x8xf32>
    %62 = arith.truncf %61 : vector<2x8x8xf32> to vector<2x8x8xbf16>
    %63 = arith.truncf %43 : vector<2x8x16xf32> to vector<2x8x16xbf16>
    "tpu.trace_start"() <{level = 10 : i32, message = "bqk,bkd->bqd"}> : () -> ()
    %cst_26 = arith.constant dense<0.000000e+00> : vector<2x8x16xf32>
    %64 = tpu.matmul %62, %63, %cst_26 {dimension_numbers = #tpu.dot_dimension_numbers<[2], [1], [1], [2], [0, 0, 0, 1, 1, 2], [0], [0]>} : vector<2x8x8xbf16>, vector<2x8x16xbf16>, vector<2x8x16xf32> -> vector<2x8x16xf32>
    "tpu.trace_stop"() : () -> ()
    %65 = vector.shape_cast %64 : vector<2x8x16xf32> to vector<16x16xf32>
    %c0_27 = arith.constant 0 : index
    %c0_28 = arith.constant 0 : index
    %66 = vector.load %arg18[%c0_27, %c0_28] : memref<16x32xf32, #tpu.memory_space<vmem>>, vector<16x16xf32>
    tpu.vector_store %arg18[%c0_27, %c0_28], %65 {strides = array<i32>} : memref<16x32xf32, #tpu.memory_space<vmem>>, vector<16x16xf32>,
    %67 = vector.extract_strided_slice %37 {offsets = [0, 16], sizes = [16, 16], strides = [1, 1]} : vector<16x96xf32> to vector<16x16xf32>
    %68 = vector.shape_cast %67 : vector<16x16xf32> to vector<2x8x16xf32>
    %69 = vector.extract_strided_slice %37 {offsets = [0, 48], sizes = [16, 16], strides = [1, 1]} : vector<16x96xf32> to vector<16x16xf32>
    %70 = vector.shape_cast %69 : vector<16x16xf32> to vector<2x8x16xf32>
    %71 = vector.extract_strided_slice %37 {offsets = [0, 80], sizes = [16, 16], strides = [1, 1]} : vector<16x96xf32> to vector<16x16xf32>
    %72 = vector.shape_cast %71 : vector<16x16xf32> to vector<2x8x16xf32>
    %73 = arith.truncf %68 : vector<2x8x16xf32> to vector<2x8x16xbf16>
    %74 = arith.truncf %70 : vector<2x8x16xf32> to vector<2x8x16xbf16>
    "tpu.trace_start"() <{level = 10 : i32, message = "bqd,bkd->bqk"}> : () -> ()
    %cst_29 = arith.constant dense<0.000000e+00> : vector<2x8x8xf32>
    %75 = tpu.matmul %73, %74, %cst_29 {dimension_numbers = #tpu.dot_dimension_numbers<[2], [2], [1], [1], [0, 0, 0, 1, 1, 1], [0], [0]>} : vector<2x8x16xbf16>, vector<2x8x16xbf16>, vector<2x8x8xf32> -> vector<2x8x8xf32>
    "tpu.trace_stop"() : () -> ()
    %c0_30 = arith.constant 0 : index
    %c1 = arith.constant 1 : index
    %c0_31 = arith.constant 0 : index
    %c0_32 = arith.constant 0 : index
    %76 = vector.load %arg3[%c0_30, %c1, %c0_31, %c0_32] : memref<1x2x8x8xf32, #tpu.memory_space<vmem>>, vector<1x1x8x8xf32>
    %77 = vector.shape_cast %76 : vector<1x1x8x8xf32> to vector<8x8xf32>
    %78 = vector.shape_cast %77 : vector<8x8xf32> to vector<1x8x8xf32>
    %79 = vector.broadcast %78 : vector<1x8x8xf32> to vector<2x8x8xf32>
    %80 = arith.addf %75, %79 : vector<2x8x8xf32>
    %cst_33 = arith.constant dense<0xFF800000> : vector<2x8xf32>
    %81 = vector.multi_reduction <maximumf>, %80, %cst_33 [2] : vector<2x8x8xf32> to vector<2x8xf32>
    %82 = vector.shape_cast %81 : vector<2x8xf32> to vector<2x8x1xf32>
    %83 = vector.broadcast %82 : vector<2x8x1xf32> to vector<2x8x8xf32>
    %84 = arith.subf %80, %83 : vector<2x8x8xf32>
    %85 = math.exp %84 : vector<2x8x8xf32>
    %cst_34 = arith.constant dense<0.000000e+00> : vector<2x8xf32>
    %86 = vector.multi_reduction <add>, %85, %cst_34 [2] : vector<2x8x8xf32> to vector<2x8xf32>
    %87 = vector.shape_cast %86 : vector<2x8xf32> to vector<2x8x1xf32>
    %88 = tpu.reciprocal %87 {approx = true} : vector<2x8x1xf32> -> vector<2x8x1xf32>
    %89 = vector.broadcast %88 : vector<2x8x1xf32> to vector<2x8x8xf32>
    %90 = arith.mulf %85, %89 : vector<2x8x8xf32>
    %91 = arith.truncf %90 : vector<2x8x8xf32> to vector<2x8x8xbf16>
    %92 = arith.truncf %72 : vector<2x8x16xf32> to vector<2x8x16xbf16>
    "tpu.trace_start"() <{level = 10 : i32, message = "bqk,bkd->bqd"}> : () -> ()
    %cst_35 = arith.constant dense<0.000000e+00> : vector<2x8x16xf32>
    %93 = tpu.matmul %91, %92, %cst_35 {dimension_numbers = #tpu.dot_dimension_numbers<[2], [1], [1], [2], [0, 0, 0, 1, 1, 2], [0], [0]>} : vector<2x8x8xbf16>, vector<2x8x16xbf16>, vector<2x8x16xf32> -> vector<2x8x16xf32>
    "tpu.trace_stop"() : () -> ()
    %94 = vector.shape_cast %93 : vector<2x8x16xf32> to vector<16x16xf32>
    %c0_36 = arith.constant 0 : index
    %c16 = arith.constant 16 : index
    %95 = vector.load %arg18[%c0_36, %c16] : memref<16x32xf32, #tpu.memory_space<vmem>>, vector<16x16xf32>
    tpu.vector_store %arg18[%c0_36, %c16], %94 {strides = array<i32>} : memref<16x32xf32, #tpu.memory_space<vmem>>, vector<16x16xf32>,
    %c0_37 = arith.constant 0 : index
    %c0_38 = arith.constant 0 : index
    %96 = vector.load %arg18[%c0_37, %c0_38] : memref<16x32xf32, #tpu.memory_space<vmem>>, vector<16x32xf32>
    %97 = arith.truncf %96 : vector<16x32xf32> to vector<16x32xbf16>
    %c0_39 = arith.constant 0 : index
    %c0_40 = arith.constant 0 : index
    %c0_41 = arith.constant 0 : index
    %98 = vector.load %arg8[%c0_39, %c0_40, %c0_41] : memref<1x32x32xbf16, #tpu.memory_space<vmem>>, vector<1x32x32xbf16>
    %99 = vector.shape_cast %98 : vector<1x32x32xbf16> to vector<32x32xbf16>
    %cst_42 = arith.constant dense<0.000000e+00> : vector<16x32xf32>
    %100 = tpu.matmul %97, %99, %cst_42 {dimension_numbers = #tpu.dot_dimension_numbers<[1], [0], [0], [1], [0, 0, 1, 1], [], []>} : vector<16x32xbf16>, vector<32x32xbf16>, vector<16x32xf32> -> vector<16x32xf32>
    %101 = arith.addf %3, %100 : vector<16x32xf32>
    %c0_43 = arith.constant 0 : index
    %c0_44 = arith.constant 0 : index
    %c0_45 = arith.constant 0 : index
    %102 = vector.load %arg9[%c0_43, %c0_44, %c0_45] : memref<1x1x32xf32, #tpu.memory_space<vmem>>, vector<1x1x32xf32>
    %103 = vector.shape_cast %102 : vector<1x1x32xf32> to vector<1x32xf32>
    %104 = vector.broadcast %103 : vector<1x32xf32> to vector<16x32xf32>
    %105 = arith.addf %101, %104 : vector<16x32xf32>
    %c0_46 = arith.constant 0 : index
    %c0_47 = arith.constant 0 : index
    %c0_48 = arith.constant 0 : index
    %106 = vector.load %arg10[%c0_46, %c0_47, %c0_48] : memref<1x1x32xf32, #tpu.memory_space<vmem>>, vector<1x1x32xf32>
    %107 = vector.shape_cast %106 : vector<1x1x32xf32> to vector<1x32xf32>
    %c0_49 = arith.constant 0 : index
    %c0_50 = arith.constant 0 : index
    %c0_51 = arith.constant 0 : index
    %108 = vector.load %arg11[%c0_49, %c0_50, %c0_51] : memref<1x1x32xf32, #tpu.memory_space<vmem>>, vector<1x1x32xf32>
    %109 = vector.shape_cast %108 : vector<1x1x32xf32> to vector<1x32xf32>
    %cst_52 = arith.constant dense<0.000000e+00> : vector<16xf32>
    %110 = vector.multi_reduction <add>, %105, %cst_52 [1] : vector<16x32xf32> to vector<16xf32>
    %111 = vector.shape_cast %110 : vector<16xf32> to vector<16x1xf32>
    %cst_53 = arith.constant 3.200000e+01 : f32
    %112 = vector.broadcast %cst_53 : f32 to vector<16x1xf32>
    %113 = arith.divf %111, %112 : vector<16x1xf32>
    %114 = vector.broadcast %113 : vector<16x1xf32> to vector<16x32xf32>
    %115 = arith.subf %105, %114 : vector<16x32xf32>
    %116 = arith.mulf %115, %115 : vector<16x32xf32>
    %cst_54 = arith.constant dense<0.000000e+00> : vector<16xf32>
    %117 = vector.multi_reduction <add>, %116, %cst_54 [1] : vector<16x32xf32> to vector<16xf32>
    %118 = vector.shape_cast %117 : vector<16xf32> to vector<16x1xf32>
    %cst_55 = arith.constant 3.200000e+01 : f32
    %119 = vector.broadcast %cst_55 : f32 to vector<16x1xf32>
    %120 = arith.divf %118, %119 : vector<16x1xf32>
    %121 = vector.broadcast %113 : vector<16x1xf32> to vector<16x32xf32>
    %122 = arith.subf %105, %121 : vector<16x32xf32>
    %cst_56 = arith.constant 9.99999974E-6 : f32
    %123 = vector.broadcast %cst_56 : f32 to vector<16x1xf32>
    %124 = arith.addf %120, %123 : vector<16x1xf32>
    %125 = math.rsqrt %124 : vector<16x1xf32>
    %126 = vector.broadcast %125 : vector<16x1xf32> to vector<16x32xf32>
    %127 = arith.mulf %122, %126 : vector<16x32xf32>
    %128 = vector.broadcast %107 : vector<1x32xf32> to vector<16x32xf32>
    %129 = arith.mulf %127, %128 : vector<16x32xf32>
    %130 = vector.broadcast %109 : vector<1x32xf32> to vector<16x32xf32>
    %131 = arith.addf %129, %130 : vector<16x32xf32>
    %132 = arith.truncf %131 : vector<16x32xf32> to vector<16x32xbf16>
    %c0_57 = arith.constant 0 : index
    %c0_58 = arith.constant 0 : index
    %c0_59 = arith.constant 0 : index
    %133 = vector.load %arg12[%c0_57, %c0_58, %c0_59] : memref<1x32x64xbf16, #tpu.memory_space<vmem>>, vector<1x32x64xbf16>
    %134 = vector.shape_cast %133 : vector<1x32x64xbf16> to vector<32x64xbf16>
    %cst_60 = arith.constant dense<0.000000e+00> : vector<16x64xf32>
    %135 = tpu.matmul %132, %134, %cst_60 {dimension_numbers = #tpu.dot_dimension_numbers<[1], [0], [0], [1], [0, 0, 1, 1], [], []>} : vector<16x32xbf16>, vector<32x64xbf16>, vector<16x64xf32> -> vector<16x64xf32>
    %c0_61 = arith.constant 0 : index
    %c0_62 = arith.constant 0 : index
    %c0_63 = arith.constant 0 : index
    %136 = vector.load %arg13[%c0_61, %c0_62, %c0_63] : memref<1x1x64xf32, #tpu.memory_space<vmem>>, vector<1x1x64xf32>
    %137 = vector.shape_cast %136 : vector<1x1x64xf32> to vector<1x64xf32>
    %138 = vector.broadcast %137 : vector<1x64xf32> to vector<16x64xf32>
    %139 = arith.addf %135, %138 : vector<16x64xf32>
    %140 = arith.mulf %139, %139 : vector<16x64xf32>
    %141 = arith.mulf %139, %140 : vector<16x64xf32>
    %cst_64 = arith.constant 4.471500e-02 : f32
    %142 = vector.broadcast %cst_64 : f32 to vector<16x64xf32>
    %143 = arith.mulf %142, %141 : vector<16x64xf32>
    %144 = arith.addf %139, %143 : vector<16x64xf32>
    %cst_65 = arith.constant 0.797884583 : f32
    %145 = vector.broadcast %cst_65 : f32 to vector<16x64xf32>
    %146 = arith.mulf %145, %144 : vector<16x64xf32>
    %147 = math.tanh %146 : vector<16x64xf32>
    %cst_66 = arith.constant 1.000000e+00 : f32
    %148 = vector.broadcast %cst_66 : f32 to vector<16x64xf32>
    %149 = arith.addf %148, %147 : vector<16x64xf32>
    %cst_67 = arith.constant 5.000000e-01 : f32
    %150 = vector.broadcast %cst_67 : f32 to vector<16x64xf32>
    %151 = arith.mulf %150, %149 : vector<16x64xf32>
    %152 = arith.mulf %139, %151 : vector<16x64xf32>
    %153 = arith.truncf %152 : vector<16x64xf32> to vector<16x64xbf16>
    %c0_68 = arith.constant 0 : index
    %c0_69 = arith.constant 0 : index
    %c0_70 = arith.constant 0 : index
    %154 = vector.load %arg14[%c0_68, %c0_69, %c0_70] : memref<1x64x32xbf16, #tpu.memory_space<vmem>>, vector<1x64x32xbf16>
    %155 = vector.shape_cast %154 : vector<1x64x32xbf16> to vector<64x32xbf16>
    %cst_71 = arith.constant dense<0.000000e+00> : vector<16x32xf32>
    %156 = tpu.matmul %153, %155, %cst_71 {dimension_numbers = #tpu.dot_dimension_numbers<[1], [0], [0], [1], [0, 0, 1, 1], [], []>} : vector<16x64xbf16>, vector<64x32xbf16>, vector<16x32xf32> -> vector<16x32xf32>
    %157 = arith.addf %105, %156 : vector<16x32xf32>
    %c0_72 = arith.constant 0 : index
    %c0_73 = arith.constant 0 : index
    %c0_74 = arith.constant 0 : index
    %158 = vector.load %arg15[%c0_72, %c0_73, %c0_74] : memref<1x1x32xf32, #tpu.memory_space<vmem>>, vector<1x1x32xf32>
    %159 = vector.shape_cast %158 : vector<1x1x32xf32> to vector<1x32xf32>
    %160 = vector.broadcast %159 : vector<1x32xf32> to vector<16x32xf32>
    %161 = arith.addf %157, %160 : vector<16x32xf32>
    %c0_75 = arith.constant 0 : index
    %c0_76 = arith.constant 0 : index
    %162 = vector.load %arg17[%c0_75, %c0_76] : memref<16x32xf32, #tpu.memory_space<vmem>>, vector<16x32xf32>
    tpu.vector_store %arg17[%c0_75, %c0_76], %161 {strides = array<i32>} : memref<16x32xf32, #tpu.memory_space<vmem>>, vector<16x32xf32>,
    %c1_i32 = arith.constant 1 : i32
    %163 = arith.cmpi eq, %arg1, %c1_i32 : i32
    %164 = arith.extui %163 : i1 to i32
    %c0_i32_77 = arith.constant 0 : i32
    %165 = arith.cmpi ne, %164, %c0_i32_77 : i32
    scf.if %165 {
      %166 = arith.truncf %161 : vector<16x32xf32> to vector<16x32xbf16>
      %c0_78 = arith.constant 0 : index
      %c0_79 = arith.constant 0 : index
      %167 = vector.load %arg16[%c0_78, %c0_79] : memref<16x32xbf16, #tpu.memory_space<vmem>>, vector<16x32xbf16>
      tpu.vector_store %arg16[%c0_78, %c0_79], %166 {strides = array<i32>} : memref<16x32xbf16, #tpu.memory_space<vmem>>, vector<16x32xbf16>,
    } else {
    }
    return
  }
  func.func @transform_0(%arg0: i32, %arg1: i32) -> (i32, i32) {
    %c0_i32 = arith.constant 0 : i32
    %c0_i32_0 = arith.constant 0 : i32
    return %arg0, %c0_i32 : i32, i32
  }
  func.func @transform_1(%arg0: i32, %arg1: i32) -> (i32, i32, i32, i32) {
    %c0_i32 = arith.constant 0 : i32
    %c0_i32_0 = arith.constant 0 : i32
    %c0_i32_1 = arith.constant 0 : i32
    %c0_i32_2 = arith.constant 0 : i32
    %c0_i32_3 = arith.constant 0 : i32
    return %c0_i32, %c0_i32_0, %c0_i32_1, %c0_i32_2 : i32, i32, i32, i32
  }
  func.func @transform_2(%arg0: i32, %arg1: i32) -> (i32, i32, i32) {
    %c0_i32 = arith.constant 0 : i32
    %c0_i32_0 = arith.constant 0 : i32
    %c0_i32_1 = arith.constant 0 : i32
    return %arg1, %c0_i32, %c0_i32_0 : i32, i32, i32
  }
  func.func @transform_3(%arg0: i32, %arg1: i32) -> (i32, i32, i32) {
    %c0_i32 = arith.constant 0 : i32
    %c0_i32_0 = arith.constant 0 : i32
    %c0_i32_1 = arith.constant 0 : i32
    return %arg1, %c0_i32, %c0_i32_0 : i32, i32, i32
  }
  func.func @transform_4(%arg0: i32, %arg1: i32) -> (i32, i32, i32) {
    %c0_i32 = arith.constant 0 : i32
    %c0_i32_0 = arith.constant 0 : i32
    %c0_i32_1 = arith.constant 0 : i32
    return %arg1, %c0_i32, %c0_i32_0 : i32, i32, i32
  }
  func.func @transform_5(%arg0: i32, %arg1: i32) -> (i32, i32, i32) {
    %c0_i32 = arith.constant 0 : i32
    %c0_i32_0 = arith.constant 0 : i32
    %c0_i32_1 = arith.constant 0 : i32
    return %arg1, %c0_i32, %c0_i32_0 : i32, i32, i32
  }
  func.func @transform_6(%arg0: i32, %arg1: i32) -> (i32, i32, i32) {
    %c0_i32 = arith.constant 0 : i32
    %c0_i32_0 = arith.constant 0 : i32
    %c0_i32_1 = arith.constant 0 : i32
    return %arg1, %c0_i32, %c0_i32_0 : i32, i32, i32
  }
  func.func @transform_7(%arg0: i32, %arg1: i32) -> (i32, i32, i32) {
    %c0_i32 = arith.constant 0 : i32
    %c0_i32_0 = arith.constant 0 : i32
    %c0_i32_1 = arith.constant 0 : i32
    return %arg1, %c0_i32, %c0_i32_0 : i32, i32, i32
  }
  func.func @transform_8(%arg0: i32, %arg1: i32) -> (i32, i32, i32) {
    %c0_i32 = arith.constant 0 : i32
    %c0_i32_0 = arith.constant 0 : i32
    %c0_i32_1 = arith.constant 0 : i32
    return %arg1, %c0_i32, %c0_i32_0 : i32, i32, i32
  }
  func.func @transform_9(%arg0: i32, %arg1: i32) -> (i32, i32, i32) {
    %c0_i32 = arith.constant 0 : i32
    %c0_i32_0 = arith.constant 0 : i32
    %c0_i32_1 = arith.constant 0 : i32
    return %arg1, %c0_i32, %c0_i32_0 : i32, i32, i32
  }
  func.func @transform_10(%arg0: i32, %arg1: i32) -> (i32, i32, i32) {
    %c0_i32 = arith.constant 0 : i32
    %c0_i32_0 = arith.constant 0 : i32
    %c0_i32_1 = arith.constant 0 : i32
    return %arg1, %c0_i32, %c0_i32_0 : i32, i32, i32
  }
  func.func @transform_11(%arg0: i32, %arg1: i32) -> (i32, i32, i32) {
    %c0_i32 = arith.constant 0 : i32
    %c0_i32_0 = arith.constant 0 : i32
    %c0_i32_1 = arith.constant 0 : i32
    return %arg1, %c0_i32, %c0_i32_0 : i32, i32, i32
  }
  func.func @transform_12(%arg0: i32, %arg1: i32) -> (i32, i32, i32) {
    %c0_i32 = arith.constant 0 : i32
    %c0_i32_0 = arith.constant 0 : i32
    %c0_i32_1 = arith.constant 0 : i32
    return %arg1, %c0_i32, %c0_i32_0 : i32, i32, i32
  }
  func.func @transform_13(%arg0: i32, %arg1: i32) -> (i32, i32, i32) {
    %c0_i32 = arith.constant 0 : i32
    %c0_i32_0 = arith.constant 0 : i32
    %c0_i32_1 = arith.constant 0 : i32
    return %arg1, %c0_i32, %c0_i32_0 : i32, i32, i32
  }
  func.func @transform_14(%arg0: i32, %arg1: i32) -> (i32, i32) {
    %c0_i32 = arith.constant 0 : i32
    %c0_i32_0 = arith.constant 0 : i32
    return %arg0, %c0_i32 : i32, i32
  }
}

module attributes {stable_mosaic.version = 11 : i64} {
  func.func @_ln_head_kernel(%arg0: i32, %arg1: memref<2x32xbf16, #tpu.memory_space<vmem>>, %arg2: memref<1x32xf32, #tpu.memory_space<vmem>>, %arg3: memref<1x32xf32, #tpu.memory_space<vmem>>, %arg4: memref<32x128xbf16, #tpu.memory_space<vmem>>, %arg5: memref<1x128xf32, #tpu.memory_space<vmem>>, %arg6: memref<2x128xf32, #tpu.memory_space<vmem>>) attributes {dimension_semantics = [#tpu.dimension_semantics<arbitrary>], iteration_bounds = array<i64: 1>, scalar_prefetch = 0 : i64, scratch_operands = 0 : i64, tpu.core_type = #tpu.core_type<tc>, window_params = [{pipeline_mode = #tpu.pipeline_mode<synchronous>, transform_indices = @transform_0, window_bounds = array<i64: 2, 32>}, {pipeline_mode = #tpu.pipeline_mode<synchronous>, transform_indices = @transform_1, window_bounds = array<i64: 1, 32>}, {pipeline_mode = #tpu.pipeline_mode<synchronous>, transform_indices = @transform_2, window_bounds = array<i64: 1, 32>}, {pipeline_mode = #tpu.pipeline_mode<synchronous>, transform_indices = @transform_3, window_bounds = array<i64: 32, 128>}, {pipeline_mode = #tpu.pipeline_mode<synchronous>, transform_indices = @transform_4, window_bounds = array<i64: 1, 128>}, {pipeline_mode = #tpu.pipeline_mode<synchronous>, transform_indices = @transform_5, window_bounds = array<i64: 2, 128>}]} {
    %c0 = arith.constant 0 : index
    %c0_0 = arith.constant 0 : index
    %0 = vector.load %arg1[%c0, %c0_0] : memref<2x32xbf16, #tpu.memory_space<vmem>>, vector<2x32xbf16>
    %1 = arith.extf %0 : vector<2x32xbf16> to vector<2x32xf32>
    %c0_1 = arith.constant 0 : index
    %c0_2 = arith.constant 0 : index
    %2 = vector.load %arg2[%c0_1, %c0_2] : memref<1x32xf32, #tpu.memory_space<vmem>>, vector<1x32xf32>
    %c0_3 = arith.constant 0 : index
    %c0_4 = arith.constant 0 : index
    %3 = vector.load %arg3[%c0_3, %c0_4] : memref<1x32xf32, #tpu.memory_space<vmem>>, vector<1x32xf32>
    %cst = arith.constant dense<0.000000e+00> : vector<2xf32>
    %4 = vector.multi_reduction <add>, %1, %cst [1] : vector<2x32xf32> to vector<2xf32>
    %5 = vector.shape_cast %4 : vector<2xf32> to vector<2x1xf32>
    %cst_5 = arith.constant 3.200000e+01 : f32
    %6 = vector.broadcast %cst_5 : f32 to vector<2x1xf32>
    %7 = arith.divf %5, %6 : vector<2x1xf32>
    %8 = vector.broadcast %7 : vector<2x1xf32> to vector<2x32xf32>
    %9 = arith.subf %1, %8 : vector<2x32xf32>
    %10 = arith.mulf %9, %9 : vector<2x32xf32>
    %cst_6 = arith.constant dense<0.000000e+00> : vector<2xf32>
    %11 = vector.multi_reduction <add>, %10, %cst_6 [1] : vector<2x32xf32> to vector<2xf32>
    %12 = vector.shape_cast %11 : vector<2xf32> to vector<2x1xf32>
    %cst_7 = arith.constant 3.200000e+01 : f32
    %13 = vector.broadcast %cst_7 : f32 to vector<2x1xf32>
    %14 = arith.divf %12, %13 : vector<2x1xf32>
    %15 = vector.broadcast %7 : vector<2x1xf32> to vector<2x32xf32>
    %16 = arith.subf %1, %15 : vector<2x32xf32>
    %cst_8 = arith.constant 9.99999974E-6 : f32
    %17 = vector.broadcast %cst_8 : f32 to vector<2x1xf32>
    %18 = arith.addf %14, %17 : vector<2x1xf32>
    %19 = math.rsqrt %18 : vector<2x1xf32>
    %20 = vector.broadcast %19 : vector<2x1xf32> to vector<2x32xf32>
    %21 = arith.mulf %16, %20 : vector<2x32xf32>
    %22 = vector.broadcast %2 : vector<1x32xf32> to vector<2x32xf32>
    %23 = arith.mulf %21, %22 : vector<2x32xf32>
    %24 = vector.broadcast %3 : vector<1x32xf32> to vector<2x32xf32>
    %25 = arith.addf %23, %24 : vector<2x32xf32>
    %26 = arith.truncf %25 : vector<2x32xf32> to vector<2x32xbf16>
    %c0_9 = arith.constant 0 : index
    %c0_10 = arith.constant 0 : index
    %27 = vector.load %arg4[%c0_9, %c0_10] : memref<32x128xbf16, #tpu.memory_space<vmem>>, vector<32x128xbf16>
    %cst_11 = arith.constant dense<0.000000e+00> : vector<2x128xf32>
    %28 = tpu.matmul %26, %27, %cst_11 {dimension_numbers = #tpu.dot_dimension_numbers<[1], [0], [0], [1], [0, 0, 1, 1], [], []>} : vector<2x32xbf16>, vector<32x128xbf16>, vector<2x128xf32> -> vector<2x128xf32>
    %c0_12 = arith.constant 0 : index
    %c0_13 = arith.constant 0 : index
    %29 = vector.load %arg5[%c0_12, %c0_13] : memref<1x128xf32, #tpu.memory_space<vmem>>, vector<1x128xf32>
    %30 = vector.broadcast %29 : vector<1x128xf32> to vector<2x128xf32>
    %31 = arith.addf %28, %30 : vector<2x128xf32>
    %c0_14 = arith.constant 0 : index
    %c0_15 = arith.constant 0 : index
    %32 = vector.load %arg6[%c0_14, %c0_15] : memref<2x128xf32, #tpu.memory_space<vmem>>, vector<2x128xf32>
    tpu.vector_store %arg6[%c0_14, %c0_15], %31 {strides = array<i32>} : memref<2x128xf32, #tpu.memory_space<vmem>>, vector<2x128xf32>,
    return
  }
  func.func @transform_0(%arg0: i32) -> (i32, i32) {
    %c0_i32 = arith.constant 0 : i32
    %c0_i32_0 = arith.constant 0 : i32
    %c0_i32_1 = arith.constant 0 : i32
    return %c0_i32, %c0_i32_0 : i32, i32
  }
  func.func @transform_1(%arg0: i32) -> (i32, i32) {
    %c0_i32 = arith.constant 0 : i32
    %c0_i32_0 = arith.constant 0 : i32
    %c0_i32_1 = arith.constant 0 : i32
    return %c0_i32, %c0_i32_0 : i32, i32
  }
  func.func @transform_2(%arg0: i32) -> (i32, i32) {
    %c0_i32 = arith.constant 0 : i32
    %c0_i32_0 = arith.constant 0 : i32
    %c0_i32_1 = arith.constant 0 : i32
    return %c0_i32, %c0_i32_0 : i32, i32
  }
  func.func @transform_3(%arg0: i32) -> (i32, i32) {
    %c0_i32 = arith.constant 0 : i32
    %c0_i32_0 = arith.constant 0 : i32
    %c0_i32_1 = arith.constant 0 : i32
    return %c0_i32, %c0_i32_0 : i32, i32
  }
  func.func @transform_4(%arg0: i32) -> (i32, i32) {
    %c0_i32 = arith.constant 0 : i32
    %c0_i32_0 = arith.constant 0 : i32
    %c0_i32_1 = arith.constant 0 : i32
    return %c0_i32, %c0_i32_0 : i32, i32
  }
  func.func @transform_5(%arg0: i32) -> (i32, i32) {
    %c0_i32 = arith.constant 0 : i32
    %c0_i32_0 = arith.constant 0 : i32
    %c0_i32_1 = arith.constant 0 : i32
    return %c0_i32, %c0_i32_0 : i32, i32
  }
}

</mosaic_0001>

<bundles_post_ra>
// kernel: _lambda_.5
= control target key start
LH: loop header
LB: loop body
LE: loop exit
PB: predicated region body
PF: predicated region fallthrough
CT: control target
= control target key end

     0   :  { %vm64_vm0 = vcmask 523264   ;;  %v690_v8 = vmov 64.0   ;;  %vm254_vm14 = vcmask 261120   ;;  %s951_s1 = inlined_call_operand.vmem [shape: f32[16,64], index: 1, kind: input, shape index: {}]   ;;  %s952_s0 = inlined_call_operand.vmem [shape: f32[16,64], index: 0, kind: input, shape index: {}]   ;;  %s953_s2 = inlined_call_operand.vmem [shape: f32[1,64], index: 2, kind: input, shape index: {}]   ;;  %s954_s10 = inlined_call_operand.vmem [shape: f32[1,64], index: 10, kind: input, shape index: {}]   ;;  %s955_s3 = inlined_call_operand.vmem [shape: f32[1,64], index: 3, kind: input, shape index: {}]   ;;  %s956_s11 = inlined_call_operand.vmem [shape: f32[1,64], index: 11, kind: input, shape index: {}]   ;;  %s957_s5 = inlined_call_operand.vmem [shape: f32[1,64], index: 5, kind: input, shape index: {}]   ;;  %s958_s4 = inlined_call_operand.vmem [shape: bf16[64,64], index: 4, kind: input, shape index: {}]   ;;  %s959_s12 = inlined_call_operand.vmem [shape: bf16[64,64], index: 12, kind: input, shape index: {}]   ;;  %s960_s13 = inlined_call_operand.vmem [shape: f32[1,64], index: 13, kind: input, shape index: {}]   ;;  %s961_s7 = inlined_call_operand.vmem [shape: f32[1,32], index: 7, kind: input, shape index: {}]   ;;  %s962_s6 = inlined_call_operand.vmem [shape: bf16[64,32], index: 6, kind: input, shape index: {}]   ;;  %s963_s14 = inlined_call_operand.vmem [shape: bf16[64,32], index: 14, kind: input, shape index: {}]   ;;  %s964_s15 = inlined_call_operand.vmem [shape: f32[1,32], index: 15, kind: input, shape index: {}]   ;;  %s965_s8 = inlined_call_operand.vmem [shape: f32[1,32], index: 8, kind: input, shape index: {}]   ;;  %s966_s9 = inlined_call_operand.vmem [shape: f32[1,32], index: 9, kind: input, shape index: {}]   ;;  %s967_s16 = inlined_call_operand.vmem [shape: f32[1,32], index: 16, kind: input, shape index: {}]   ;;  %s968_s17 = inlined_call_operand.vmem [shape: f32[1,32], index: 17, kind: input, shape index: {}]   ;;  %s969_s18 = inlined_call_operand.vmem [shape: f32[16,32], index: 18, kind: output, shape index: {}]  }
   0x1   :  { %972 = sst [smem:[#allocation2_spill]] %s951_s1  ;;  %662 = vrcp.f32 %v690_v8  ;;  %v635_v35 = vld [vmem:[%s958_s4 + $0x18] sm:$0xff]  ;;  %v634_v37 = vld [vmem:[%s958_s4 + $0x10] sm:$0xff]  ;;  %v633_v39 = vld [vmem:[%s958_s4 + $0x8] sm:$0xff] }
   0x2   :  { %973 = sst [smem:[#allocation3_spill]] %s952_s0  ;;  %v643_v36 = vld [vmem:[%s959_s12 + $0x18] sm:$0xff]  ;;  %170 = vmatpush.bf16.msra.mxu0 %v635_v35  ;;  %v642_v38 = vld [vmem:[%s959_s12 + $0x10] sm:$0xff]  ;;  %v641_v40 = vld [vmem:[%s959_s12 + $0x8] sm:$0xff] }
   0x3   :  { %974 = sst [smem:[#allocation4_spill]] %s953_s2  ;;  %418 = vmatpush.bf16.msra.mxu2 %v643_v36  ;;  %v632_v45 = vld [vmem:[%s958_s4] sm:$0xff] }
   0x4   :  { %s975_s29 = sld [smem:[#allocation2_spill]]  ;;  %v640_v46 = vld [vmem:[%s959_s12] sm:$0xff] }
   0x5   :  { %s976_s19 = sld [smem:[#allocation3_spill]] }
   0x6   :  { %171 = vmatpush.bf16.msra.mxu0 %v634_v37  ;;  %s977_s25 = sld [smem:[#allocation4_spill]] }
   0x7   :  { %v663_v9 = vpop.eup %662  ;;  %419 = vmatpush.bf16.msra.mxu2 %v642_v38  ;;  %v638_v38 = vld [vmem:[%s962_s6 + $0x10] sm:$0xff] }
   0x8   :  { %v72_v10 = vmul.f32 64.0, %v663_v9  ;;  %vm76_vm1 = vweird.f32 %v663_v9 }
   0xa   :  { %v316_v0 = vld [vmem:[%s975_s29] sm:$0xff]  ;;  %v317_v4 = vld [vmem:[%s975_s29 + $0x8] sm:$0xff]  ;;  %v73_v11 = vsub.f32 1.0, %v72_v10  ;;  %172 = vmatpush.bf16.msra.mxu0 %v633_v39  ;;  %v647_v39 = vld [vmem:[%s963_s14 + $0x18] sm:$0xff] }
   0xb   :  { %v60_v1 = vld [vmem:[%s976_s19] sm:$0xff]  ;;  %v320_v2 = vsel %vm64_vm0, %v316_v0, 0.0  ;;  %v61_v5 = vld [vmem:[%s976_s19 + $0x8] sm:$0xff]  ;;  %v323_v6 = vsel %vm64_vm0, %v317_v4, 0.0  ;;  %420 = vmatpush.bf16.msra.mxu2 %v641_v40  ;;  %490 = vmatpush.bf16.msra.mxu3 %v647_v39 }
   0xc   :  { %v65_v3 = vsel %vm64_vm0, %v60_v1, 0.0  ;;  %321 = vadd.xlane.f32.xlu0 %v320_v2  ;;  %v68_v7 = vsel %vm64_vm0, %v61_v5, 0.0  ;;  %v74_v12 = vmul.f32 %v663_v9, %v73_v11  ;;  %v637_v40 = vld [vmem:[%s962_s6 + $0x8] sm:$0xff] }
   0xd   :  { %66 = vadd.xlane.f32.xlu1 %v65_v3 }
   0xe   :  { %v75_v13 = vadd.f32 %v663_v9, %v74_v12  ;;  %173 = vmatpush.bf16.msra.mxu0 %v632_v45 }
   0xf   :  { %421 = vmatpush.bf16.msra.mxu2 %v640_v46 }
  0x10   :  { %v77_v14 = vsel %vm76_vm1, %v663_v9, %v75_v13 }
  0x14   :  { %324 = vadd.xlane.f32.xlu0 %v323_v6 }
  0x15   :  { %69 = vadd.xlane.f32.xlu1 %v68_v7 }
  0x7f   :  { %v322_v15 = vpop.xlane.xlu0 %321 }
  0x80   :  { %v67_v16 = vpop.xlane.xlu1 %66  ;;  %v326_v17 = vmul.f32 %v322_v15, %v77_v14 }
  0x81   :  { %v78_v18 = vmul.f32 %v77_v14, %v67_v16  ;;  %v652_v16 = vld [vmem:[%s954_s10] ss:$0 sm:$0xff] }
  0x82   :  { %v803_v19 = vsub.f32 %v316_v0, %v326_v17 }
  0x83   :  { %v805_v20 = vsub.f32 %v60_v1, %v78_v18 }
  0x84   :  { %v330_v21 = vmul.f32 %v803_v19, %v803_v19 }
  0x85   :  { %v82_v22 = vmul.f32 %v805_v20, %v805_v20 }
  0x86   :  { %v332_v23 = vsel %vm64_vm0, %v330_v21, 0.0  ;;  %v650_v21 = vld [vmem:[%s977_s25] ss:$0 sm:$0xff] }
  0x87   :  { %v84_v24 = vsel %vm64_vm0, %v82_v22, 0.0  ;;  %333 = vadd.xlane.f32.xlu2 %v332_v23  ;;  %v325_v25 = vpop.xlane.xlu0 %324 }
  0x88   :  { %85 = vadd.xlane.f32.xlu0 %v84_v24  ;;  %v70_v26 = vpop.xlane.xlu1 %69  ;;  %v327_v27 = vmul.f32 %v325_v25, %v77_v14 }
  0x89   :  { %v79_v28 = vmul.f32 %v77_v14, %v70_v26  ;;  %v653_v26 = vld [vmem:[%s956_s11] ss:$0 sm:$0xff] }
  0x8a   :  { %v813_v29 = vsub.f32 %v317_v4, %v327_v27 }
  0x8b   :  { %v815_v30 = vsub.f32 %v61_v5, %v79_v28  ;;  %v651_v28 = vld [vmem:[%s955_s3] ss:$0 sm:$0xff] }
  0x8c   :  { %v331_v31 = vmul.f32 %v813_v29, %v813_v29 }
  0x8d   :  { %v83_v32 = vmul.f32 %v815_v30, %v815_v30 }
  0x8e   :  { %v335_v33 = vsel %vm64_vm0, %v331_v31, 0.0 }
  0x8f   :  { %v87_v34 = vsel %vm64_vm0, %v83_v32, 0.0  ;;  %336 = vadd.xlane.f32.xlu2 %v335_v33 }
  0x90   :  { %88 = vadd.xlane.f32.xlu1 %v87_v34 }
  0xfa   :  { %v334_v41 = vpop.xlane.xlu2 %333 }
  0xfb   :  { %v86_v42 = vpop.xlane.xlu0 %85  ;;  %v338_v43 = vmul.f32 %v334_v41, %v77_v14  ;;  %v646_v41 = vld [vmem:[%s963_s14 + $0x10] sm:$0xff] }
  0xfc   :  { %v90_v44 = vmul.f32 %v86_v42, %v77_v14  ;;  %v654_v42 = vld [vmem:[%s957_s5] ss:$0 sm:$0xff]  ;;  %491 = vmatpush.bf16.msra.mxu3 %v646_v41 }
  0xfd   :  { %v340_v47 = vadd.f32 1e-05, %v338_v43  ;;  %v636_v43 = vld [vmem:[%s962_s6] sm:$0xff] }
  0xfe   :  { %v92_v48 = vadd.f32 1e-05, %v90_v44  ;;  %v645_v44 = vld [vmem:[%s963_s14 + $0x8] sm:$0xff] }
  0xff   :  { %664 = vrsqrt.f32 %v340_v47  ;;  %vm348_vm5 = vweird.f32 %v340_v47 }
 0x100   :  { %666 = vrsqrt.f32 %v92_v48  ;;  %vm100_vm3 = vweird.f32 %v92_v48  ;;  %492 = vmatpush.bf16.msra.mxu3 %v645_v44 }
 0x102   :  { %v337_v49 = vpop.xlane.xlu2 %336 }
 0x103   :  { %v89_v50 = vpop.xlane.xlu1 %88  ;;  %v339_v51 = vmul.f32 %v337_v49, %v77_v14  ;;  %v644_v49 = vld [vmem:[%s963_s14] sm:$0xff] }
 0x104   :  { %v91_v52 = vmul.f32 %v89_v50, %v77_v14  ;;  %493 = vmatpush.bf16.msra.mxu3 %v644_v49 }
 0x105   :  { %v665_v53 = vpop.eup %664  ;;  %v341_v54 = vadd.f32 1e-05, %v339_v51 }
 0x106   :  { %v93_v55 = vadd.f32 1e-05, %v91_v52  ;;  %v667_v56 = vpop.eup %666  ;;  %v343_v57 = vmul.f32 %v665_v53, %v340_v47  ;;  %vm349_vm2 = vweird.f32 %v665_v53  ;;  %v655_v47 = vld [vmem:[%s960_s13] ss:$0 sm:$0xff] }
 0x107   :  { %v95_v58 = vmul.f32 %v667_v56, %v92_v48  ;;  %668 = vrsqrt.f32 %v341_v54  ;;  %vm101_vm4 = vweird.f32 %v667_v56  ;;  %vm350_vm6 = vmor %vm348_vm5, %vm349_vm2  ;;  %vm358_vm11 = vweird.f32 %v341_v54 }
 0x108   :  { %v344_v59 = vmul.f32 %v665_v53, %v343_v57  ;;  %670 = vrsqrt.f32 %v93_v55  ;;  %vm102_vm7 = vmor %vm100_vm3, %vm101_vm4  ;;  %vm110_vm9 = vweird.f32 %v93_v55 }
 0x109   :  { %v96_v60 = vmul.f32 %v667_v56, %v95_v58 }
 0x10a   :  { %v345_v61 = vmul.f32 0.5, %v344_v59 }
 0x10b   :  { %v97_v62 = vmul.f32 0.5, %v96_v60 }
 0x10c   :  { %v346_v63 = vsub.f32 1.5, %v345_v61 }
 0x10d   :  { %v669_v0 = vpop.eup %668  ;;  %v98_v1 = vsub.f32 1.5, %v97_v62 }
 0x10e   :  { %v671_v2 = vpop.eup %670  ;;  %v347_v3 = vmul.f32 %v665_v53, %v346_v63  ;;  %v353_v4 = vmul.f32 %v669_v0, %v341_v54  ;;  %vm359_vm8 = vweird.f32 %v669_v0 }
 0x10f   :  { %v99_v5 = vmul.f32 %v667_v56, %v98_v1  ;;  %v105_v6 = vmul.f32 %v671_v2, %v93_v55  ;;  %vm111_vm10 = vweird.f32 %v671_v2  ;;  %vm360_vm12 = vmor %vm358_vm11, %vm359_vm8 }
 0x110   :  { %v354_v7 = vmul.f32 %v669_v0, %v353_v4  ;;  %v351_v9 = vsel %vm350_vm6, %v665_v53, %v347_v3  ;;  %vm112_vm13 = vmor %vm110_vm9, %vm111_vm10 }
 0x111   :  { %v106_v8 = vmul.f32 %v671_v2, %v105_v6  ;;  %v103_v11 = vsel %vm102_vm7, %v667_v56, %v99_v5  ;;  %v362_v14 = vmul.f32 %v351_v9, %v803_v19 }
 0x112   :  { %v355_v10 = vmul.f32 0.5, %v354_v7  ;;  %v114_v17 = vmul.f32 %v103_v11, %v805_v20 }
 0x113   :  { %v107_v12 = vmul.f32 0.5, %v106_v8  ;;  %v367_v25 = vmul.f32 %v652_v16, %v362_v14 }
 0x114   :  { %v356_v13 = vsub.f32 1.5, %v355_v10  ;;  %v119_v27 = vmul.f32 %v650_v21, %v114_v17 }
 0x115   :  { %v108_v15 = vsub.f32 1.5, %v107_v12  ;;  %v372_v33 = vadd.f32 %v653_v26, %v367_v25 }
 0x116   :  { %v357_v18 = vmul.f32 %v669_v0, %v356_v13  ;;  %v124_v35 = vadd.f32 %v651_v28, %v119_v27 }
 0x117   :  { %v109_v22 = vmul.f32 %v671_v2, %v108_v15 }
 0x118   :  { %v361_v23 = vsel %vm360_vm12, %v669_v0, %v357_v18 }
 0x119   :  { %v363_v19 = vmul.f32 %v361_v23, %v813_v29  ;;  %v113_v24 = vsel %vm112_vm13, %v671_v2, %v109_v22 }
 0x11a   :  { %v115_v20 = vmul.f32 %v113_v24, %v815_v30  ;;  %v639_v30 = vld [vmem:[%s962_s6 + $0x18] sm:$0xff] }
 0x11b   :  { %v368_v31 = vmul.f32 %v652_v16, %v363_v19  ;;  %242 = vmatpush.bf16.msra.mxu1 %v639_v30 }
 0x11c   :  { %v120_v32 = vmul.f32 %v650_v21, %v115_v20 }
 0x11d   :  { %v373_v34 = vadd.f32 %v653_v26, %v368_v31  ;;  %v656_v31 = vld [vmem:[%s961_s7] ss:$0 sm:$0xff] }
 0x11e   :  { %v125_v36 = vadd.f32 %v651_v28, %v120_v32 }
 0x11f   :  { %v374_v29 = vpack.c.bf16 %v373_v34, %v372_v33  ;;  %243 = vmatpush.bf16.msra.mxu1 %v638_v38 }
 0x120   :  { %v126_v37 = vpack.c.bf16 %v125_v36, %v124_v35  ;;  %v657_v36 = vld [vmem:[%s964_s15] ss:$0 sm:$0xff] }
 0x121   :  { %614 = vmatmul.msk.bf16.vlgmr.msra.gmra.mxu2 %vm64_vm0, %v374_v29 }
 0x122   :  { %580 = vmatmul.msk.bf16.vlgmr.msra.gmra.mxu0 %vm64_vm0, %v126_v37 }
 0x123   :  { %244 = vmatpush.bf16.msra.mxu1 %v637_v40 }
 0x127   :  { %245 = vmatpush.bf16.msra.mxu1 %v636_v43  ;;  %v691_v43 = vmov 32.0  }
 0x19f   :  { %v175_v45 = vpop.f32.mrf.mxu0 }
 0x1a0   :  { %v176_v46 = vadd.f32 %v654_v42, %v175_v45 }
 0x1a2   :  { %v180_v48 = vmul.f32 %v176_v46, %v176_v46 }
 0x1a4   :  { %v182_v50 = vmul.f32 %v180_v48, %v176_v46  ;;  %v423_v51 = vpop.f32.mrf.mxu2 }
 0x1a5   :  { %v424_v52 = vadd.f32 %v655_v47, %v423_v51 }
 0x1a6   :  { %v184_v53 = vmul.f32 0.044715, %v182_v50 }
 0x1a7   :  { %v428_v54 = vmul.f32 %v424_v52, %v424_v52  ;;  %v177_v55 = vpop.f32.mrf.mxu0 }
 0x1a8   :  { %v186_v56 = vadd.f32 %v184_v53, %v176_v46  ;;  %v178_v57 = vadd.f32 %v654_v42, %v177_v55 }
 0x1a9   :  { %v430_v58 = vmul.f32 %v428_v54, %v424_v52 }
 0x1aa   :  { %v188_v59 = vmul.f32 0.7978846, %v186_v56  ;;  %v181_v60 = vmul.f32 %v178_v57, %v178_v57 }
 0x1ab   :  { %v432_v61 = vmul.f32 0.044715, %v430_v58 }
 0x1ac   :  { %v183_v62 = vmul.f32 %v181_v60, %v178_v57  ;;  %v425_v63 = vpop.f32.mrf.mxu2  ;;  %672 = vtanh.f32 %v188_v59 }
 0x1ad   :  { %v434_v0 = vadd.f32 %v432_v61, %v424_v52  ;;  %v426_v1 = vadd.f32 %v655_v47, %v425_v63 }
 0x1ae   :  { %v185_v2 = vmul.f32 0.044715, %v183_v62 }
 0x1af   :  { %v436_v3 = vmul.f32 0.7978846, %v434_v0  ;;  %v429_v4 = vmul.f32 %v426_v1, %v426_v1 }
 0x1b0   :  { %v187_v5 = vadd.f32 %v185_v2, %v178_v57 }
 0x1b1   :  { %v431_v6 = vmul.f32 %v429_v4, %v426_v1  ;;  %674 = vtanh.f32 %v436_v3 }
 0x1b2   :  { %v189_v7 = vmul.f32 0.7978846, %v187_v5  ;;  %v673_v9 = vpop.eup %672 }
 0x1b3   :  { %v433_v8 = vmul.f32 0.044715, %v431_v6  ;;  %v192_v12 = vadd.f32 1.0, %v673_v9 }
 0x1b4   :  { %676 = vtanh.f32 %v189_v7 }
 0x1b5   :  { %v435_v10 = vadd.f32 %v433_v8, %v426_v1  ;;  %v194_v16 = vmul.f32 0.5, %v192_v12 }
 0x1b7   :  { %v437_v11 = vmul.f32 0.7978846, %v435_v10  ;;  %v675_v13 = vpop.eup %674  ;;  %v196_v22 = vmul.f32 %v194_v16, %v176_v46 }
 0x1b8   :  { %v440_v17 = vadd.f32 1.0, %v675_v13 }
 0x1b9   :  { %678 = vtanh.f32 %v437_v11 }
 0x1ba   :  { %v677_v14 = vpop.eup %676  ;;  %v442_v24 = vmul.f32 0.5, %v440_v17  ;;  %680 = vrcp.f32 %v691_v43 }
 0x1bb   :  { %v193_v15 = vadd.f32 1.0, %v677_v14 }
 0x1bc   :  { %v444_v20 = vmul.f32 %v442_v24, %v424_v52 }
 0x1bd   :  { %v195_v18 = vmul.f32 0.5, %v193_v15 }
 0x1bf   :  { %v679_v21 = vpop.eup %678  ;;  %v197_v23 = vmul.f32 %v195_v18, %v178_v57 }
 0x1c0   :  { %v441_v19 = vadd.f32 1.0, %v679_v21  ;;  %v681_v44 = vpop.eup %680 }
 0x1c1   :  { %v198_v25 = vpack.c.bf16 %v197_v23, %v196_v22  ;;  %v262_v45 = vmul.f32 32.0, %v681_v44  ;;  %vm266_vm15 = vweird.f32 %v681_v44 }
 0x1c2   :  { %v443_v26 = vmul.f32 0.5, %v441_v19 }
 0x1c3   :  { %597 = vmatmul.msk.bf16.vlgmr.msra.gmra.mxu1 %vm64_vm0, %v198_v25  ;;  %v263_v46 = vsub.f32 1.0, %v262_v45 }
 0x1c4   :  { %v445_v27 = vmul.f32 %v443_v26, %v426_v1 }
 0x1c5   :  { %v264_v47 = vmul.f32 %v681_v44, %v263_v46  ;;  %v661_v46 = vld [vmem:[%s968_s17] ss:$0 sm:$0xff] }
 0x1c6   :  { %v446_v28 = vpack.c.bf16 %v445_v27, %v444_v20 }
 0x1c7   :  { %v265_v48 = vadd.f32 %v681_v44, %v264_v47 }
 0x1c8   :  { %631 = vmatmul.msk.bf16.vlgmr.msra.gmra.mxu3 %vm64_vm0, %v446_v28 }
 0x1c9   :  { %v267_v49 = vsel %vm266_vm15, %v681_v44, %v265_v48  ;;  %v659_v44 = vld [vmem:[%s966_s9] ss:$0 sm:$0xff] }
 0x240   :  { %v247_v32 = vpop.f32.mrf.mxu1 }
 0x241   :  { %v248_v33 = vadd.f32 %v656_v31, %v247_v32 }
 0x243   :  { %v255_v34 = vsel %vm254_vm14, %v248_v33, 0.0 }
 0x244   :  { %256 = vadd.xlane.f32.xlu2 %v255_v34 }
 0x248   :  { %v249_v35 = vpop.f32.mrf.mxu1 }
 0x249   :  { %v250_v29 = vadd.f32 %v656_v31, %v249_v35 }
 0x24b   :  { %v495_v37 = vpop.f32.mrf.mxu3  ;;  %v258_v30 = vsel %vm254_vm14, %v250_v29, 0.0 }
 0x24c   :  { %v496_v38 = vadd.f32 %v657_v36, %v495_v37  ;;  %259 = vadd.xlane.f32.xlu0 %v258_v30  ;;  %v658_v37 = vld [vmem:[%s965_s8] ss:$0 sm:$0xff] }
 0x24e   :  { %v502_v39 = vsel %vm254_vm14, %v496_v38, 0.0 }
 0x24f   :  { %503 = vadd.xlane.f32.xlu1 %v502_v39 }
 0x253   :  { %v497_v40 = vpop.f32.mrf.mxu3 }
 0x254   :  { %v498_v41 = vadd.f32 %v657_v36, %v497_v40 }
 0x256   :  { %v505_v42 = vsel %vm254_vm14, %v498_v41, 0.0 }
 0x257   :  { %506 = vadd.xlane.f32.xlu2 %v505_v42 }
 0x2b7   :  { %v257_v50 = vpop.xlane.xlu2 %256 }
 0x2b8   :  { %v268_v51 = vmul.f32 %v267_v49, %v257_v50 }
 0x2ba   :  { %v907_v52 = vsub.f32 %v248_v33, %v268_v51 }
 0x2bc   :  { %v272_v53 = vmul.f32 %v907_v52, %v907_v52 }
 0x2be   :  { %v274_v54 = vsel %vm254_vm14, %v272_v53, 0.0 }
 0x2bf   :  { %v260_v55 = vpop.xlane.xlu0 %259  ;;  %275 = vadd.xlane.f32.xlu0 %v274_v54 }
 0x2c0   :  { %v269_v56 = vmul.f32 %v267_v49, %v260_v55 }
 0x2c2   :  { %v912_v57 = vsub.f32 %v250_v29, %v269_v56  ;;  %v504_v58 = vpop.xlane.xlu1 %503 }
 0x2c3   :  { %v508_v59 = vmul.f32 %v504_v58, %v267_v49 }
 0x2c4   :  { %v273_v60 = vmul.f32 %v912_v57, %v912_v57 }
 0x2c5   :  { %v916_v61 = vsub.f32 %v496_v38, %v508_v59 }
 0x2c6   :  { %v277_v62 = vsel %vm254_vm14, %v273_v60, 0.0 }
 0x2c7   :  { %278 = vadd.xlane.f32.xlu1 %v277_v62  ;;  %v512_v63 = vmul.f32 %v916_v61, %v916_v61 }
 0x2c9   :  { %v514_v0 = vsel %vm254_vm14, %v512_v63, 0.0 }
 0x2ca   :  { %v507_v1 = vpop.xlane.xlu2 %506  ;;  %515 = vadd.xlane.f32.xlu2 %v514_v0 }
 0x2cb   :  { %v509_v2 = vmul.f32 %v507_v1, %v267_v49 }
 0x2cd   :  { %v922_v3 = vsub.f32 %v498_v41, %v509_v2  ;;  %v660_v41 = vld [vmem:[%s967_s16] ss:$0 sm:$0xff] }
 0x2cf   :  { %v513_v4 = vmul.f32 %v922_v3, %v922_v3 }
 0x2d1   :  { %v517_v5 = vsel %vm254_vm14, %v513_v4, 0.0 }
 0x2d2   :  { %518 = vadd.xlane.f32.xlu0 %v517_v5 }
 0x332   :  { %v276_v6 = vpop.xlane.xlu0 %275 }
 0x333   :  { %v280_v7 = vmul.f32 %v276_v6, %v267_v49 }
 0x335   :  { %v282_v8 = vadd.f32 1e-05, %v280_v7 }
 0x337   :  { %682 = vrsqrt.f32 %v282_v8  ;;  %vm290_vm1 = vweird.f32 %v282_v8 }
 0x33a   :  { %v279_v9 = vpop.xlane.xlu1 %278 }
 0x33b   :  { %v281_v10 = vmul.f32 %v279_v9, %v267_v49 }
 0x33d   :  { %v683_v11 = vpop.eup %682  ;;  %v283_v12 = vadd.f32 1e-05, %v281_v10  ;;  %v516_v13 = vpop.xlane.xlu2 %515 }
 0x33e   :  { %v285_v14 = vmul.f32 %v683_v11, %v282_v8  ;;  %v520_v15 = vmul.f32 %v516_v13, %v267_v49  ;;  %vm291_vm0 = vweird.f32 %v683_v11 }
 0x33f   :  { %684 = vrsqrt.f32 %v283_v12  ;;  %vm292_vm2 = vmor %vm290_vm1, %vm291_vm0  ;;  %vm300_vm7 = vweird.f32 %v283_v12 }
 0x340   :  { %v286_v16 = vmul.f32 %v683_v11, %v285_v14  ;;  %v522_v17 = vadd.f32 1e-05, %v520_v15 }
 0x342   :  { %v287_v18 = vmul.f32 0.5, %v286_v16  ;;  %686 = vrsqrt.f32 %v522_v17  ;;  %vm530_vm4 = vweird.f32 %v522_v17 }
 0x344   :  { %v288_v22 = vsub.f32 1.5, %v287_v18 }
 0x345   :  { %v685_v21 = vpop.eup %684  ;;  %v519_v23 = vpop.xlane.xlu0 %518 }
 0x346   :  { %v295_v19 = vmul.f32 %v685_v21, %v283_v12  ;;  %v521_v24 = vmul.f32 %v519_v23, %v267_v49  ;;  %v289_v27 = vmul.f32 %v683_v11, %v288_v22  ;;  %vm301_vm5 = vweird.f32 %v685_v21 }
 0x347   :  { %vm302_vm8 = vmor %vm300_vm7, %vm301_vm5 }
 0x348   :  { %v687_v25 = vpop.eup %686  ;;  %v296_v26 = vmul.f32 %v685_v21, %v295_v19  ;;  %v523_v20 = vadd.f32 1e-05, %v521_v24  ;;  %v293_v33 = vsel %vm292_vm2, %v683_v11, %v289_v27 }
 0x349   :  { %v525_v28 = vmul.f32 %v687_v25, %v522_v17  ;;  %vm531_vm3 = vweird.f32 %v687_v25  ;;  %v304_v30 = vmul.f32 %v293_v33, %v907_v52 }
 0x34a   :  { %v297_v31 = vmul.f32 0.5, %v296_v26  ;;  %688 = vrsqrt.f32 %v523_v20  ;;  %vm532_vm6 = vmor %vm530_vm4, %vm531_vm3  ;;  %vm540_vm10 = vweird.f32 %v523_v20 }
 0x34b   :  { %v526_v32 = vmul.f32 %v687_v25, %v525_v28  ;;  %v309_v45 = vmul.f32 %v658_v37, %v304_v30 }
 0x34c   :  { %v298_v34 = vsub.f32 1.5, %v297_v31 }
 0x34d   :  { %v527_v35 = vmul.f32 0.5, %v526_v32  ;;  %v314_v52 = vadd.f32 %v659_v44, %v309_v45 }
 0x34e   :  { %v299_v38 = vmul.f32 %v685_v21, %v298_v34 }
 0x34f   :  { %v528_v36 = vsub.f32 1.5, %v527_v35 }
 0x350   :  { %v689_v29 = vpop.eup %688  ;;  %v303_v48 = vsel %vm302_vm8, %v685_v21, %v299_v38 }
 0x351   :  { %v529_v39 = vmul.f32 %v687_v25, %v528_v36  ;;  %v535_v40 = vmul.f32 %v689_v29, %v523_v20  ;;  %vm541_vm9 = vweird.f32 %v689_v29  ;;  %v305_v53 = vmul.f32 %v303_v48, %v912_v57 }
 0x352   :  { %vm542_vm11 = vmor %vm540_vm10, %vm541_vm9 }
 0x353   :  { %v533_v42 = vsel %vm532_vm6, %v687_v25, %v529_v39  ;;  %v536_v43 = vmul.f32 %v689_v29, %v535_v40  ;;  %v310_v59 = vmul.f32 %v658_v37, %v305_v53 }
 0x354   :  { %v544_v47 = vmul.f32 %v533_v42, %v916_v61 }
 0x355   :  { %v537_v49 = vmul.f32 0.5, %v536_v43  ;;  %v315_v62 = vadd.f32 %v659_v44, %v310_v59 }
 0x356   :  { %v549_v50 = vmul.f32 %v660_v41, %v544_v47 }
 0x357   :  { %v538_v51 = vsub.f32 1.5, %v537_v49 }
 0x358   :  { %v554_v54 = vadd.f32 %v661_v46, %v549_v50 }
 0x359   :  { %v539_v55 = vmul.f32 %v689_v29, %v538_v51 }
 0x35a   :  { %v556_v56 = vadd.f32 %v554_v54, %v314_v52 }
 0x35b   :  { %v543_v58 = vsel %vm542_vm11, %v689_v29, %v539_v55 }
 0x35c   :  { %558 = vst.msk [vmem:[%s969_s18] sm:$0xff] %vm254_vm14, %v556_v56  ;;  %v545_v60 = vmul.f32 %v543_v58, %v922_v3 }
 0x35e   :  { %v550_v61 = vmul.f32 %v660_v41, %v545_v60 }
 0x360   :  { %v555_v63 = vadd.f32 %v661_v46, %v550_v61 }
 0x362   :  { %v557_v0 = vadd.f32 %v555_v63, %v315_v62 }
 0x364   :  { %559 = vst.msk [vmem:[%s969_s18 + $0x8] sm:$0xff] %vm254_vm14, %v557_v0 }

// kernel: _lambda_.7
= control target key start
LH: loop header
LB: loop body
LE: loop exit
PB: predicated region body
PF: predicated region fallthrough
CT: control target
= control target key end

     0   :  { %vm18_vm0 = vcmask 257024   ;;  %v70_v3 = vmov 32.0   ;;  %vm57_vm5 = vcmask 254976   ;;  %s105_s0 = inlined_call_operand.vmem [shape: bf16[4,32], index: 0, kind: input, shape index: {}]   ;;  %s106_s1 = inlined_call_operand.vmem [shape: f32[1,32], index: 1, kind: input, shape index: {}]   ;;  %s107_s2 = inlined_call_operand.vmem [shape: f32[1,32], index: 2, kind: input, shape index: {}]   ;;  %s108_s3 = inlined_call_operand.vmem [shape: bf16[4,32], index: 3, kind: output, shape index: {}]  }
   0x1   :  { %v14_v0 = vld [vmem:[%s105_s0] sm:$0x3]  ;;  %66 = vrcp.f32 %v70_v3 }
   0x2   :  { %v15_v1 = vunpack.c.l.bf16 %v14_v0  ;;  %v64_v24 = vld [vmem:[%s106_s1] ss:$0 sm:$0xff] }
   0x3   :  { %v65_v26 = vld [vmem:[%s107_s2] ss:$0 sm:$0xff] }
   0x4   :  { %v19_v2 = vsel %vm18_vm0, %v15_v1, 0.0 }
   0x5   :  { %20 = vadd.xlane.f32.xlu0 %v19_v2 }
   0x7   :  { %v67_v4 = vpop.eup %66 }
   0x8   :  { %v23_v5 = vmul.f32 32.0, %v67_v4  ;;  %vm27_vm1 = vweird.f32 %v67_v4 }
   0xa   :  { %v24_v6 = vsub.f32 1.0, %v23_v5 }
   0xc   :  { %v25_v7 = vmul.f32 %v67_v4, %v24_v6 }
   0xe   :  { %v26_v8 = vadd.f32 %v67_v4, %v25_v7 }
  0x10   :  { %v28_v9 = vsel %vm27_vm1, %v67_v4, %v26_v8 }
  0x78   :  { %v21_v10 = vpop.xlane.xlu0 %20 }
  0x79   :  { %v29_v11 = vmul.f32 %v28_v9, %v21_v10 }
  0x7b   :  { %v30_v12 = vsub.f32 %v15_v1, %v29_v11 }
  0x7d   :  { %v31_v13 = vmul.f32 %v30_v12, %v30_v12 }
  0x7f   :  { %v32_v14 = vsel %vm18_vm0, %v31_v13, 0.0 }
  0x80   :  { %33 = vadd.xlane.f32.xlu0 %v32_v14 }
  0xf3   :  { %v34_v15 = vpop.xlane.xlu0 %33 }
  0xf4   :  { %v35_v16 = vmul.f32 %v34_v15, %v28_v9 }
  0xf6   :  { %v36_v17 = vadd.f32 1e-05, %v35_v16 }
  0xf8   :  { %68 = vrsqrt.f32 %v36_v17  ;;  %vm43_vm3 = vweird.f32 %v36_v17 }
  0xfe   :  { %v69_v18 = vpop.eup %68 }
  0xff   :  { %v38_v19 = vmul.f32 %v69_v18, %v36_v17  ;;  %vm44_vm2 = vweird.f32 %v69_v18 }
 0x100   :  { %vm45_vm4 = vmor %vm43_vm3, %vm44_vm2 }
 0x101   :  { %v39_v20 = vmul.f32 %v69_v18, %v38_v19 }
 0x103   :  { %v40_v21 = vmul.f32 0.5, %v39_v20 }
 0x105   :  { %v41_v22 = vsub.f32 1.5, %v40_v21 }
 0x107   :  { %v42_v23 = vmul.f32 %v69_v18, %v41_v22 }
 0x109   :  { %v46_v25 = vsel %vm45_vm4, %v69_v18, %v42_v23 }
 0x10a   :  { %v47_v27 = vmul.f32 %v46_v25, %v30_v12 }
 0x10c   :  { %v51_v28 = vmul.f32 %v64_v24, %v47_v27 }
 0x10e   :  { %v55_v29 = vadd.f32 %v65_v26, %v51_v28 }
 0x110   :  { %v56_v30 = vpack.c.bf16 %v55_v29, %v55_v29 }
 0x112   :  { %58 = vst.msk [vmem:[%s108_s3] sm:$0x3] %vm57_vm5, %v56_v30 }

// kernel: _lambda_.9
= control target key start
LH: loop header
LB: loop body
LE: loop exit
PB: predicated region body
PF: predicated region fallthrough
CT: control target
= control target key end

     0   :  { %vm26_vm0 = vcmask 254976   ;;  %s220_s0 = inlined_call_operand.vmem [shape: bf16[2,32], index: 0, kind: input, shape index: {}]   ;;  %s221_s1 = inlined_call_operand.vmem [shape: f32[1,32], index: 1, kind: input, shape index: {}]   ;;  %s222_s2 = inlined_call_operand.vmem [shape: f32[1,32], index: 2, kind: input, shape index: {}]   ;;  %s223_s3 = inlined_call_operand.vmem [shape: bf16[32,128], index: 3, kind: input, shape index: {}]   ;;  %s224_s4 = inlined_call_operand.vmem [shape: f32[1,128], index: 4, kind: input, shape index: {}]   ;;  %s225_s5 = inlined_call_operand.hbm [shape: f32[2,128], index: 5, kind: output, shape index: {}]  }
   0x1   :  { %v22_v0 = vld [vmem:[%s220_s0] sm:$0x1] }
   0x2   :  { %v23_v1 = vunpack.c.l.bf16 %v22_v0 }
   0x3   :  { %10 = vsyncpa [#allocation3], 0  ;;  %v165_v3 = vmov 32.0   ;;  %v129_v15 = vld [vmem:[%s223_s3 + $0x8] sm:$0xff]  ;;  %v128_v16 = vld [vmem:[%s223_s3] sm:$0xff]  ;;  %vm85_vm5 = vcmask 261120  }
   0x4   :  { %v27_v2 = vsel %vm26_vm0, %v23_v1, 0.0  ;;  %135 = vrcp.f32 %v165_v3  ;;  %95 = vmatpush.bf16.msra.mxu0 %v129_v15  ;;  %v132_v26 = vld [vmem:[%s221_s1] ss:$0 sm:$0xff]  ;;  %s166_s28 = smov [#allocation2]   ;;  %s110_s1 = sshll.u32 %s225_s5, 4  ;;  %s111_s1 = int_to_ptr.hbm [resolvable:$true] %s110_s1 }
   0x5   :  { %28 = vadd.xlane.f32.xlu0 %v27_v2  ;;  %v133_v29 = vld [vmem:[%s222_s2] ss:$0 sm:$0xff]  ;;  %s108_s29 = sshll.u32 %s166_s28, 4  ;;  %s109_s29 = int_to_ptr.vmem [resolvable:$true] %s108_s29 }
   0x6   :  { %v134_v33 = vld [vmem:[%s224_s4] ss:$0 sm:$0xff] }
   0x8   :  { %96 = vmatpush.bf16.msra.mxu0 %v128_v16 }
   0xa   :  { %v136_v4 = vpop.eup %135 }
   0xb   :  { %v31_v5 = vmul.f32 32.0, %v136_v4  ;;  %vm35_vm1 = vweird.f32 %v136_v4 }
   0xd   :  { %v32_v6 = vsub.f32 1.0, %v31_v5 }
   0xf   :  { %v33_v7 = vmul.f32 %v136_v4, %v32_v6 }
  0x11   :  { %v34_v8 = vadd.f32 %v136_v4, %v33_v7 }
  0x13   :  { %v36_v9 = vsel %vm35_vm1, %v136_v4, %v34_v8 }
  0x78   :  { %v29_v10 = vpop.xlane.xlu0 %28 }
  0x79   :  { %v37_v11 = vmul.f32 %v36_v9, %v29_v10 }
  0x7b   :  { %v38_v12 = vsub.f32 %v23_v1, %v37_v11 }
  0x7d   :  { %v39_v13 = vmul.f32 %v38_v12, %v38_v12 }
  0x7f   :  { %v40_v14 = vsel %vm26_vm0, %v39_v13, 0.0 }
  0x80   :  { %41 = vadd.xlane.f32.xlu0 %v40_v14 }
  0xf3   :  { %v42_v17 = vpop.xlane.xlu0 %41 }
  0xf4   :  { %v43_v18 = vmul.f32 %v42_v17, %v36_v9 }
  0xf6   :  { %v44_v19 = vadd.f32 1e-05, %v43_v18 }
  0xf8   :  { %137 = vrsqrt.f32 %v44_v19  ;;  %vm51_vm3 = vweird.f32 %v44_v19 }
  0xfe   :  { %v138_v20 = vpop.eup %137 }
  0xff   :  { %v46_v21 = vmul.f32 %v138_v20, %v44_v19  ;;  %vm52_vm2 = vweird.f32 %v138_v20 }
 0x100   :  { %vm53_vm4 = vmor %vm51_vm3, %vm52_vm2 }
 0x101   :  { %v47_v22 = vmul.f32 %v138_v20, %v46_v21 }
 0x103   :  { %v48_v23 = vmul.f32 0.5, %v47_v22 }
 0x105   :  { %v49_v24 = vsub.f32 1.5, %v48_v23 }
 0x107   :  { %v50_v25 = vmul.f32 %v138_v20, %v49_v24 }
 0x109   :  { %v54_v27 = vsel %vm53_vm4, %v138_v20, %v50_v25 }
 0x10a   :  { %v55_v28 = vmul.f32 %v54_v27, %v38_v12 }
 0x10c   :  { %v59_v30 = vmul.f32 %v132_v26, %v55_v28 }
 0x10e   :  { %v63_v31 = vadd.f32 %v133_v29, %v59_v30 }
 0x110   :  { %v64_v32 = vpack.c.bf16 %v63_v31, %v63_v31 }
 0x112   :  { %127 = vmatmul.msk.bf16.vlgmr.msra.gmra.mxu0 %vm85_vm5, %v64_v32 }
 0x18f   :  { %v98_v34 = vpop.f32.mrf.mxu0 }
 0x190   :  { %v99_v35 = vadd.f32 %v134_v33, %v98_v34 }
 0x192   :  { %102 = vst [vmem:[#allocation2] sm:$0x3] %v99_v35 }
 0x193   :  { %113 = dma.vmem_to_hbm [thread:$0]  %s109_s29, 32, %s111_s1, [#allocation3]  }
 0x197   :  { %v100_v36 = vpop.f32.mrf.mxu0 }
 0x198   :  { %163 = dma.done.wait [#allocation3], 32  }
 0x199   :  { %164 = vsyncadd [#allocation3], 4294967264 }
 0x19a   :  { %118 = vsyncpa [#allocation3], 1 }

// kernel: _lambda_.6
= control target key start
LH: loop header
LB: loop body
LE: loop exit
PB: predicated region body
PF: predicated region fallthrough
CT: control target
= control target key end

     0   :  { %s2175_s29 = smov 0   ;;  %s2177_s30 = smov 0   ;;  %s2550_s0 = inlined_call_operand.vmem [shape: bf16[32,32], index: 0, kind: input, shape index: {}]   ;;  %s2551_s1 = inlined_call_operand.vmem [shape: f32[1,2,8,8], index: 1, kind: input, shape index: {}]   ;;  %s2552_s2 = inlined_call_operand.vmem [shape: f32[2,1,32], index: 2, kind: input, shape index: {}]   ;;  %s2553_s3 = inlined_call_operand.vmem [shape: f32[2,1,32], index: 3, kind: input, shape index: {}]   ;;  %s2554_s4 = inlined_call_operand.vmem [shape: bf16[2,32,96], index: 4, kind: input, shape index: {}]   ;;  %s2555_s5 = inlined_call_operand.vmem [shape: f32[2,1,96], index: 5, kind: input, shape index: {}]   ;;  %s2556_s6 = inlined_call_operand.vmem [shape: bf16[2,32,32], index: 6, kind: input, shape index: {}]   ;;  %s2557_s7 = inlined_call_operand.vmem [shape: f32[2,1,32], index: 7, kind: input, shape index: {}]   ;;  %s2558_s8 = inlined_call_operand.vmem [shape: f32[2,1,32], index: 8, kind: input, shape index: {}]   ;;  %s2559_s9 = inlined_call_operand.vmem [shape: f32[2,1,32], index: 9, kind: input, shape index: {}]   ;;  %s2560_s10 = inlined_call_operand.vmem [shape: bf16[2,32,64], index: 10, kind: input, shape index: {}]   ;;  %s2561_s11 = inlined_call_operand.vmem [shape: f32[2,1,64], index: 11, kind: input, shape index: {}]   ;;  %s2562_s12 = inlined_call_operand.vmem [shape: bf16[2,64,32], index: 12, kind: input, shape index: {}]   ;;  %s2563_s13 = inlined_call_operand.vmem [shape: f32[2,1,32], index: 13, kind: input, shape index: {}]   ;;  %s2564_s14 = inlined_call_operand.vmem [shape: bf16[32,32], index: 14, kind: output, shape index: {}]  }
   0x1   :  { %2570 = sst [smem:[#allocation8_spill]] %s2551_s1  ;;  %s2179_s15 = smov 0  }
   0x2   :  { %2571 = sst [smem:[#allocation9_spill]] %s2554_s4 }
   0x3   :  { %2572 = sst [smem:[#allocation10_spill]] %s2556_s6 }
   0x4   :  { %2573 = sst [smem:[#allocation11_spill]] %s2564_s14 }
   0x5 LB: > { %2574 = sst [smem:[#allocation4_spill]] %s2087_s30  ;;  %s33_s16 = sadd.s32 1, %s2087_s30  ;;  %s2091_s15 = sphi %s2179_s15, %s24_s15   ;;  %s2087_s30 = sphi %s2177_s30, %s2589_s30   ;;  %s2083_s29 = sphi %s2175_s29, %s2588_s29  }
   0x6   : > { %2575 = sst [smem:[#allocation5_spill]] %s2091_s15  ;;  %p1867_p0 = scmp.ge.s32.totalorder %s2091_s15, 1 }
   0x7   : > { %p34_p1 = scmp.ge.s32.totalorder %s33_s16, 2  ;;  %p529_p2 = scmp.lt.s32.totalorder %s2091_s15, 3 }
   0x9   : > { %s2591_s16 = smov (%p34_p1, %s33_s16), 0  ;;  %p530_p3 = pnand %p1867_p0, %p529_p2 }
   0xa   : > { %2576 = sst [smem:[#allocation6_spill]] %s2591_s16 }
   0xb   : > { %533 = sbr.rel (%p530_p3) target bundleno = 2376 (0x948), region = 76 }
  0x10   : > { %p625_p4 = scmp.lt.s32.totalorder %s2083_s29, 1  ;;  %s2577_s4 = sld [smem:[#allocation9_spill]] }
  0x11   : > { %s2578_s6 = sld [smem:[#allocation10_spill]]  ;;  %p1876_p5 = scmp.ne.s32.totalorder %s2083_s29, 0 }
  0x12   : > { %s2197_s17 = scalar_select %p625_p4, %s2083_s29, 1 }
  0x14   : > { %s1947_s24 = sshll.u32 %s2197_s17, 4  ;;  %s649_s1 = scalar_lea.vmem %s2558_s8, %s2197_s17 }
  0x15   : > { %s652_s27 = scalar_lea.vmem %s2559_s9, %s2197_s17  ;;  %s668_s25 = scalar_lea.vmem %s2563_s13, %s2197_s17 }
  0x16   : > { %s2215_s19 = scalar_lea.vmem %s2577_s4, %s1947_s24  ;;  %s2237_s4 = scalar_lea.vmem %s2560_s10, %s1947_s24 }
  0x17   : > { %s2220_s15 = scalar_lea.vmem %s2578_s6, %s1947_s24  ;;  %s660_s6 = scalar_lea.vmem %s2561_s11, %s2197_s17 }
  0x18   : > { %2579 = sst [smem:[#allocation7_spill]] %s2220_s15  ;;  %s1950_s15 = sshll.u32 %s2197_s17, 5 }
  0x19   : > { %s2247_s21 = scalar_lea.vmem %s2562_s12, %s1950_s15  ;;  %679 = sbr.rel (%p1876_p5) target bundleno = 37 (0x25), region = 80 }
  0x1e   : > { %v1962_v0 = vld [vmem:[%s2550_s0] sm:$0xff]   ;;  %vm688_vm0 = vcmask 261120   ;;  %v1969_v1 = vld [vmem:[%s2550_s0 + $0x8] sm:$0xff]  }
  0x1f   : > { %v1963_v2 = vunpack.c.l.bf16 %v1962_v0  ;;  %v1964_v3 = vunpack.c.h.bf16 %v1962_v0  ;;  %v1967_v4 = vunpack.c.l.bf16 %v1969_v1  ;;  %v1968_v5 = vunpack.c.h.bf16 %v1969_v1 }
  0x21   : > { %689 = vst.msk [vmem:[#allocation2] sm:$0xff] %vm688_vm0, %v1963_v2 }
  0x22   : > { %690 = vst.msk [vmem:[#allocation2 + $0x8] sm:$0xff] %vm688_vm0, %v1964_v3 }
  0x23   : > { %691 = vst.msk [vmem:[#allocation2 + $0x10] sm:$0xff] %vm688_vm0, %v1967_v4 }
  0x24   : > { %692 = vst.msk [vmem:[#allocation2 + $0x18] sm:$0xff] %vm688_vm0, %v1968_v5 }
  0x25 PF: > { %vm699_vm1 = vcmask 261120   ;;  %v2093_v14 = vmov 32.0   ;;  %v1952_v41 = vld [vmem:[%s2215_s19 + $0x8] sm:$0xff]  ;;  %v1951_v46 = vld [vmem:[%s2215_s19] sm:$0xff]  ;;  %s2580_s30 = scalar_lea.vmem %s2552_s2, %s2197_s17  ;;  %s2581_s20 = scalar_lea.vmem %s2553_s3, %s2197_s17  ;;  %vm866_vm15 = vcmask 130048   ;;  %vm1012_vm0 = vcmask 1043456  }
  0x26   : > { %2011 = vrcp.f32 %v2093_v14  ;;  %843 = vmatpush.bf16.msra.mxu0 %v1952_v41  ;;  %1970 = vmatpush.bf16.msra.mxu1 %v1952_v41  ;;  %s2582_s26 = scalar_lea.vmem %s2555_s5, %s2197_s17  ;;  %s2094_s24 = smov 96  }
  0x27   : > { %s2095_s28 = smov 64   ;;  %s2583_s19 = sld [smem:[#allocation8_spill]] }
  0x28   : > { %v2262_v7 = vld [vmem:[#allocation2] sm:$0xff]  ;;  %s2097_s16 = smov 112   ;;  %s2098_s23 = smov 48  }
  0x29   : > { %v700_v9 = vsel %vm699_vm1, %v2262_v7, 0.0  ;;  %v2270_v11 = vld [vmem:[#allocation2 + $0x8] sm:$0xff]  ;;  %s2584_s22 = sld [smem:[#allocation7_spill]]  ;;  %s2585_s18 = scalar_lea.vmem %s2557_s7, %s2197_s17 }
  0x2a   : > { %v2260_v6 = vld [vmem:[#allocation2 + $0x10] sm:$0xff]  ;;  %701 = vadd.xlane.f32.xlu0 %v700_v9  ;;  %v703_v13 = vsel %vm699_vm1, %v2270_v11, 0.0  ;;  %844 = vmatpush.bf16.msra.mxu0 %v1951_v46  ;;  %p1942_p6 = scmp.ne.s32.totalorder %s2083_s29, 1 }
  0x2b   : > { %v706_v8 = vsel %vm699_vm1, %v2260_v6, 0.0  ;;  %v2268_v10 = vld [vmem:[#allocation2 + $0x18] sm:$0xff]  ;;  %1971 = vmatpush.bf16.msra.mxu1 %v1951_v46  ;;  %s2586_s14 = sld [smem:[#allocation11_spill]] (!%p1942_p6) }
  0x2c   : > { %707 = vadd.xlane.f32.xlu1 %v706_v8  ;;  %v709_v12 = vsel %vm699_vm1, %v2268_v10, 0.0  ;;  %v2012_v15 = vpop.eup %2011 }
  0x2d   : > { %v713_v16 = vmul.f32 32.0, %v2012_v15  ;;  %vm717_vm2 = vweird.f32 %v2012_v15 }
  0x2f   : > { %v714_v17 = vsub.f32 1.0, %v713_v16 }
  0x31   : > { %v715_v18 = vmul.f32 %v2012_v15, %v714_v17 }
  0x32   : > { %704 = vadd.xlane.f32.xlu0 %v703_v13 }
  0x33   : > { %v716_v19 = vadd.f32 %v2012_v15, %v715_v18 }
  0x34   : > { %710 = vadd.xlane.f32.xlu1 %v709_v12 }
  0x35   : > { %v2276_v20 = vsel %vm717_vm2, %v2012_v15, %v716_v19  ;;  %vm958_vm2 = vcmask 64512  }
  0x9d   : > { %v702_v22 = vpop.xlane.xlu0 %701 }
  0x9e   : > { %v719_v24 = vmul.f32 %v2276_v20, %v702_v22 }
  0x9f   : > { %v708_v21 = vpop.xlane.xlu1 %707 }
  0xa0   : > { %v721_v23 = vmul.f32 %v2276_v20, %v708_v21  ;;  %v2284_v26 = vsub.f32 %v2262_v7, %v719_v24  ;;  %v2003_v21 = vld [vmem:[%s2580_s30] ss:$0 sm:$0xff]  ;;  %s2096_s30 = smov 80  }
  0xa2   : > { %v2281_v25 = vsub.f32 %v2260_v6, %v721_v23  ;;  %v727_v28 = vmul.f32 %v2284_v26, %v2284_v26 }
  0xa4   : > { %v729_v27 = vmul.f32 %v2281_v25, %v2281_v25  ;;  %v731_v30 = vsel %vm699_vm1, %v727_v28, 0.0 }
  0xa5   : > { %732 = vadd.xlane.f32.xlu2 %v731_v30  ;;  %v705_v32 = vpop.xlane.xlu0 %704 }
  0xa6   : > { %v737_v29 = vsel %vm699_vm1, %v729_v27, 0.0  ;;  %v720_v34 = vmul.f32 %v2276_v20, %v705_v32 }
  0xa7   : > { %v711_v31 = vpop.xlane.xlu1 %710  ;;  %738 = vadd.xlane.f32.xlu0 %v737_v29  ;;  %v2004_v29 = vld [vmem:[%s2581_s20] ss:$0 sm:$0xff] }
  0xa8   : > { %v722_v33 = vmul.f32 %v2276_v20, %v711_v31  ;;  %v2298_v36 = vsub.f32 %v2270_v11, %v720_v34 }
  0xaa   : > { %v2295_v35 = vsub.f32 %v2268_v10, %v722_v33  ;;  %v728_v38 = vmul.f32 %v2298_v36, %v2298_v36 }
  0xac   : > { %v730_v37 = vmul.f32 %v2295_v35, %v2295_v35  ;;  %v734_v40 = vsel %vm699_vm1, %v728_v38, 0.0 }
  0xad   : > { %735 = vadd.xlane.f32.xlu2 %v734_v40 }
  0xae   : > { %v740_v39 = vsel %vm699_vm1, %v730_v37, 0.0 }
  0xaf   : > { %741 = vadd.xlane.f32.xlu1 %v740_v39 }
 0x118   : > { %v733_v42 = vpop.xlane.xlu2 %732 }
 0x119   : > { %v743_v44 = vmul.f32 %v733_v42, %v2276_v20 }
 0x11a   : > { %v739_v43 = vpop.xlane.xlu0 %738 }
 0x11b   : > { %v745_v45 = vmul.f32 %v739_v43, %v2276_v20  ;;  %v747_v47 = vadd.f32 1e-05, %v743_v44 }
 0x11d   : > { %v749_v48 = vadd.f32 1e-05, %v745_v45  ;;  %2013 = vrsqrt.f32 %v747_v47  ;;  %vm757_vm6 = vweird.f32 %v747_v47 }
 0x11f   : > { %2015 = vrsqrt.f32 %v749_v48  ;;  %vm777_vm5 = vweird.f32 %v749_v48 }
 0x120   : > { %v736_v50 = vpop.xlane.xlu2 %735 }
 0x121   : > { %v744_v52 = vmul.f32 %v736_v50, %v2276_v20 }
 0x122   : > { %v742_v49 = vpop.xlane.xlu1 %741 }
 0x123   : > { %v746_v51 = vmul.f32 %v742_v49, %v2276_v20  ;;  %v2014_v53 = vpop.eup %2013  ;;  %v748_v55 = vadd.f32 1e-05, %v744_v52 }
 0x124   : > { %v752_v57 = vmul.f32 %v2014_v53, %v747_v47  ;;  %vm758_vm4 = vweird.f32 %v2014_v53 }
 0x125   : > { %v750_v54 = vadd.f32 1e-05, %v746_v51  ;;  %v2016_v56 = vpop.eup %2015  ;;  %vm759_vm8 = vmor %vm757_vm6, %vm758_vm4  ;;  %vm767_vm13 = vweird.f32 %v748_v55 }
 0x126   : > { %v772_v58 = vmul.f32 %v2016_v56, %v749_v48  ;;  %v753_v59 = vmul.f32 %v2014_v53, %v752_v57  ;;  %vm778_vm3 = vweird.f32 %v2016_v56 }
 0x127   : > { %2017 = vrsqrt.f32 %v750_v54  ;;  %vm779_vm7 = vmor %vm777_vm5, %vm778_vm3  ;;  %vm787_vm11 = vweird.f32 %v750_v54  ;;  %vm1338_vm3 = vcmask 261248  }
 0x128   : > { %2019 = vrsqrt.f32 %v748_v55  ;;  %v773_v60 = vmul.f32 %v2016_v56, %v772_v58  ;;  %v754_v61 = vmul.f32 0.5, %v753_v59 }
 0x12a   : > { %v774_v62 = vmul.f32 0.5, %v773_v60  ;;  %v755_v63 = vsub.f32 1.5, %v754_v61 }
 0x12c   : > { %v775_v1 = vsub.f32 1.5, %v774_v62  ;;  %v756_v4 = vmul.f32 %v2014_v53, %v755_v63 }
 0x12d   : > { %v2018_v0 = vpop.eup %2017 }
 0x12e   : > { %v2020_v2 = vpop.eup %2019  ;;  %v782_v3 = vmul.f32 %v2018_v0, %v750_v54  ;;  %v776_v5 = vmul.f32 %v2016_v56, %v775_v1  ;;  %v760_v15 = vsel %vm759_vm8, %v2014_v53, %v756_v4  ;;  %vm788_vm9 = vweird.f32 %v2018_v0 }
 0x12f   : > { %v762_v8 = vmul.f32 %v2020_v2, %v748_v55  ;;  %vm768_vm10 = vweird.f32 %v2020_v2  ;;  %v791_v22 = vmul.f32 %v760_v15, %v2284_v26  ;;  %vm789_vm12 = vmor %vm787_vm11, %vm788_vm9 }
 0x130   : > { %v783_v9 = vmul.f32 %v2018_v0, %v782_v3  ;;  %v780_v13 = vsel %vm779_vm7, %v2016_v56, %v776_v5  ;;  %vm769_vm14 = vmor %vm767_vm13, %vm768_vm10 }
 0x131   : > { %v763_v12 = vmul.f32 %v2020_v2, %v762_v8  ;;  %v793_v18 = vmul.f32 %v780_v13, %v2281_v25  ;;  %v798_v26 = vmul.f32 %v2003_v21, %v791_v22 }
 0x132   : > { %v784_v14 = vmul.f32 0.5, %v783_v9  ;;  %v860_v9 = vld [vmem:[%s2583_s19] sm:$0xff] }
 0x133   : > { %v764_v16 = vmul.f32 0.5, %v763_v12  ;;  %v800_v30 = vmul.f32 %v2003_v21, %v793_v18  ;;  %v805_v38 = vadd.f32 %v2004_v29, %v798_v26 }
 0x134   : > { %v785_v17 = vsub.f32 1.5, %v784_v14 }
 0x135   : > { %v765_v19 = vsub.f32 1.5, %v764_v16  ;;  %v807_v34 = vadd.f32 %v2004_v29, %v800_v30 }
 0x136   : > { %v786_v23 = vmul.f32 %v2018_v0, %v785_v17 }
 0x137   : > { %v766_v24 = vmul.f32 %v2020_v2, %v765_v19 }
 0x138   : > { %v790_v27 = vsel %vm789_vm12, %v2018_v0, %v786_v23 }
 0x139   : > { %v794_v28 = vmul.f32 %v790_v27, %v2295_v35  ;;  %v770_v25 = vsel %vm769_vm14, %v2020_v2, %v766_v24  ;;  %v2005_v35 = vld [vmem:[%s2582_s26] ss:$0 sm:$0xff]  ;;  %s2099_s26 = smov 16  }
 0x13a   : > { %v792_v31 = vmul.f32 %v770_v25, %v2298_v36 }
 0x13b   : > { %v801_v32 = vmul.f32 %v2003_v21, %v794_v28 }
 0x13c   : > { %v799_v33 = vmul.f32 %v2003_v21, %v792_v31 }
 0x13d   : > { %v808_v37 = vadd.f32 %v2004_v29, %v801_v32 }
 0x13e   : > { %v806_v39 = vadd.f32 %v2004_v29, %v799_v33 }
 0x13f   : > { %v810_v40 = vpack.c.bf16 %v808_v37, %v807_v34 }
 0x140   : > { %v809_v41 = vpack.c.bf16 %v806_v39, %v805_v38 }
 0x141   : > { %1886 = vmatmul.msk.bf16.vlgmr.msra.gmra.mxu1 %vm699_vm1, %v810_v40 }
 0x142   : > { %1885 = vmatmul.msk.bf16.vlgmr.msra.gmra.mxu0 %vm699_vm1, %v809_v41 }
 0x1be   : > { %v851_v42 = vpop.f32.mrf.mxu1 }
 0x1bf   : > { %v846_v36 = vpop.f32.mrf.mxu0  ;;  %v852_v43 = vadd.f32 %v2005_v35, %v851_v42 }
 0x1c0   : > { %v847_v44 = vadd.f32 %v2005_v35, %v846_v36 }
 0x1c1   : > { %v858_v45 = vpack.c.bf16 %v852_v43, %v852_v43 }
 0x1c2   : > { %v856_v46 = vpack.c.bf16 %v847_v44, %v847_v44 }
 0x1c3   : > { %v911_v47 = vunpack.c.l.b16 %v858_v45 }
 0x1c4   : > { %v862_v48 = vunpack.c.l.b16 %v856_v46 }
 0x1c5   : > { %v2333_v49 = vpack.c.b16 %v911_v47, %v911_v47 }
 0x1c6   : > { %v2335_v50 = vpack.c.b16 %v862_v48, %v862_v48  ;;  %v853_v52 = vpop.f32.mrf.mxu1 }
 0x1c7   : > { %v848_v51 = vpop.f32.mrf.mxu0  ;;  %913 = vrot.lane.b32.xlu1 %v2333_v49, %s2094_s24  ;;  %v854_v55 = vadd.f32 %v2005_v35, %v853_v52 }
 0x1c8   : > { %v849_v53 = vadd.f32 %v2005_v35, %v848_v51  ;;  %864 = vrot.lane.b32.xlu0 %v2335_v50, %s2094_s24 }
 0x1c9   : > { %v859_v58 = vpack.c.bf16 %v854_v55, %v854_v55 }
 0x1ca   : > { %v857_v54 = vpack.c.bf16 %v849_v53, %v849_v53 }
 0x1cb   : > { %v935_v59 = vunpack.c.l.b16 %v859_v58 }
 0x1cc   : > { %v887_v56 = vunpack.c.l.b16 %v857_v54 }
 0x1cd   : > { %v2344_v60 = vpack.c.b16 %v935_v59, %v935_v59 }
 0x1ce   : > { %v2339_v57 = vpack.c.b16 %v887_v56, %v887_v56 }
 0x1d0   : > { %889 = vrot.lane.b32.xlu2 %v2339_v57, %s2094_s24  ;;  %1007 = vrot.lane.b32.xlu0 %v2335_v50, %s2095_s28 }
 0x1d8   : > { %937 = vrot.lane.b32.xlu2 %v2344_v60, %s2094_s24 }
 0x22a   : > { %v890_v61 = vpop.permute.xlu2 %889 }
 0x22b   : > { %v895_v62 = vsel %vm866_vm15, %v890_v61, 0 }
 0x22c   : > { %904 = vmatpush.bf16.xpose.msra.mxu2 %v895_v62 }
 0x232   : > { %v938_v63 = vpop.permute.xlu2 %937 }
 0x233   : > { %1888 = vmatmul.msk.bf16.vlgmr.msra.gmra.mxu2 %vm866_vm15, %v857_v54  ;;  %v943_v4 = vsel %vm866_vm15, %v938_v63, 0 }
 0x239   : > { %v914_v0 = vpop.permute.xlu1 %913 }
 0x23a   : > { %v865_v1 = vpop.permute.xlu0 %864  ;;  %v919_v2 = vsel %vm866_vm15, %v914_v0, 0 }
 0x23b   : > { %v871_v3 = vsel %vm866_vm15, %v865_v1, 0  ;;  %928 = vmatpush.bf16.xpose.msra.mxu3 %v919_v2 }
 0x23c   : > { %880 = vmatpush.bf16.xpose.msrb.mxu1 %v871_v3 }
 0x242   : > { %v1008_v5 = vpop.permute.xlu0 %1007  ;;  %1889 = vmatmul.msk.bf16.vlgmr.msra.gmra.mxu3 %vm866_vm15, %v858_v45 }
 0x243   : > { %1887 = vmatmul.msk.bf16.vlgmr.msrb.gmra.mxu1 %vm866_vm15, %v856_v46  ;;  %v1014_v8 = vsel %vm1012_vm0, %v1008_v5, 0 }
 0x244   : > { %952 = vmatpush.bf16.xpose.msra.mxu1 %v943_v4  ;;  %1023 = vmatpush.bf16.msrb.mxu2 %v1014_v8 }
 0x253   : > { %1890 = vmatmul.msk.bf16.vlgmr.msra.gmra.mxu1 %vm866_vm15, %v859_v58 }
 0x2b6   : > { %v906_v12 = vpop.f32.mrf.mxu2 }
 0x2b7   : > { %v907_v13 = vadd.f32 %v906_v12, %v860_v9 }
 0x2b9   : > { %v962_v14 = vsel %vm958_vm2, %v907_v13, -inf }
 0x2ba   : > { %963 = vmax.xlane.f32.xlu2 %v962_v14 }
 0x2be   : > { %v908_v15 = vpop.f32.mrf.mxu2 }
 0x2c0   : > { %v882_v16 = vpop.f32.mrf.mxu1 }
 0x2c1   : > { %v883_v17 = vadd.f32 %v882_v16, %v860_v9 }
 0x2c3   : > { %v959_v18 = vsel %vm958_vm2, %v883_v17, -inf }
 0x2c4   : > { %960 = vmax.xlane.f32.xlu0 %v959_v18 }
 0x2c5   : > { %v930_v19 = vpop.f32.mrf.mxu3 }
 0x2c6   : > { %v931_v21 = vadd.f32 %v930_v19, %v860_v9 }
 0x2c8   : > { %v884_v22 = vpop.f32.mrf.mxu1  ;;  %v965_v23 = vsel %vm958_vm2, %v931_v21, -inf }
 0x2c9   : > { %966 = vmax.xlane.f32.xlu1 %v965_v23 }
 0x2cd   : > { %v932_v24 = vpop.f32.mrf.mxu3 }
 0x2d0   : > { %v954_v27 = vpop.f32.mrf.mxu1 }
 0x2d1   : > { %v955_v28 = vadd.f32 %v954_v27, %v860_v9 }
 0x2d2   : > { %1029 = vrot.lane.b32.xlu2 %v2339_v57, %s2095_s28 }
 0x2d3   : > { %v968_v25 = vsel %vm958_vm2, %v955_v28, -inf }
 0x2d4   : > { %969 = vmax.xlane.f32.xlu0 %v968_v25 }
 0x2d8   : > { %v956_v29 = vpop.f32.mrf.mxu1 }
 0x2e2   : > { %1100 = vrot.lane.b32.xlu1 %v2335_v50, %s2096_s30 }
 0x2e8   : > { %1123 = vrot.lane.b32.xlu0 %v2339_v57, %s2096_s30 }
 0x2ea   : > { %1098 = vrot.lane.b32.xlu1 %v2335_v50, %s2097_s16 }
 0x2f2   : > { %1121 = vrot.lane.b32.xlu1 %v2339_v57, %s2097_s16 }
 0x2fa   : > { %1050 = vrot.lane.b32.xlu1 %v2333_v49, %s2095_s28 }
 0x32d   : > { %v964_v30 = vpop.xlane.xlu2 %963 }
 0x32e   : > { %v972_v31 = vsub.f32 %v907_v13, %v964_v30 }
 0x330   : > { %v977_v26 = vmul.f32 1.442695, %v972_v31 }
 0x332   : > { %2021 = vpow2.f32 %v977_v26 }
 0x335   : > { %v1030_v32 = vpop.permute.xlu2 %1029 }
 0x336   : > { %v1035_v33 = vsel %vm1012_vm0, %v1030_v32, 0  ;;  %v1895_v32 = vld [vmem:[%s2583_s19 + $0x8] sm:$0xff] }
 0x337   : > { %1044 = vmatpush.bf16.msrb.mxu3 %v1035_v33  ;;  %v961_v34 = vpop.xlane.xlu0 %960 }
 0x338   : > { %v2022_v37 = vpop.eup %2021  ;;  %v971_v38 = vsub.f32 %v883_v17, %v961_v34 }
 0x339   : > { %v986_v39 = vsel %vm958_vm2, %v2022_v37, 0.0 }
 0x33a   : > { %v975_v40 = vmul.f32 1.442695, %v971_v38  ;;  %987 = vadd.xlane.f32.xlu1 %v986_v39 }
 0x33c   : > { %2023 = vpow2.f32 %v975_v40  ;;  %v967_v41 = vpop.xlane.xlu1 %966 }
 0x33d   : > { %v973_v35 = vsub.f32 %v931_v21, %v967_v41 }
 0x33f   : > { %v979_v42 = vmul.f32 1.442695, %v973_v35 }
 0x341   : > { %2025 = vpow2.f32 %v979_v42 }
 0x342   : > { %v2024_v36 = vpop.eup %2023 }
 0x343   : > { %v983_v43 = vsel %vm958_vm2, %v2024_v36, 0.0 }
 0x344   : > { %984 = vadd.xlane.f32.xlu2 %v983_v43 }
 0x347   : > { %v970_v44 = vpop.xlane.xlu0 %969  ;;  %v2026_v45 = vpop.eup %2025 }
 0x348   : > { %v974_v46 = vsub.f32 %v955_v28, %v970_v44  ;;  %v989_v48 = vsel %vm958_vm2, %v2026_v45, 0.0 }
 0x34a   : > { %v981_v47 = vmul.f32 1.442695, %v974_v46 }
 0x34c   : > { %2027 = vpow2.f32 %v981_v47  ;;  %990 = vadd.xlane.f32.xlu2 %v989_v48 }
 0x352   : > { %v2028_v51 = vpop.eup %2027 }
 0x353   : > { %1071 = vrot.lane.b32.xlu1 %v2344_v60, %s2095_s28  ;;  %v992_v52 = vsel %vm958_vm2, %v2028_v51, 0.0 }
 0x354   : > { %993 = vadd.xlane.f32.xlu0 %v992_v52  ;;  %v1101_v53 = vpop.permute.xlu1 %1100 }
 0x355   : > { %v1106_v54 = vsel %vm866_vm15, %v1101_v53, 0 }
 0x356   : > { %1115 = vmatpush.bf16.xpose.msra.mxu2 %v1106_v54 }
 0x35a   : > { %v1124_v55 = vpop.permute.xlu0 %1123 }
 0x35b   : > { %v1129_v56 = vsel %vm866_vm15, %v1124_v55, 0  ;;  %1146 = vrot.lane.b32.xlu1 %v2333_v49, %s2096_s30 }
 0x35c   : > { %1138 = vmatpush.bf16.xpose.msra.mxu3 %v1129_v56  ;;  %v1099_v58 = vpop.permute.xlu1 %1098 }
 0x363   : > { %1167 = vrot.lane.b32.xlu1 %v2344_v60, %s2097_s16 }
 0x364   : > { %1169 = vrot.lane.b32.xlu2 %v2344_v60, %s2096_s30  ;;  %v1122_v59 = vpop.permute.xlu1 %1121 }
 0x368   : > { %1144 = vrot.lane.b32.xlu0 %v2333_v49, %s2097_s16 }
 0x36c   : > { %v1051_v61 = vpop.permute.xlu1 %1050 }
 0x36d   : > { %v1056_v62 = vsel %vm1012_vm0, %v1051_v61, 0 }
 0x36e   : > { %1065 = vmatpush.bf16.msrb.mxu0 %v1056_v62 }
 0x3ad   : > { %v988_v63 = vpop.xlane.xlu1 %987 }
 0x3ae   : > { %2029 = vrcp.f32 %v988_v63 }
 0x3b4   : > { %v2030_v0 = vpop.eup %2029 }
 0x3b5   : > { %v1000_v1 = vmul.f32 %v2030_v0, %v2022_v37 }
 0x3b7   : > { %v985_v2 = vpop.xlane.xlu2 %984  ;;  %v1004_v3 = vpack.c.bf16 %v1000_v1, %v1000_v1 }
 0x3b8   : > { %2031 = vrcp.f32 %v985_v2 }
 0x3b9   : > { %1892 = vmatmul.msk.bf16.vlgmr.msrb.gmra.mxu3 %vm958_vm2, %v1004_v3 }
 0x3be   : > { %v2032_v4 = vpop.eup %2031 }
 0x3bf   : > { %v999_v5 = vmul.f32 %v2032_v4, %v2024_v36  ;;  %v991_v8 = vpop.xlane.xlu2 %990 }
 0x3c0   : > { %2033 = vrcp.f32 %v991_v8 }
 0x3c1   : > { %v1003_v9 = vpack.c.bf16 %v999_v5, %v999_v5 }
 0x3c3   : > { %1891 = vmatmul.msk.bf16.vlgmr.msrb.gmra.mxu2 %vm958_vm2, %v1003_v9 }
 0x3c5   : > { %v1072_v12 = vpop.permute.xlu1 %1071 }
 0x3c6   : > { %v2034_v13 = vpop.eup %2033  ;;  %v1077_v14 = vsel %vm1012_vm0, %v1072_v12, 0 }
 0x3c7   : > { %v1001_v15 = vmul.f32 %v2034_v13, %v2026_v45  ;;  %1086 = vmatpush.bf16.msrb.mxu1 %v1077_v14  ;;  %v1170_v16 = vpop.permute.xlu2 %1169  ;;  %v994_v17 = vpop.xlane.xlu0 %993 }
 0x3c8   : > { %v1175_v18 = vsel %vm866_vm15, %v1170_v16, 0  ;;  %2035 = vrcp.f32 %v994_v17 }
 0x3c9   : > { %1897 = vmatmul.msk.bf16.vlgmr.msra.gmra.mxu3 %vm866_vm15, %v1122_v59  ;;  %v1005_v19 = vpack.c.bf16 %v1001_v15, %v1001_v15 }
 0x3cb   : > { %1184 = vmatpush.bf16.xpose.msra.mxu1 %v1175_v18  ;;  %1893 = vmatmul.msk.bf16.vlgmr.msrb.gmra.mxu0 %vm958_vm2, %v1005_v19 }
 0x3cd   : > { %v1147_v21 = vpop.permute.xlu1 %1146 }
 0x3ce   : > { %v2036_v22 = vpop.eup %2035  ;;  %v1152_v23 = vsel %vm866_vm15, %v1147_v21, 0 }
 0x3cf   : > { %v1002_v24 = vmul.f32 %v2036_v22, %v2028_v51  ;;  %1161 = vmatpush.bf16.xpose.msra.mxu0 %v1152_v23 }
 0x3d1   : > { %v1006_v27 = vpack.c.bf16 %v1002_v24, %v1002_v24 }
 0x3d3   : > { %1894 = vmatmul.msk.bf16.vlgmr.msrb.gmra.mxu1 %vm958_vm2, %v1006_v27  ;;  %1896 = vmatmul.msk.bf16.vlgmr.msra.gmra.mxu2 %vm866_vm15, %v1099_v58 }
 0x3d5   : > { %v1168_v25 = vpop.permute.xlu1 %1167 }
 0x3da   : > { %v1145_v28 = vpop.permute.xlu0 %1144 }
 0x3db   : > { %1898 = vmatmul.msk.bf16.vlgmr.msra.gmra.mxu0 %vm866_vm15, %v1145_v28 }
 0x3e3   : > { %1899 = vmatmul.msk.bf16.vlgmr.msra.gmra.mxu1 %vm866_vm15, %v1168_v25 }
 0x43c   : > { %v1046_v29 = vpop.f32.mrf.mxu3 }
 0x43d   : > { %1093 = vst.msk [vmem:[#allocation3 + $0x8] sm:$0xff] %vm866_vm15, %v1046_v29 }
 0x444   : > { %v1048_v30 = vpop.f32.mrf.mxu3 }
 0x446   : > { %v1025_v31 = vpop.f32.mrf.mxu2 }
 0x447   : > { %1092 = vst.msk [vmem:[#allocation3] sm:$0xff] %vm866_vm15, %v1025_v31 }
 0x448   : > { %v1067_v26 = vpop.f32.mrf.mxu0 }
 0x449   : > { %1094 = vst.msk [vmem:[#allocation3 + $0x10] sm:$0xff] %vm866_vm15, %v1067_v26 }
 0x44c   : > { %v1140_v33 = vpop.f32.mrf.mxu3 }
 0x44d   : > { %v1141_v34 = vadd.f32 %v1895_v32, %v1140_v33 }
 0x44e   : > { %v1027_v37 = vpop.f32.mrf.mxu2 }
 0x44f   : > { %v1193_v38 = vsel %vm958_vm2, %v1141_v34, -inf }
 0x450   : > { %v1069_v39 = vpop.f32.mrf.mxu0  ;;  %1194 = vmax.xlane.f32.xlu0 %v1193_v38  ;;  %v1088_v40 = vpop.f32.mrf.mxu1 }
 0x451   : > { %1095 = vst.msk [vmem:[#allocation3 + $0x18] sm:$0xff] %vm866_vm15, %v1088_v40 }
 0x454   : > { %v1142_v41 = vpop.f32.mrf.mxu3 }
 0x456   : > { %v1117_v35 = vpop.f32.mrf.mxu2 }
 0x457   : > { %v1118_v42 = vadd.f32 %v1895_v32, %v1117_v35 }
 0x458   : > { %v1090_v36 = vpop.f32.mrf.mxu1  ;;  %v1163_v43 = vpop.f32.mrf.mxu0 }
 0x459   : > { %v1164_v44 = vadd.f32 %v1895_v32, %v1163_v43  ;;  %v1190_v45 = vsel %vm958_vm2, %v1118_v42, -inf }
 0x45a   : > { %1191 = vmax.xlane.f32.xlu1 %v1190_v45 }
 0x45b   : > { %v1196_v46 = vsel %vm958_vm2, %v1164_v44, -inf }
 0x45c   : > { %1197 = vmax.xlane.f32.xlu2 %v1196_v46  ;;  %v1954_v46 = vld [vmem:[%s2584_s22 + $0x8] sm:$0xff] }
 0x45e   : > { %v1119_v47 = vpop.f32.mrf.mxu2 }
 0x45f   : > { %v1953_v47 = vld [vmem:[%s2584_s22] sm:$0xff] }
 0x460   : > { %v1165_v48 = vpop.f32.mrf.mxu0  ;;  %v1186_v51 = vpop.f32.mrf.mxu1 }
 0x461   : > { %v1187_v52 = vadd.f32 %v1895_v32, %v1186_v51 }
 0x463   : > { %v1199_v53 = vsel %vm958_vm2, %v1187_v52, -inf }
 0x464   : > { %1200 = vmax.xlane.f32.xlu1 %v1199_v53 }
 0x468   : > { %v1188_v54 = vpop.f32.mrf.mxu1 }
 0x474   : > { %1238 = vrot.lane.b32.xlu2 %v2335_v50, %s2098_s23 }
 0x47c   : > { %1301 = vrot.lane.b32.xlu2 %v2344_v60, %s2098_s23 }
 0x4c3   : > { %v1195_v63 = vpop.xlane.xlu0 %1194 }
 0x4c4   : > { %v1203_v60 = vsub.f32 %v1141_v34, %v1195_v63 }
 0x4c6   : > { %v1208_v12 = vmul.f32 1.442695, %v1203_v60 }
 0x4cd   : > { %v1192_v55 = vpop.xlane.xlu1 %1191 }
 0x4ce   : > { %v1202_v56 = vsub.f32 %v1118_v42, %v1192_v55 }
 0x4cf   : > { %v1198_v58 = vpop.xlane.xlu2 %1197 }
 0x4d0   : > { %v1206_v59 = vmul.f32 1.442695, %v1202_v56  ;;  %v1204_v61 = vsub.f32 %v1164_v44, %v1198_v58 }
 0x4d2   : > { %2037 = vpow2.f32 %v1206_v59  ;;  %v1210_v62 = vmul.f32 1.442695, %v1204_v61 }
 0x4d4   : > { %2039 = vpow2.f32 %v1210_v62  ;;  %v2006_v62 = vld [vmem:[%s2585_s18] ss:$0 sm:$0xff] }
 0x4d7   : > { %v1201_v0 = vpop.xlane.xlu1 %1200  ;;  %v1239_v1 = vpop.permute.xlu2 %1238 }
 0x4d8   : > { %v2038_v2 = vpop.eup %2037  ;;  %v1205_v3 = vsub.f32 %v1187_v52, %v1201_v0  ;;  %v1244_v4 = vsel %vm1012_vm0, %v1239_v1, 0 }
 0x4d9   : > { %1253 = vmatpush.bf16.msrb.mxu2 %v1244_v4  ;;  %v1214_v50 = vsel %vm958_vm2, %v2038_v2, 0.0 }
 0x4da   : > { %v2040_v5 = vpop.eup %2039  ;;  %v1212_v8 = vmul.f32 1.442695, %v1205_v3  ;;  %1215 = vadd.xlane.f32.xlu1 %v1214_v50 }
 0x4db   : > { %v1220_v9 = vsel %vm958_vm2, %v2040_v5, 0.0 }
 0x4dc   : > { %2041 = vpow2.f32 %v1212_v8  ;;  %1221 = vadd.xlane.f32.xlu0 %v1220_v9 }
 0x4dd   : > { %2043 = vpow2.f32 %v1208_v12  ;;  %1377 = vmatpush.bf16.msra.mxu2 %v1954_v46 }
 0x4df   : > { %v1302_v13 = vpop.permute.xlu2 %1301 }
 0x4e0   : > { %v1307_v14 = vsel %vm1012_vm0, %v1302_v13, 0 }
 0x4e1   : > { %1316 = vmatpush.bf16.msrb.mxu1 %v1307_v14  ;;  %1378 = vmatpush.bf16.msra.mxu2 %v1953_v47 }
 0x4e2   : > { %v2042_v15 = vpop.eup %2041 }
 0x4e3   : > { %v1223_v16 = vsel %vm958_vm2, %v2042_v15, 0.0  ;;  %v2044_v17 = vpop.eup %2043 }
 0x4e4   : > { %1224 = vadd.xlane.f32.xlu0 %v1223_v16  ;;  %v1217_v18 = vsel %vm958_vm2, %v2044_v17, 0.0 }
 0x4ec   : > { %1218 = vadd.xlane.f32.xlu0 %v1217_v18 }
 0x4f3   : > { %1259 = vrot.lane.b32.xlu1 %v2339_v57, %s2098_s23 }
 0x500   : > { %1280 = vrot.lane.b32.xlu0 %v2333_v49, %s2098_s23 }
 0x54d   : > { %v1216_v19 = vpop.xlane.xlu1 %1215 }
 0x54e   : > { %2045 = vrcp.f32 %v1216_v19 }
 0x54f   : > { %v1222_v21 = vpop.xlane.xlu0 %1221 }
 0x554   : > { %v2046_v22 = vpop.eup %2045 }
 0x555   : > { %v1230_v23 = vmul.f32 %v2046_v22, %v2038_v2 }
 0x557   : > { %v1234_v24 = vpack.c.bf16 %v1230_v23, %v1230_v23  ;;  %v1225_v27 = vpop.xlane.xlu0 %1224 }
 0x558   : > { %2047 = vrcp.f32 %v1225_v27 }
 0x559   : > { %1900 = vmatmul.msk.bf16.vlgmr.msrb.gmra.mxu2 %vm958_vm2, %v1234_v24 }
 0x55e   : > { %v2048_v28 = vpop.eup %2047 }
 0x55f   : > { %v1233_v25 = vmul.f32 %v2048_v28, %v2042_v15  ;;  %v1219_v29 = vpop.xlane.xlu0 %1218 }
 0x560   : > { %2049 = vrcp.f32 %v1219_v29 }
 0x561   : > { %v1237_v30 = vpack.c.bf16 %v1233_v25, %v1233_v25  ;;  %2051 = vrcp.f32 %v1222_v21 }
 0x563   : > { %1903 = vmatmul.msk.bf16.vlgmr.msrb.gmra.mxu1 %vm958_vm2, %v1237_v30 }
 0x565   : > { %v1260_v57 = vpop.permute.xlu1 %1259 }
 0x566   : > { %v2050_v31 = vpop.eup %2049  ;;  %v1265_v49 = vsel %vm1012_vm0, %v1260_v57, 0 }
 0x567   : > { %v1231_v26 = vmul.f32 %v2050_v31, %v2044_v17  ;;  %1274 = vmatpush.bf16.msrb.mxu3 %v1265_v49  ;;  %v2052_v33 = vpop.eup %2051 }
 0x568   : > { %v1232_v34 = vmul.f32 %v2052_v33, %v2040_v5 }
 0x569   : > { %v1235_v32 = vpack.c.bf16 %v1231_v26, %v1231_v26 }
 0x56a   : > { %v1236_v39 = vpack.c.bf16 %v1232_v34, %v1232_v34 }
 0x56b   : > { %1901 = vmatmul.msk.bf16.vlgmr.msrb.gmra.mxu3 %vm958_vm2, %v1235_v32  ;;  %v1956_v32 = vld [vmem:[%s2237_s4 + $0x8] sm:$0xff] }
 0x56c   : > { %1540 = vmatpush.bf16.msra.mxu3 %v1956_v32  ;;  %v1960_v32 = vld [vmem:[%s2247_s21 + $0x18] sm:$0xff] }
 0x572   : > { %v1281_v37 = vpop.permute.xlu0 %1280 }
 0x573   : > { %v1286_v38 = vsel %vm1012_vm0, %v1281_v37, 0  ;;  %v1955_v37 = vld [vmem:[%s2237_s4] sm:$0xff]  ;;  %vm1623_vm0 = vcmask 523264  }
 0x574   : > { %1295 = vmatpush.bf16.msrb.mxu0 %v1286_v38  ;;  %1541 = vmatpush.bf16.msra.mxu3 %v1955_v37  ;;  %v1957_v37 = vld [vmem:[%s2247_s21] sm:$0xff] }
 0x577   : > { %1902 = vmatmul.msk.bf16.vlgmr.msrb.gmra.mxu0 %vm958_vm2, %v1236_v39 }
 0x578   : > { %1634 = vmatpush.bf16.msra.mxu0 %v1960_v32 }
 0x5dc   : > { %v1255_v40 = vpop.f32.mrf.mxu2 }
 0x5dd   : > { %1326 = vrot.lane.b32.xlu1 %v1255_v40, %s2099_s26 }
 0x5e0   : > { %v1318_v41 = vpop.f32.mrf.mxu1 }
 0x5e4   : > { %v1257_v35 = vpop.f32.mrf.mxu2 }
 0x5e8   : > { %v1320_v42 = vpop.f32.mrf.mxu1 }
 0x5ee   : > { %v1276_v36 = vpop.f32.mrf.mxu3 }
 0x5ef   : > { %1328 = vrot.lane.b32.xlu2 %v1276_v36, %s2099_s26 }
 0x5f4   : > { %v1297_v43 = vpop.f32.mrf.mxu0 }
 0x5f5   : > { %1330 = vrot.lane.b32.xlu1 %v1297_v43, %s2099_s26 }
 0x5f6   : > { %v1278_v44 = vpop.f32.mrf.mxu3 }
 0x5f7   : > { %1332 = vrot.lane.b32.xlu2 %v1318_v41, %s2099_s26 }
 0x5fc   : > { %v1299_v45 = vpop.f32.mrf.mxu0 }
 0x649   : > { %v1329_v48 = vpop.permute.xlu2 %1328 }
 0x64a   : > { %1340 = vst.msk [vmem:[#allocation3 + $0x8] sm:$0xff] %vm1338_vm3, %v1329_v48 }
 0x64f   : > { %v1327_v51 = vpop.permute.xlu1 %1326 }
 0x650   : > { %1339 = vst.msk [vmem:[#allocation3] sm:$0xff] %vm1338_vm3, %v1327_v51 }
 0x651   : > { %v1333_v52 = vpop.permute.xlu2 %1332  ;;  %v1344_v54 = vld [vmem:[#allocation3 + $0x8] sm:$0xff] }
 0x652   : > { %1342 = vst.msk [vmem:[#allocation3 + $0x18] sm:$0xff] %vm1338_vm3, %v1333_v52 }
 0x657   : > { %v1343_v53 = vld [vmem:[#allocation3] sm:$0xff] }
 0x658   : > { %v1347_v55 = vpack.c.bf16 %v1344_v54, %v1343_v53 }
 0x659   : > { %v1346_v59 = vld [vmem:[#allocation3 + $0x18] sm:$0xff] }
 0x65a   : > { %1912 = vmatmul.msk.bf16.vlgmr.msra.gmra.mxu2 %vm699_vm1, %v1347_v55 }
 0x667   : > { %v1331_v56 = vpop.permute.xlu1 %1330 }
 0x668   : > { %1341 = vst.msk [vmem:[#allocation3 + $0x10] sm:$0xff] %vm1338_vm3, %v1331_v56  ;;  %v2007_v56 = vld [vmem:[%s649_s1] ss:$0 sm:$0xff] }
 0x66f   : > { %v1345_v58 = vld [vmem:[#allocation3 + $0x10] sm:$0xff] }
 0x670   : > { %v1348_v61 = vpack.c.bf16 %v1346_v59, %v1345_v58 }
 0x672   : > { %1913 = vmatmul.msk.bf16.gmra.mxu2 %vm699_vm1, %v1348_v61 }
 0x6dd   : > { %v1380_v63 = vpop.f32.mrf.mxu2 }
 0x6de   : > { %v1390_v0 = vadd.f32 %v1380_v63, %v2262_v7  ;;  %v2008_v63 = vld [vmem:[%s652_s27] ss:$0 sm:$0xff] }
 0x6e0   : > { %v2445_v1 = vadd.f32 %v2006_v62, %v1390_v0 }
 0x6e2   : > { %v1404_v2 = vsel %vm699_vm1, %v2445_v1, 0.0 }
 0x6e3   : > { %1405 = vadd.xlane.f32.xlu0 %v1404_v2 }
 0x6e5   : > { %v1382_v3 = vpop.f32.mrf.mxu2 }
 0x6e6   : > { %v1391_v4 = vadd.f32 %v1382_v3, %v2270_v11 }
 0x6e8   : > { %v2450_v50 = vadd.f32 %v2006_v62, %v1391_v4 }
 0x6ea   : > { %v1407_v5 = vsel %vm699_vm1, %v2450_v50, 0.0 }
 0x6eb   : > { %1408 = vadd.xlane.f32.xlu1 %v1407_v5 }
 0x6f5   : > { %v1385_v60 = vpop.f32.mrf.mxu2 }
 0x6f6   : > { %v1392_v8 = vadd.f32 %v1385_v60, %v2260_v6 }
 0x6f8   : > { %v2455_v9 = vadd.f32 %v2006_v62, %v1392_v8 }
 0x6fa   : > { %v1410_v7 = vsel %vm699_vm1, %v2455_v9, 0.0 }
 0x6fb   : > { %1411 = vadd.xlane.f32.xlu2 %v1410_v7 }
 0x6fd   : > { %v1387_v12 = vpop.f32.mrf.mxu2 }
 0x6fe   : > { %v1393_v13 = vadd.f32 %v1387_v12, %v2268_v10 }
 0x700   : > { %v2460_v14 = vadd.f32 %v2006_v62, %v1393_v13 }
 0x702   : > { %v1413_v11 = vsel %vm699_vm1, %v2460_v14, 0.0 }
 0x703   : > { %1414 = vadd.xlane.f32.xlu0 %v1413_v11 }
 0x756   : > { %v1406_v15 = vpop.xlane.xlu0 %1405 }
 0x757   : > { %v1416_v16 = vmul.f32 %v1406_v15, %v2276_v20 }
 0x759   : > { %v1420_v6 = vsub.f32 %v2445_v1, %v1416_v16 }
 0x75b   : > { %v1424_v17 = vmul.f32 %v1420_v6, %v1420_v6 }
 0x75d   : > { %v1428_v18 = vsel %vm699_vm1, %v1424_v17, 0.0 }
 0x75e   : > { %v1409_v19 = vpop.xlane.xlu1 %1408  ;;  %1429 = vadd.xlane.f32.xlu1 %v1428_v18 }
 0x75f   : > { %v1417_v21 = vmul.f32 %v1409_v19, %v2276_v20 }
 0x761   : > { %v1421_v10 = vsub.f32 %v2450_v50, %v1417_v21 }
 0x763   : > { %v1425_v22 = vmul.f32 %v1421_v10, %v1421_v10 }
 0x765   : > { %v1431_v23 = vsel %vm699_vm1, %v1425_v22, 0.0 }
 0x766   : > { %1432 = vadd.xlane.f32.xlu2 %v1431_v23 }
 0x76e   : > { %v1412_v24 = vpop.xlane.xlu2 %1411 }
 0x76f   : > { %v1418_v27 = vmul.f32 %v1412_v24, %v2276_v20 }
 0x771   : > { %v2472_v28 = vsub.f32 %v2455_v9, %v1418_v27 }
 0x773   : > { %v1426_v25 = vmul.f32 %v2472_v28, %v2472_v28 }
 0x775   : > { %v1434_v29 = vsel %vm699_vm1, %v1426_v25, 0.0 }
 0x776   : > { %1435 = vadd.xlane.f32.xlu0 %v1434_v29  ;;  %v1415_v30 = vpop.xlane.xlu0 %1414 }
 0x777   : > { %v1419_v57 = vmul.f32 %v1415_v30, %v2276_v20 }
 0x779   : > { %v2479_v31 = vsub.f32 %v2460_v14, %v1419_v57 }
 0x77b   : > { %v1427_v49 = vmul.f32 %v2479_v31, %v2479_v31 }
 0x77d   : > { %v1437_v26 = vsel %vm699_vm1, %v1427_v49, 0.0 }
 0x77e   : > { %1438 = vadd.xlane.f32.xlu1 %v1437_v26 }
 0x7d1   : > { %v1430_v33 = vpop.xlane.xlu1 %1429 }
 0x7d2   : > { %v1440_v34 = vmul.f32 %v1430_v33, %v2276_v20  ;;  %v1959_v33 = vld [vmem:[%s2247_s21 + $0x10] sm:$0xff] }
 0x7d3   : > { %1635 = vmatpush.bf16.msra.mxu0 %v1959_v33 }
 0x7d4   : > { %v1444_v38 = vadd.f32 1e-05, %v1440_v34  ;;  %v2009_v34 = vld [vmem:[%s660_s6] ss:$0 sm:$0xff] }
 0x7d6   : > { %2053 = vrsqrt.f32 %v1444_v38  ;;  %vm1454_vm5 = vweird.f32 %v1444_v38 }
 0x7d9   : > { %v1433_v39 = vpop.xlane.xlu2 %1432 }
 0x7da   : > { %v1441_v40 = vmul.f32 %v1433_v39, %v2276_v20 }
 0x7dc   : > { %v2054_v41 = vpop.eup %2053  ;;  %v1445_v35 = vadd.f32 1e-05, %v1441_v40 }
 0x7dd   : > { %v1449_v42 = vmul.f32 %v2054_v41, %v1444_v38  ;;  %vm1455_vm4 = vweird.f32 %v2054_v41 }
 0x7de   : > { %2055 = vrsqrt.f32 %v1445_v35  ;;  %vm1456_vm6 = vmor %vm1454_vm5, %vm1455_vm4  ;;  %vm1464_vm8 = vweird.f32 %v1445_v35 }
 0x7df   : > { %v1450_v36 = vmul.f32 %v2054_v41, %v1449_v42 }
 0x7e1   : > { %v1451_v43 = vmul.f32 0.5, %v1450_v36 }
 0x7e3   : > { %v1452_v44 = vsub.f32 1.5, %v1451_v43 }
 0x7e4   : > { %v2056_v45 = vpop.eup %2055 }
 0x7e5   : > { %v1453_v46 = vmul.f32 %v2054_v41, %v1452_v44  ;;  %v1459_v47 = vmul.f32 %v2056_v45, %v1445_v35  ;;  %vm1465_vm7 = vweird.f32 %v2056_v45 }
 0x7e6   : > { %vm1466_vm9 = vmor %vm1464_vm8, %vm1465_vm7 }
 0x7e7   : > { %v1460_v48 = vmul.f32 %v2056_v45, %v1459_v47  ;;  %v1457_v51 = vsel %vm1456_vm6, %v2054_v41, %v1453_v46 }
 0x7e8   : > { %v1488_v58 = vmul.f32 %v1457_v51, %v1420_v6 }
 0x7e9   : > { %v1461_v52 = vmul.f32 0.5, %v1460_v48  ;;  %v1436_v53 = vpop.xlane.xlu0 %1435 }
 0x7ea   : > { %v1442_v54 = vmul.f32 %v1436_v53, %v2276_v20  ;;  %v1495_v0 = vmul.f32 %v2007_v56, %v1488_v58 }
 0x7eb   : > { %v1462_v55 = vsub.f32 1.5, %v1461_v52 }
 0x7ec   : > { %v1446_v59 = vadd.f32 1e-05, %v1442_v54  ;;  %v1502_v8 = vadd.f32 %v2008_v63, %v1495_v0 }
 0x7ed   : > { %v1463_v61 = vmul.f32 %v2056_v45, %v1462_v55 }
 0x7ee   : > { %2057 = vrsqrt.f32 %v1446_v59  ;;  %vm1474_vm11 = vweird.f32 %v1446_v59 }
 0x7ef   : > { %v1467_v62 = vsel %vm1466_vm9, %v2056_v45, %v1463_v61 }
 0x7f0   : > { %v1489_v2 = vmul.f32 %v1467_v62, %v1421_v10 }
 0x7f1   : > { %v1439_v3 = vpop.xlane.xlu1 %1438 }
 0x7f2   : > { %v1496_v4 = vmul.f32 %v2007_v56, %v1489_v2  ;;  %v1443_v5 = vmul.f32 %v1439_v3, %v2276_v20 }
 0x7f4   : > { %v2058_v60 = vpop.eup %2057  ;;  %v1503_v7 = vadd.f32 %v2008_v63, %v1496_v4  ;;  %v1447_v12 = vadd.f32 1e-05, %v1443_v5 }
 0x7f5   : > { %v1469_v13 = vmul.f32 %v2058_v60, %v1446_v59  ;;  %vm1475_vm10 = vweird.f32 %v2058_v60 }
 0x7f6   : > { %2059 = vrsqrt.f32 %v1447_v12  ;;  %v1506_v11 = vpack.c.bf16 %v1503_v7, %v1502_v8  ;;  %vm1476_vm12 = vmor %vm1474_vm11, %vm1475_vm10  ;;  %vm1484_vm14 = vweird.f32 %v1447_v12 }
 0x7f7   : > { %v1470_v15 = vmul.f32 %v2058_v60, %v1469_v13 }
 0x7f8   : > { %1922 = vmatmul.msk.bf16.vlgmr.msra.gmra.mxu3 %vm699_vm1, %v1506_v11 }
 0x7f9   : > { %v1471_v16 = vmul.f32 0.5, %v1470_v15 }
 0x7fb   : > { %v1472_v6 = vsub.f32 1.5, %v1471_v16 }
 0x7fc   : > { %v2060_v17 = vpop.eup %2059 }
 0x7fd   : > { %v1473_v18 = vmul.f32 %v2058_v60, %v1472_v6  ;;  %v1479_v19 = vmul.f32 %v2060_v17, %v1447_v12  ;;  %vm1485_vm13 = vweird.f32 %v2060_v17 }
 0x7fe   : > { %vm1486_vm15 = vmor %vm1484_vm14, %vm1485_vm13 }
 0x7ff   : > { %v1480_v21 = vmul.f32 %v2060_v17, %v1479_v19  ;;  %v1477_v20 = vsel %vm1476_vm12, %v2058_v60, %v1473_v18 }
 0x800   : > { %v1490_v23 = vmul.f32 %v1477_v20, %v2472_v28  ;;  %v1958_v28 = vld [vmem:[%s2247_s21 + $0x8] sm:$0xff] }
 0x801   : > { %v1481_v10 = vmul.f32 0.5, %v1480_v21  ;;  %1636 = vmatpush.bf16.msra.mxu0 %v1958_v28 }
 0x802   : > { %v1497_v29 = vmul.f32 %v2007_v56, %v1490_v23  ;;  %v2010_v23 = vld [vmem:[%s668_s25] ss:$0 sm:$0xff] }
 0x803   : > { %v1482_v22 = vsub.f32 1.5, %v1481_v10 }
 0x804   : > { %v1504_v57 = vadd.f32 %v2008_v63, %v1497_v29 }
 0x805   : > { %v1483_v24 = vmul.f32 %v2060_v17, %v1482_v22  ;;  %1637 = vmatpush.bf16.msra.mxu0 %v1957_v37 }
 0x807   : > { %v1487_v27 = vsel %vm1486_vm15, %v2060_v17, %v1483_v24 }
 0x808   : > { %v1491_v25 = vmul.f32 %v1487_v27, %v2479_v31 }
 0x80a   : > { %v1498_v30 = vmul.f32 %v2007_v56, %v1491_v25 }
 0x80c   : > { %v1505_v49 = vadd.f32 %v2008_v63, %v1498_v30 }
 0x80e   : > { %v1507_v26 = vpack.c.bf16 %v1505_v49, %v1504_v57 }
 0x810   : > { %1923 = vmatmul.msk.bf16.gmra.mxu3 %vm699_vm1, %v1507_v26 }
 0x87b   : > { %v1543_v31 = vpop.f32.mrf.mxu3 }
 0x87c   : > { %v1544_v38 = vadd.f32 %v2009_v34, %v1543_v31 }
 0x87e   : > { %v1553_v39 = vmul.f32 %v1544_v38, %v1544_v38 }
 0x880   : > { %v1557_v40 = vmul.f32 %v1553_v39, %v1544_v38 }
 0x882   : > { %v1561_v41 = vmul.f32 0.044715, %v1557_v40 }
 0x883   : > { %v1545_v35 = vpop.f32.mrf.mxu3 }
 0x884   : > { %v1565_v42 = vadd.f32 %v1561_v41, %v1544_v38  ;;  %v1546_v36 = vadd.f32 %v2009_v34, %v1545_v35 }
 0x886   : > { %v1569_v43 = vmul.f32 0.7978846, %v1565_v42  ;;  %v1554_v44 = vmul.f32 %v1546_v36, %v1546_v36 }
 0x888   : > { %v1558_v45 = vmul.f32 %v1554_v44, %v1546_v36  ;;  %2061 = vtanh.f32 %v1569_v43 }
 0x88a   : > { %v1562_v46 = vmul.f32 0.044715, %v1558_v45 }
 0x88c   : > { %v1566_v47 = vadd.f32 %v1562_v46, %v1546_v36 }
 0x88e   : > { %v1570_v48 = vmul.f32 0.7978846, %v1566_v47  ;;  %v2062_v51 = vpop.eup %2061 }
 0x88f   : > { %v1577_v52 = vadd.f32 1.0, %v2062_v51 }
 0x890   : > { %2063 = vtanh.f32 %v1570_v48 }
 0x891   : > { %v1581_v58 = vmul.f32 0.5, %v1577_v52 }
 0x893   : > { %v1548_v53 = vpop.f32.mrf.mxu3  ;;  %v1585_v0 = vmul.f32 %v1581_v58, %v1544_v38 }
 0x894   : > { %v1549_v54 = vadd.f32 %v2009_v34, %v1548_v53 }
 0x896   : > { %v2064_v55 = vpop.eup %2063  ;;  %v1555_v56 = vmul.f32 %v1549_v54, %v1549_v54 }
 0x897   : > { %v1578_v59 = vadd.f32 1.0, %v2064_v55 }
 0x898   : > { %v1559_v61 = vmul.f32 %v1555_v56, %v1549_v54 }
 0x899   : > { %v1582_v62 = vmul.f32 0.5, %v1578_v59 }
 0x89a   : > { %v1563_v63 = vmul.f32 0.044715, %v1559_v61 }
 0x89b   : > { %v1586_v2 = vmul.f32 %v1582_v62, %v1546_v36  ;;  %v1550_v3 = vpop.f32.mrf.mxu3 }
 0x89c   : > { %v1567_v4 = vadd.f32 %v1563_v63, %v1549_v54  ;;  %v1551_v5 = vadd.f32 %v2009_v34, %v1550_v3 }
 0x89d   : > { %v1589_v60 = vpack.c.bf16 %v1586_v2, %v1585_v0 }
 0x89e   : > { %v1571_v8 = vmul.f32 0.7978846, %v1567_v4  ;;  %v1556_v7 = vmul.f32 %v1551_v5, %v1551_v5 }
 0x89f   : > { %1940 = vmatmul.msk.bf16.vlgmr.msra.gmra.mxu0 %vm1623_vm0, %v1589_v60 }
 0x8a0   : > { %v1560_v12 = vmul.f32 %v1556_v7, %v1551_v5  ;;  %2065 = vtanh.f32 %v1571_v8 }
 0x8a2   : > { %v1564_v13 = vmul.f32 0.044715, %v1560_v12 }
 0x8a4   : > { %v1568_v11 = vadd.f32 %v1564_v13, %v1551_v5 }
 0x8a6   : > { %v1572_v15 = vmul.f32 0.7978846, %v1568_v11  ;;  %v2066_v16 = vpop.eup %2065 }
 0x8a7   : > { %v1579_v6 = vadd.f32 1.0, %v2066_v16 }
 0x8a8   : > { %2067 = vtanh.f32 %v1572_v15 }
 0x8a9   : > { %v1583_v19 = vmul.f32 0.5, %v1579_v6 }
 0x8ab   : > { %v1587_v20 = vmul.f32 %v1583_v19, %v1549_v54 }
 0x8ae   : > { %v2068_v17 = vpop.eup %2067 }
 0x8af   : > { %v1580_v18 = vadd.f32 1.0, %v2068_v17 }
 0x8b1   : > { %v1584_v21 = vmul.f32 0.5, %v1580_v18 }
 0x8b3   : > { %v1588_v10 = vmul.f32 %v1584_v21, %v1551_v5 }
 0x8b5   : > { %v1590_v22 = vpack.c.bf16 %v1588_v10, %v1587_v20 }
 0x8b7   : > { %1941 = vmatmul.msk.bf16.gmra.mxu0 %vm1623_vm0, %v1590_v22 }
 0x91c   : > { %v1639_v24 = vpop.f32.mrf.mxu0 }
 0x91d   : > { %v1649_v27 = vadd.f32 %v1639_v24, %v2445_v1 }
 0x91f   : > { %v1657_v25 = vadd.f32 %v2010_v23, %v1649_v27 }
 0x921   : > { %1661 = vst.msk [vmem:[#allocation2] sm:$0xff] %vm699_vm1, %v1657_v25 }
 0x924   : > { %v1641_v29 = vpop.f32.mrf.mxu0 }
 0x925   : > { %v1650_v30 = vadd.f32 %v1641_v29, %v2450_v50 }
 0x927   : > { %v1658_v57 = vadd.f32 %v2010_v23, %v1650_v30 }
 0x929   : > { %1662 = vst.msk [vmem:[#allocation2 + $0x8] sm:$0xff] %vm699_vm1, %v1658_v57 }
 0x934   : > { %v1644_v49 = vpop.f32.mrf.mxu0 }
 0x935   : > { %v1651_v26 = vadd.f32 %v1644_v49, %v2455_v9 }
 0x937   : > { %v1659_v32 = vadd.f32 %v2010_v23, %v1651_v26 }
 0x939   : > { %1663 = vst.msk [vmem:[#allocation2 + $0x10] sm:$0xff] %vm699_vm1, %v1659_v32 }
 0x93c   : > { %v1646_v33 = vpop.f32.mrf.mxu0 }
 0x93d   : > { %v1652_v28 = vadd.f32 %v1646_v33, %v2460_v14  ;;  %1668 = sbr.rel (%p1942_p6) target bundleno = 2376 (0x948), region = 84 }
 0x93f   : > { %v1660_v34 = vadd.f32 %v2010_v23, %v1652_v28 }
 0x941   : > { %1664 = vst.msk [vmem:[#allocation2 + $0x18] sm:$0xff] %vm699_vm1, %v1660_v34 }
 0x942   : > { %v1669_v1 = vpack.c.bf16 %v1657_v25, %v1657_v25  ;;  %vm1673_vm2 = vcmask 257024   ;;  %v1670_v50 = vpack.c.bf16 %v1658_v57, %v1658_v57  ;;  %v1671_v37 = vpack.c.bf16 %v1659_v32, %v1659_v32 }
 0x943   : > { %v1672_v31 = vpack.c.bf16 %v1660_v34, %v1660_v34 }
 0x944   : > { %1674 = vst.msk [vmem:[%s2586_s14] sm:$0xf] %vm1673_vm2, %v1669_v1 }
 0x945   : > { %1675 = vst.msk [vmem:[%s2586_s14 + $0x4] sm:$0xf] %vm1673_vm2, %v1670_v50 }
 0x946   : > { %1676 = vst.msk [vmem:[%s2586_s14 + $0x8] sm:$0xf] %vm1673_vm2, %v1671_v37 }
 0x947   : > { %1677 = vst.msk [vmem:[%s2586_s14 + $0xc] sm:$0xf] %vm1673_vm2, %v1672_v31 }
 0x948 PF: > { %s2587_s28 = sld [smem:[#allocation5_spill]] }
 0x949   : > { %s2588_s29 = sld [smem:[#allocation4_spill]] }
 0x94a   : > { %s2589_s30 = sld [smem:[#allocation6_spill]] }
 0x94e   : > { %s24_s15 = sadd.s32 1, %s2587_s28  }
 0x94f   : > { %p21_p7 = scmp.ge.s32.totalorder %s24_s15, 4  }
 0x951   :  { %23 = sbr.rel (!%p21_p7) target bundleno = 5 (0x5), region = 151 }

// kernel: _lambda_.8
= control target key start
LH: loop header
LB: loop body
LE: loop exit
PB: predicated region body
PF: predicated region fallthrough
CT: control target
= control target key end

     0   :  { %s1714_s29 = smov 0   ;;  %s1716_s30 = smov 0   ;;  %s1944_s0 = inlined_call_operand.vmem [shape: bf16[16,32], index: 0, kind: input, shape index: {}]   ;;  %s1945_s1 = inlined_call_operand.vmem [shape: f32[1,2,8,8], index: 1, kind: input, shape index: {}]   ;;  %s1946_s2 = inlined_call_operand.vmem [shape: f32[2,1,32], index: 2, kind: input, shape index: {}]   ;;  %s1947_s3 = inlined_call_operand.vmem [shape: f32[2,1,32], index: 3, kind: input, shape index: {}]   ;;  %s1948_s4 = inlined_call_operand.vmem [shape: bf16[2,32,96], index: 4, kind: input, shape index: {}]   ;;  %s1949_s5 = inlined_call_operand.vmem [shape: f32[2,1,96], index: 5, kind: input, shape index: {}]   ;;  %s1950_s6 = inlined_call_operand.vmem [shape: bf16[2,32,32], index: 6, kind: input, shape index: {}]   ;;  %s1951_s7 = inlined_call_operand.vmem [shape: f32[2,1,32], index: 7, kind: input, shape index: {}]   ;;  %s1952_s8 = inlined_call_operand.vmem [shape: f32[2,1,32], index: 8, kind: input, shape index: {}]   ;;  %s1953_s9 = inlined_call_operand.vmem [shape: f32[2,1,32], index: 9, kind: input, shape index: {}]   ;;  %s1954_s10 = inlined_call_operand.vmem [shape: bf16[2,32,64], index: 10, kind: input, shape index: {}]   ;;  %s1955_s11 = inlined_call_operand.vmem [shape: f32[2,1,64], index: 11, kind: input, shape index: {}]   ;;  %s1956_s12 = inlined_call_operand.vmem [shape: bf16[2,64,32], index: 12, kind: input, shape index: {}]   ;;  %s1957_s13 = inlined_call_operand.vmem [shape: f32[2,1,32], index: 13, kind: input, shape index: {}]   ;;  %s1958_s14 = inlined_call_operand.vmem [shape: bf16[16,32], index: 14, kind: output, shape index: {}]  }
   0x1   :  { %1964 = sst [smem:[#allocation8_spill]] %s1945_s1  ;;  %s1718_s15 = smov 0  }
   0x2   :  { %1965 = sst [smem:[#allocation9_spill]] %s1948_s4 }
   0x3   :  { %1966 = sst [smem:[#allocation10_spill]] %s1950_s6 }
   0x4   :  { %1967 = sst [smem:[#allocation11_spill]] %s1958_s14 }
   0x5 LB: > { %1968 = sst [smem:[#allocation4_spill]] %s1626_s30  ;;  %s33_s16 = sadd.s32 1, %s1626_s30  ;;  %s1630_s15 = sphi %s1718_s15, %s24_s15   ;;  %s1626_s30 = sphi %s1716_s30, %s1983_s30   ;;  %s1622_s29 = sphi %s1714_s29, %s1982_s29  }
   0x6   : > { %1969 = sst [smem:[#allocation5_spill]] %s1630_s15  ;;  %p1453_p0 = scmp.ge.s32.totalorder %s1630_s15, 1 }
   0x7   : > { %p34_p1 = scmp.ge.s32.totalorder %s33_s16, 2  ;;  %p529_p2 = scmp.lt.s32.totalorder %s1630_s15, 3 }
   0x9   : > { %s1985_s16 = smov (%p34_p1, %s33_s16), 0  ;;  %p530_p3 = pnand %p1453_p0, %p529_p2 }
   0xa   : > { %1970 = sst [smem:[#allocation6_spill]] %s1985_s16 }
   0xb   : > { %533 = sbr.rel (%p530_p3) target bundleno = 1935 (0x78f), region = 76 }
  0x10   : > { %p625_p4 = scmp.lt.s32.totalorder %s1622_s29, 1  ;;  %s1971_s4 = sld [smem:[#allocation9_spill]] }
  0x11   : > { %s1972_s6 = sld [smem:[#allocation10_spill]]  ;;  %p1462_p5 = scmp.ne.s32.totalorder %s1622_s29, 0 }
  0x12   : > { %s1736_s17 = scalar_select %p625_p4, %s1622_s29, 1 }
  0x14   : > { %s1521_s24 = sshll.u32 %s1736_s17, 4  ;;  %s649_s1 = scalar_lea.vmem %s1952_s8, %s1736_s17 }
  0x15   : > { %s652_s27 = scalar_lea.vmem %s1953_s9, %s1736_s17  ;;  %s668_s25 = scalar_lea.vmem %s1957_s13, %s1736_s17 }
  0x16   : > { %s1754_s19 = scalar_lea.vmem %s1971_s4, %s1521_s24  ;;  %s1776_s4 = scalar_lea.vmem %s1954_s10, %s1521_s24 }
  0x17   : > { %s1759_s15 = scalar_lea.vmem %s1972_s6, %s1521_s24  ;;  %s660_s6 = scalar_lea.vmem %s1955_s11, %s1736_s17 }
  0x18   : > { %1973 = sst [smem:[#allocation7_spill]] %s1759_s15  ;;  %s1524_s15 = sshll.u32 %s1736_s17, 5 }
  0x19   : > { %s1786_s21 = scalar_lea.vmem %s1956_s12, %s1524_s15  ;;  %679 = sbr.rel (%p1462_p5) target bundleno = 35 (0x23), region = 80 }
  0x1e   : > { %v1536_v0 = vld [vmem:[%s1944_s0] sm:$0xff]   ;;  %vm684_vm0 = vcmask 261120  }
  0x1f   : > { %v1537_v1 = vunpack.c.l.bf16 %v1536_v0  ;;  %v1538_v2 = vunpack.c.h.bf16 %v1536_v0 }
  0x21   : > { %685 = vst.msk [vmem:[#allocation2] sm:$0xff] %vm684_vm0, %v1537_v1 }
  0x22   : > { %686 = vst.msk [vmem:[#allocation2 + $0x8] sm:$0xff] %vm684_vm0, %v1538_v2 }
  0x23 PF: > { %vm691_vm1 = vcmask 261120   ;;  %v1632_v7 = vmov 32.0   ;;  %v1526_v24 = vld [vmem:[%s1754_s19 + $0x8] sm:$0xff]  ;;  %v1525_v26 = vld [vmem:[%s1754_s19] sm:$0xff]  ;;  %s1974_s28 = scalar_lea.vmem %s1946_s2, %s1736_s17  ;;  %s1975_s16 = scalar_lea.vmem %s1947_s3, %s1736_s17  ;;  %vm799_vm9 = vcmask 130048   ;;  %vm843_vm10 = vcmask 64512  }
  0x24   : > { %1578 = vrcp.f32 %v1632_v7  ;;  %783 = vmatpush.bf16.msra.mxu0 %v1526_v24  ;;  %v1570_v45 = vld [vmem:[%s1974_s28] ss:$0 sm:$0xff]  ;;  %s1976_s23 = scalar_lea.vmem %s1949_s5, %s1736_s17  ;;  %s1633_s22 = smov 80   ;;  %vm873_vm11 = vcmask 1043456   ;;  %vm1035_vm12 = vcmask 261248  }
  0x25   : > { %v1571_v50 = vld [vmem:[%s1975_s16] ss:$0 sm:$0xff]  ;;  %s1634_s26 = smov 96   ;;  %s1635_s24 = smov 112  }
  0x26   : > { %v1572_v55 = vld [vmem:[%s1976_s23] ss:$0 sm:$0xff]  ;;  %s1977_s28 = sld [smem:[#allocation8_spill]]  ;;  %s1636_s16 = smov 64  }
  0x27   : > { %s1637_s14 = smov 48   ;;  %s1978_s20 = sld [smem:[#allocation7_spill]] }
  0x28   : > { %v1796_v3 = vld [vmem:[#allocation2] sm:$0xff]  ;;  %784 = vmatpush.bf16.msra.mxu0 %v1525_v26  ;;  %s1638_s23 = smov 16   ;;  %p1516_p6 = scmp.ne.s32.totalorder %s1622_s29, 1 }
  0x29   : > { %v692_v4 = vsel %vm691_vm1, %v1796_v3, 0.0  ;;  %v1800_v5 = vld [vmem:[#allocation2 + $0x8] sm:$0xff] }
  0x2a   : > { %693 = vadd.xlane.f32.xlu0 %v692_v4  ;;  %v695_v6 = vsel %vm691_vm1, %v1800_v5, 0.0  ;;  %v1579_v8 = vpop.eup %1578 }
  0x2b   : > { %v699_v9 = vmul.f32 32.0, %v1579_v8  ;;  %vm703_vm2 = vweird.f32 %v1579_v8 }
  0x2c   : > { %v1476_v24 = vld [vmem:[%s1977_s28 + $0x8] sm:$0xff] }
  0x2d   : > { %v700_v10 = vsub.f32 1.0, %v699_v9 }
  0x2f   : > { %v701_v11 = vmul.f32 %v1579_v8, %v700_v10 }
  0x31   : > { %v702_v12 = vadd.f32 %v1579_v8, %v701_v11 }
  0x32   : > { %696 = vadd.xlane.f32.xlu0 %v695_v6 }
  0x33   : > { %v1804_v13 = vsel %vm703_vm2, %v1579_v8, %v702_v12 }
  0x9d   : > { %v694_v14 = vpop.xlane.xlu0 %693 }
  0x9e   : > { %v705_v15 = vmul.f32 %v1804_v13, %v694_v14 }
  0xa0   : > { %v707_v16 = vsub.f32 %v1796_v3, %v705_v15  ;;  %v793_v15 = vld [vmem:[%s1977_s28] sm:$0xff] }
  0xa2   : > { %v709_v17 = vmul.f32 %v707_v16, %v707_v16 }
  0xa4   : > { %v711_v18 = vsel %vm691_vm1, %v709_v17, 0.0 }
  0xa5   : > { %712 = vadd.xlane.f32.xlu1 %v711_v18  ;;  %v697_v19 = vpop.xlane.xlu0 %696 }
  0xa6   : > { %v706_v20 = vmul.f32 %v1804_v13, %v697_v19 }
  0xa8   : > { %v708_v21 = vsub.f32 %v1800_v5, %v706_v20 }
  0xaa   : > { %v710_v22 = vmul.f32 %v708_v21, %v708_v21 }
  0xac   : > { %v714_v23 = vsel %vm691_vm1, %v710_v22, 0.0 }
  0xad   : > { %715 = vadd.xlane.f32.xlu1 %v714_v23 }
 0x118   : > { %v713_v25 = vpop.xlane.xlu1 %712 }
 0x119   : > { %v717_v27 = vmul.f32 %v713_v25, %v1804_v13 }
 0x11b   : > { %v719_v28 = vadd.f32 1e-05, %v717_v27 }
 0x11d   : > { %1580 = vrsqrt.f32 %v719_v28  ;;  %vm727_vm4 = vweird.f32 %v719_v28 }
 0x120   : > { %v716_v29 = vpop.xlane.xlu1 %715 }
 0x121   : > { %v718_v30 = vmul.f32 %v716_v29, %v1804_v13 }
 0x123   : > { %v1581_v31 = vpop.eup %1580  ;;  %v720_v32 = vadd.f32 1e-05, %v718_v30 }
 0x124   : > { %v722_v33 = vmul.f32 %v1581_v31, %v719_v28  ;;  %vm728_vm3 = vweird.f32 %v1581_v31 }
 0x125   : > { %1582 = vrsqrt.f32 %v720_v32  ;;  %vm729_vm5 = vmor %vm727_vm4, %vm728_vm3  ;;  %vm737_vm7 = vweird.f32 %v720_v32  ;;  %vm1227_vm4 = vcmask 523264  }
 0x126   : > { %v723_v34 = vmul.f32 %v1581_v31, %v722_v33 }
 0x128   : > { %v724_v35 = vmul.f32 0.5, %v723_v34 }
 0x12a   : > { %v725_v36 = vsub.f32 1.5, %v724_v35 }
 0x12b   : > { %v1583_v37 = vpop.eup %1582 }
 0x12c   : > { %v726_v38 = vmul.f32 %v1581_v31, %v725_v36  ;;  %v732_v39 = vmul.f32 %v1583_v37, %v720_v32  ;;  %vm738_vm6 = vweird.f32 %v1583_v37 }
 0x12d   : > { %vm739_vm8 = vmor %vm737_vm7, %vm738_vm6 }
 0x12e   : > { %v733_v40 = vmul.f32 %v1583_v37, %v732_v39  ;;  %v730_v41 = vsel %vm729_vm5, %v1581_v31, %v726_v38 }
 0x12f   : > { %v741_v44 = vmul.f32 %v730_v41, %v707_v16 }
 0x130   : > { %v734_v42 = vmul.f32 0.5, %v733_v40 }
 0x131   : > { %v746_v49 = vmul.f32 %v1570_v45, %v741_v44 }
 0x132   : > { %v735_v43 = vsub.f32 1.5, %v734_v42 }
 0x133   : > { %v751_v52 = vadd.f32 %v1571_v50, %v746_v49 }
 0x134   : > { %v736_v46 = vmul.f32 %v1583_v37, %v735_v43 }
 0x136   : > { %v740_v47 = vsel %vm739_vm8, %v1583_v37, %v736_v46 }
 0x137   : > { %v742_v48 = vmul.f32 %v740_v47, %v708_v21 }
 0x139   : > { %v747_v51 = vmul.f32 %v1570_v45, %v742_v48 }
 0x13b   : > { %v752_v53 = vadd.f32 %v1571_v50, %v747_v51 }
 0x13d   : > { %v753_v54 = vpack.c.bf16 %v752_v53, %v751_v52 }
 0x13f   : > { %1471 = vmatmul.msk.bf16.vlgmr.msra.gmra.mxu0 %vm691_vm1, %v753_v54 }
 0x1bc   : > { %v786_v56 = vpop.f32.mrf.mxu0 }
 0x1bd   : > { %v787_v57 = vadd.f32 %v1572_v55, %v786_v56 }
 0x1bf   : > { %v791_v58 = vpack.c.bf16 %v787_v57, %v787_v57 }
 0x1c1   : > { %v795_v59 = vunpack.c.l.b16 %v791_v58 }
 0x1c3   : > { %v796_v60 = vpack.c.b16 %v795_v59, %v795_v59 }
 0x1c4   : > { %v788_v61 = vpop.f32.mrf.mxu0 }
 0x1c5   : > { %v789_v62 = vadd.f32 %v1572_v55, %v788_v61  ;;  %917 = vrot.lane.b32.xlu0 %v796_v60, %s1633_s22  ;;  %797 = vrot.lane.b32.xlu2 %v796_v60, %s1634_s26 }
 0x1c7   : > { %v792_v63 = vpack.c.bf16 %v789_v62, %v789_v62 }
 0x1c9   : > { %v820_v0 = vunpack.c.l.b16 %v792_v63 }
 0x1cb   : > { %v1832_v1 = vpack.c.b16 %v820_v0, %v820_v0 }
 0x1cd   : > { %940 = vrot.lane.b32.xlu1 %v1832_v1, %s1633_s22  ;;  %822 = vrot.lane.b32.xlu2 %v1832_v1, %s1634_s26 }
 0x1d5   : > { %915 = vrot.lane.b32.xlu2 %v796_v60, %s1635_s24 }
 0x1dd   : > { %938 = vrot.lane.b32.xlu2 %v1832_v1, %s1635_s24  ;;  %s1979_s24 = scalar_lea.vmem %s1951_s7, %s1736_s17 }
 0x21f   : > { %v798_v2 = vpop.permute.xlu2 %797 }
 0x220   : > { %v804_v4 = vsel %vm799_vm9, %v798_v2, 0 }
 0x221   : > { %813 = vmatpush.bf16.xpose.msra.mxu1 %v804_v4 }
 0x227   : > { %v823_v6 = vpop.permute.xlu2 %822 }
 0x228   : > { %1472 = vmatmul.msk.bf16.vlgmr.msra.gmra.mxu1 %vm799_vm9, %v791_v58  ;;  %v828_v7 = vsel %vm799_vm9, %v823_v6, 0 }
 0x229   : > { %837 = vmatpush.bf16.xpose.msra.mxu2 %v828_v7 }
 0x22f   : > { %v916_v10 = vpop.permute.xlu2 %915 }
 0x230   : > { %1473 = vmatmul.msk.bf16.vlgmr.msra.gmra.mxu2 %vm799_vm9, %v792_v63 }
 0x237   : > { %v918_v8 = vpop.permute.xlu0 %917  ;;  %v939_v14 = vpop.permute.xlu2 %938 }
 0x238   : > { %v923_v9 = vsel %vm799_vm9, %v918_v8, 0 }
 0x239   : > { %932 = vmatpush.bf16.xpose.msrb.mxu0 %v923_v9 }
 0x23f   : > { %v941_v11 = vpop.permute.xlu1 %940 }
 0x240   : > { %1477 = vmatmul.msk.bf16.vlgmr.msrb.gmra.mxu0 %vm799_vm9, %v916_v10  ;;  %v946_v12 = vsel %vm799_vm9, %v941_v11, 0 }
 0x241   : > { %955 = vmatpush.bf16.xpose.msrb.mxu1 %v946_v12 }
 0x248   : > { %1478 = vmatmul.msk.bf16.vlgmr.msrb.gmra.mxu1 %vm799_vm9, %v939_v14 }
 0x2a5   : > { %v815_v16 = vpop.f32.mrf.mxu1 }
 0x2a6   : > { %v816_v17 = vadd.f32 %v815_v16, %v793_v15 }
 0x2a8   : > { %v844_v18 = vsel %vm843_vm10, %v816_v17, -inf }
 0x2a9   : > { %845 = vmax.xlane.f32.xlu2 %v844_v18 }
 0x2ad   : > { %v817_v19 = vpop.f32.mrf.mxu1 }
 0x2b3   : > { %v839_v20 = vpop.f32.mrf.mxu2 }
 0x2b4   : > { %v840_v21 = vadd.f32 %v839_v20, %v793_v15 }
 0x2b6   : > { %v847_v22 = vsel %vm843_vm10, %v840_v21, -inf }
 0x2b7   : > { %848 = vmax.xlane.f32.xlu0 %v847_v22 }
 0x2bb   : > { %v841_v23 = vpop.f32.mrf.mxu2 }
 0x2bd   : > { %v934_v25 = vpop.f32.mrf.mxu0 }
 0x2be   : > { %v935_v26 = vadd.f32 %v1476_v24, %v934_v25  ;;  %v1527_v25 = vld [vmem:[%s1978_s20] sm:$0xff] }
 0x2c0   : > { %v961_v27 = vsel %vm843_vm10, %v935_v26, -inf }
 0x2c1   : > { %962 = vmax.xlane.f32.xlu1 %v961_v27 }
 0x2c5   : > { %v936_v28 = vpop.f32.mrf.mxu0  ;;  %v957_v29 = vpop.f32.mrf.mxu1 }
 0x2c6   : > { %v958_v30 = vadd.f32 %v1476_v24, %v957_v29  ;;  %v1528_v24 = vld [vmem:[%s1978_s20 + $0x8] sm:$0xff] }
 0x2c7   : > { %1066 = vmatpush.bf16.msra.mxu0 %v1528_v24 }
 0x2c8   : > { %v964_v31 = vsel %vm843_vm10, %v958_v30, -inf }
 0x2c9   : > { %965 = vmax.xlane.f32.xlu2 %v964_v31  ;;  %v1573_v31 = vld [vmem:[%s1979_s24] ss:$0 sm:$0xff] }
 0x2cb   : > { %890 = vrot.lane.b32.xlu0 %v1832_v1, %s1636_s16  ;;  %1067 = vmatpush.bf16.msra.mxu0 %v1527_v25 }
 0x2cd   : > { %v959_v32 = vpop.f32.mrf.mxu1 }
 0x2e1   : > { %868 = vrot.lane.b32.xlu2 %v796_v60, %s1636_s16 }
 0x2e9   : > { %985 = vrot.lane.b32.xlu2 %v796_v60, %s1637_s14 }
 0x31c   : > { %v846_v33 = vpop.xlane.xlu2 %845 }
 0x31d   : > { %v850_v34 = vsub.f32 %v816_v17, %v846_v33 }
 0x31f   : > { %v852_v35 = vmul.f32 1.442695, %v850_v34 }
 0x321   : > { %1584 = vpow2.f32 %v852_v35 }
 0x327   : > { %v1585_v36 = vpop.eup %1584 }
 0x328   : > { %v856_v37 = vsel %vm843_vm10, %v1585_v36, 0.0 }
 0x329   : > { %857 = vadd.xlane.f32.xlu0 %v856_v37 }
 0x32a   : > { %v849_v38 = vpop.xlane.xlu0 %848 }
 0x32b   : > { %v851_v39 = vsub.f32 %v840_v21, %v849_v38 }
 0x32d   : > { %v854_v40 = vmul.f32 1.442695, %v851_v39 }
 0x32f   : > { %1586 = vpow2.f32 %v854_v40 }
 0x334   : > { %v963_v41 = vpop.xlane.xlu1 %962 }
 0x335   : > { %v1587_v42 = vpop.eup %1586  ;;  %v967_v43 = vsub.f32 %v935_v26, %v963_v41 }
 0x336   : > { %v859_v44 = vsel %vm843_vm10, %v1587_v42, 0.0 }
 0x337   : > { %v969_v45 = vmul.f32 1.442695, %v967_v43  ;;  %860 = vadd.xlane.f32.xlu1 %v859_v44 }
 0x339   : > { %1588 = vpow2.f32 %v969_v45 }
 0x33c   : > { %v966_v46 = vpop.xlane.xlu2 %965 }
 0x33d   : > { %v968_v47 = vsub.f32 %v958_v30, %v966_v46  ;;  %1006 = vrot.lane.b32.xlu0 %v1832_v1, %s1637_s14  ;;  %v891_v51 = vpop.permute.xlu0 %890 }
 0x33e   : > { %v896_v54 = vsel %vm873_vm11, %v891_v51, 0  ;;  %v1529_v51 = vld [vmem:[%s1776_s4] sm:$0xff] }
 0x33f   : > { %v1589_v48 = vpop.eup %1588  ;;  %v971_v49 = vmul.f32 1.442695, %v968_v47 }
 0x340   : > { %v973_v50 = vsel %vm843_vm10, %v1589_v48, 0.0 }
 0x341   : > { %1590 = vpow2.f32 %v971_v49  ;;  %974 = vadd.xlane.f32.xlu1 %v973_v50 }
 0x344   : > { %v869_v52 = vpop.permute.xlu2 %868 }
 0x345   : > { %v875_v53 = vsel %vm873_vm11, %v869_v52, 0 }
 0x346   : > { %884 = vmatpush.bf16.msra.mxu3 %v875_v53 }
 0x347   : > { %v1591_v55 = vpop.eup %1590 }
 0x348   : > { %v976_v56 = vsel %vm843_vm10, %v1591_v55, 0.0 }
 0x349   : > { %977 = vadd.xlane.f32.xlu1 %v976_v56 }
 0x34a   : > { %905 = vmatpush.bf16.msrb.mxu3 %v896_v54 }
 0x34c   : > { %v986_v57 = vpop.permute.xlu2 %985 }
 0x34d   : > { %v991_v58 = vsel %vm873_vm11, %v986_v57, 0 }
 0x34e   : > { %1000 = vmatpush.bf16.msrb.mxu2 %v991_v58 }
 0x39c   : > { %v858_v59 = vpop.xlane.xlu0 %857 }
 0x39d   : > { %1592 = vrcp.f32 %v858_v59 }
 0x3a3   : > { %v1593_v60 = vpop.eup %1592 }
 0x3a4   : > { %v864_v61 = vmul.f32 %v1593_v60, %v1585_v36 }
 0x3a6   : > { %v866_v62 = vpack.c.bf16 %v864_v61, %v864_v61 }
 0x3a8   : > { %1474 = vmatmul.msk.bf16.vlgmr.msra.gmra.mxu3 %vm843_vm10, %v866_v62 }
 0x3aa   : > { %v861_v63 = vpop.xlane.xlu1 %860 }
 0x3ab   : > { %1594 = vrcp.f32 %v861_v63 }
 0x3af   : > { %v1007_v0 = vpop.permute.xlu0 %1006 }
 0x3b0   : > { %v1012_v1 = vsel %vm873_vm11, %v1007_v0, 0 }
 0x3b1   : > { %v1595_v2 = vpop.eup %1594  ;;  %1021 = vmatpush.bf16.msra.mxu3 %v1012_v1 }
 0x3b2   : > { %v865_v4 = vmul.f32 %v1595_v2, %v1587_v42 }
 0x3b4   : > { %v975_v6 = vpop.xlane.xlu1 %974  ;;  %v867_v7 = vpack.c.bf16 %v865_v4, %v865_v4 }
 0x3b5   : > { %1596 = vrcp.f32 %v975_v6 }
 0x3b8   : > { %1475 = vmatmul.msk.bf16.vlgmr.msrb.gmra.mxu3 %vm843_vm10, %v867_v7 }
 0x3bb   : > { %v1597_v8 = vpop.eup %1596 }
 0x3bc   : > { %v981_v9 = vmul.f32 %v1597_v8, %v1589_v48  ;;  %v978_v10 = vpop.xlane.xlu1 %977  ;;  %v1530_v48 = vld [vmem:[%s1776_s4 + $0x8] sm:$0xff] }
 0x3bd   : > { %1598 = vrcp.f32 %v978_v10  ;;  %1168 = vmatpush.bf16.msra.mxu1 %v1530_v48 }
 0x3be   : > { %v983_v11 = vpack.c.bf16 %v981_v9, %v981_v9  ;;  %v1575_v9 = vld [vmem:[%s652_s27] ss:$0 sm:$0xff] }
 0x3c0   : > { %1479 = vmatmul.msk.bf16.vlgmr.msrb.gmra.mxu2 %vm843_vm10, %v983_v11 }
 0x3c1   : > { %1169 = vmatpush.bf16.msra.mxu1 %v1529_v51 }
 0x3c3   : > { %v1599_v12 = vpop.eup %1598 }
 0x3c4   : > { %v982_v14 = vmul.f32 %v1599_v12, %v1591_v55 }
 0x3c6   : > { %v984_v15 = vpack.c.bf16 %v982_v14, %v982_v14 }
 0x3c8   : > { %1480 = vmatmul.msk.bf16.vlgmr.msra.gmra.mxu3 %vm843_vm10, %v984_v15 }
 0x42b   : > { %v886_v16 = vpop.f32.mrf.mxu3 }
 0x42c   : > { %911 = vst.msk [vmem:[#allocation3] sm:$0xff] %vm799_vm9, %v886_v16 }
 0x433   : > { %v888_v17 = vpop.f32.mrf.mxu3 }
 0x434   : > { %v1534_v17 = vld [vmem:[%s1786_s21 + $0x18] sm:$0xff] }
 0x435   : > { %1235 = vmatpush.bf16.msra.mxu2 %v1534_v17 }
 0x43b   : > { %v907_v18 = vpop.f32.mrf.mxu3 }
 0x43c   : > { %912 = vst.msk [vmem:[#allocation3 + $0x8] sm:$0xff] %vm799_vm9, %v907_v18  ;;  %v1533_v18 = vld [vmem:[%s1786_s21 + $0x10] sm:$0xff] }
 0x43d   : > { %1236 = vmatpush.bf16.msra.mxu2 %v1533_v18 }
 0x443   : > { %v909_v19 = vpop.f32.mrf.mxu3  ;;  %v1002_v20 = vpop.f32.mrf.mxu2 }
 0x444   : > { %1029 = vrot.lane.b32.xlu1 %v1002_v20, %s1638_s23  ;;  %v1532_v19 = vld [vmem:[%s1786_s21 + $0x8] sm:$0xff]  ;;  %v1576_v20 = vld [vmem:[%s660_s6] ss:$0 sm:$0xff] }
 0x445   : > { %1237 = vmatpush.bf16.msra.mxu2 %v1532_v19 }
 0x44b   : > { %v1004_v21 = vpop.f32.mrf.mxu2  ;;  %v1023_v22 = vpop.f32.mrf.mxu3 }
 0x44c   : > { %1031 = vrot.lane.b32.xlu2 %v1023_v22, %s1638_s23  ;;  %v1531_v21 = vld [vmem:[%s1786_s21] sm:$0xff] }
 0x44d   : > { %1238 = vmatpush.bf16.msra.mxu2 %v1531_v21 }
 0x453   : > { %v1025_v23 = vpop.f32.mrf.mxu3 }
 0x4a6   : > { %v1032_v26 = vpop.permute.xlu2 %1031 }
 0x4a7   : > { %1037 = vst.msk [vmem:[#allocation3 + $0x8] sm:$0xff] %vm1035_vm12, %v1032_v26 }
 0x4ae   : > { %v1039_v29 = vld [vmem:[#allocation3 + $0x8] sm:$0xff] }
 0x4b6   : > { %v1030_v27 = vpop.permute.xlu1 %1029 }
 0x4b7   : > { %1036 = vst.msk [vmem:[#allocation3] sm:$0xff] %vm1035_vm12, %v1030_v27 }
 0x4be   : > { %v1038_v28 = vld [vmem:[#allocation3] sm:$0xff] }
 0x4bf   : > { %v1040_v30 = vpack.c.bf16 %v1039_v29, %v1038_v28 }
 0x4c1   : > { %1489 = vmatmul.msk.bf16.vlgmr.msra.gmra.mxu0 %vm691_vm1, %v1040_v30 }
 0x53e   : > { %v1069_v32 = vpop.f32.mrf.mxu0 }
 0x53f   : > { %v1074_v33 = vadd.f32 %v1069_v32, %v1796_v3 }
 0x541   : > { %v1880_v34 = vadd.f32 %v1573_v31, %v1074_v33 }
 0x543   : > { %v1084_v35 = vsel %vm691_vm1, %v1880_v34, 0.0 }
 0x544   : > { %1085 = vadd.xlane.f32.xlu0 %v1084_v35 }
 0x546   : > { %v1071_v36 = vpop.f32.mrf.mxu0 }
 0x547   : > { %v1075_v37 = vadd.f32 %v1071_v36, %v1800_v5 }
 0x549   : > { %v1885_v38 = vadd.f32 %v1573_v31, %v1075_v37 }
 0x54b   : > { %v1087_v39 = vsel %vm691_vm1, %v1885_v38, 0.0 }
 0x54c   : > { %1088 = vadd.xlane.f32.xlu2 %v1087_v39 }
 0x5b7   : > { %v1086_v40 = vpop.xlane.xlu0 %1085 }
 0x5b8   : > { %v1090_v3 = vmul.f32 %v1086_v40, %v1804_v13 }
 0x5ba   : > { %v1092_v41 = vsub.f32 %v1880_v34, %v1090_v3 }
 0x5bc   : > { %v1094_v42 = vmul.f32 %v1092_v41, %v1092_v41 }
 0x5be   : > { %v1096_v43 = vsel %vm691_vm1, %v1094_v42, 0.0 }
 0x5bf   : > { %1097 = vadd.xlane.f32.xlu1 %v1096_v43  ;;  %v1089_v44 = vpop.xlane.xlu2 %1088 }
 0x5c0   : > { %v1091_v5 = vmul.f32 %v1089_v44, %v1804_v13 }
 0x5c2   : > { %v1093_v45 = vsub.f32 %v1885_v38, %v1091_v5 }
 0x5c4   : > { %v1095_v46 = vmul.f32 %v1093_v45, %v1093_v45 }
 0x5c6   : > { %v1099_v47 = vsel %vm691_vm1, %v1095_v46, 0.0 }
 0x5c7   : > { %1100 = vadd.xlane.f32.xlu0 %v1099_v47 }
 0x632   : > { %v1098_v49 = vpop.xlane.xlu1 %1097 }
 0x633   : > { %v1102_v50 = vmul.f32 %v1098_v49, %v1804_v13 }
 0x635   : > { %v1104_v52 = vadd.f32 1e-05, %v1102_v50 }
 0x637   : > { %1600 = vrsqrt.f32 %v1104_v52  ;;  %vm1112_vm14 = vweird.f32 %v1104_v52 }
 0x63a   : > { %v1101_v53 = vpop.xlane.xlu0 %1100 }
 0x63b   : > { %v1103_v54 = vmul.f32 %v1101_v53, %v1804_v13  ;;  %v1574_v13 = vld [vmem:[%s649_s1] ss:$0 sm:$0xff] }
 0x63d   : > { %v1601_v55 = vpop.eup %1600  ;;  %v1105_v56 = vadd.f32 1e-05, %v1103_v54 }
 0x63e   : > { %v1107_v57 = vmul.f32 %v1601_v55, %v1104_v52  ;;  %vm1113_vm13 = vweird.f32 %v1601_v55 }
 0x63f   : > { %1602 = vrsqrt.f32 %v1105_v56  ;;  %vm1114_vm15 = vmor %vm1112_vm14, %vm1113_vm13  ;;  %vm1122_vm2 = vweird.f32 %v1105_v56 }
 0x640   : > { %v1108_v58 = vmul.f32 %v1601_v55, %v1107_v57 }
 0x642   : > { %v1109_v59 = vmul.f32 0.5, %v1108_v58 }
 0x644   : > { %v1110_v60 = vsub.f32 1.5, %v1109_v59 }
 0x645   : > { %v1603_v61 = vpop.eup %1602 }
 0x646   : > { %v1111_v62 = vmul.f32 %v1601_v55, %v1110_v60  ;;  %v1117_v63 = vmul.f32 %v1603_v61, %v1105_v56  ;;  %vm1123_vm0 = vweird.f32 %v1603_v61 }
 0x647   : > { %vm1124_vm3 = vmor %vm1122_vm2, %vm1123_vm0 }
 0x648   : > { %v1118_v0 = vmul.f32 %v1603_v61, %v1117_v63  ;;  %v1115_v1 = vsel %vm1114_vm15, %v1601_v55, %v1111_v62 }
 0x649   : > { %v1126_v6 = vmul.f32 %v1115_v1, %v1092_v41 }
 0x64a   : > { %v1119_v2 = vmul.f32 0.5, %v1118_v0 }
 0x64b   : > { %v1131_v10 = vmul.f32 %v1574_v13, %v1126_v6 }
 0x64c   : > { %v1120_v4 = vsub.f32 1.5, %v1119_v2 }
 0x64d   : > { %v1136_v14 = vadd.f32 %v1575_v9, %v1131_v10 }
 0x64e   : > { %v1121_v7 = vmul.f32 %v1603_v61, %v1120_v4 }
 0x650   : > { %v1125_v8 = vsel %vm1124_vm3, %v1603_v61, %v1121_v7 }
 0x651   : > { %v1127_v11 = vmul.f32 %v1125_v8, %v1093_v45  ;;  %v1577_v45 = vld [vmem:[%s668_s25] ss:$0 sm:$0xff]  ;;  %s1980_s25 = sld [smem:[#allocation11_spill]] (!%p1516_p6) }
 0x653   : > { %v1132_v12 = vmul.f32 %v1574_v13, %v1127_v11 }
 0x655   : > { %v1137_v15 = vadd.f32 %v1575_v9, %v1132_v12 }
 0x657   : > { %v1138_v16 = vpack.c.bf16 %v1137_v15, %v1136_v14 }
 0x659   : > { %1498 = vmatmul.msk.bf16.vlgmr.msra.gmra.mxu1 %vm691_vm1, %v1138_v16 }
 0x6d6   : > { %v1171_v22 = vpop.f32.mrf.mxu1 }
 0x6d7   : > { %v1172_v23 = vadd.f32 %v1576_v20, %v1171_v22 }
 0x6d9   : > { %v1176_v24 = vmul.f32 %v1172_v23, %v1172_v23 }
 0x6db   : > { %v1178_v25 = vmul.f32 %v1176_v24, %v1172_v23 }
 0x6dd   : > { %v1180_v26 = vmul.f32 0.044715, %v1178_v25 }
 0x6de   : > { %v1173_v27 = vpop.f32.mrf.mxu1 }
 0x6df   : > { %v1182_v28 = vadd.f32 %v1180_v26, %v1172_v23  ;;  %v1174_v29 = vadd.f32 %v1576_v20, %v1173_v27 }
 0x6e1   : > { %v1184_v30 = vmul.f32 0.7978846, %v1182_v28  ;;  %v1177_v31 = vmul.f32 %v1174_v29, %v1174_v29 }
 0x6e3   : > { %v1179_v32 = vmul.f32 %v1177_v31, %v1174_v29  ;;  %1604 = vtanh.f32 %v1184_v30 }
 0x6e5   : > { %v1181_v33 = vmul.f32 0.044715, %v1179_v32 }
 0x6e7   : > { %v1183_v35 = vadd.f32 %v1181_v33, %v1174_v29 }
 0x6e9   : > { %v1185_v36 = vmul.f32 0.7978846, %v1183_v35  ;;  %v1605_v37 = vpop.eup %1604 }
 0x6ea   : > { %v1188_v39 = vadd.f32 1.0, %v1605_v37 }
 0x6eb   : > { %1606 = vtanh.f32 %v1185_v36 }
 0x6ec   : > { %v1190_v3 = vmul.f32 0.5, %v1188_v39 }
 0x6ee   : > { %v1192_v43 = vmul.f32 %v1190_v3, %v1172_v23 }
 0x6f1   : > { %v1607_v40 = vpop.eup %1606 }
 0x6f2   : > { %v1189_v41 = vadd.f32 1.0, %v1607_v40 }
 0x6f4   : > { %v1191_v42 = vmul.f32 0.5, %v1189_v41 }
 0x6f6   : > { %v1193_v44 = vmul.f32 %v1191_v42, %v1174_v29 }
 0x6f8   : > { %v1194_v5 = vpack.c.bf16 %v1193_v44, %v1192_v43 }
 0x6fa   : > { %1515 = vmatmul.msk.bf16.vlgmr.msra.gmra.mxu2 %vm1227_vm4, %v1194_v5 }
 0x77d   : > { %v1240_v46 = vpop.f32.mrf.mxu2 }
 0x77e   : > { %v1245_v47 = vadd.f32 %v1240_v46, %v1880_v34 }
 0x780   : > { %v1251_v48 = vadd.f32 %v1577_v45, %v1245_v47 }
 0x782   : > { %1253 = vst.msk [vmem:[#allocation2] sm:$0xff] %vm691_vm1, %v1251_v48 }
 0x785   : > { %v1242_v49 = vpop.f32.mrf.mxu2 }
 0x786   : > { %v1246_v50 = vadd.f32 %v1242_v49, %v1885_v38  ;;  %1258 = sbr.rel (%p1516_p6) target bundleno = 1935 (0x78f), region = 84 }
 0x788   : > { %v1252_v51 = vadd.f32 %v1577_v45, %v1246_v50 }
 0x78a   : > { %1254 = vst.msk [vmem:[#allocation2 + $0x8] sm:$0xff] %vm691_vm1, %v1252_v51 }
 0x78b   : > { %v1259_v52 = vpack.c.bf16 %v1251_v48, %v1251_v48  ;;  %vm1261_vm5 = vcmask 257024   ;;  %v1260_v53 = vpack.c.bf16 %v1252_v51, %v1252_v51 }
 0x78d   : > { %1262 = vst.msk [vmem:[%s1980_s25] sm:$0xf] %vm1261_vm5, %v1259_v52 }
 0x78e   : > { %1263 = vst.msk [vmem:[%s1980_s25 + $0x4] sm:$0xf] %vm1261_vm5, %v1260_v53 }
 0x78f PF: > { %s1981_s20 = sld [smem:[#allocation5_spill]] }
 0x790   : > { %s1982_s29 = sld [smem:[#allocation4_spill]] }
 0x791   : > { %s1983_s30 = sld [smem:[#allocation6_spill]] }
 0x795   : > { %s24_s15 = sadd.s32 1, %s1981_s20  }
 0x796   : > { %p21_p7 = scmp.ge.s32.totalorder %s24_s15, 4  }
 0x798   :  { %23 = sbr.rel (!%p21_p7) target bundleno = 5 (0x5), region = 151 }

</bundles_post_ra>
